<compile_context>
chip_gen: v6e
topology: v6e:2x2x1
jax: 0.10.0
libtpu: 0.0.40
codegen_flags: <defaults>
</compile_context>

<pallas_src>
import math

import jax
import jax.numpy as jnp
from jax.experimental import pallas as pl
from jax.experimental.pallas import tpu as pltpu

# ----------------------- model configuration (small) -----------------------
B = 2             # batch size
S = 8             # click-sequence length (power of two)
D = 32            # id_dimension (power of two)
H = 2             # nhead
HD = D // H       # per-head dim
L = 2             # mlp_layers (hyper-network depth)
V = 64            # id_vocab
P = 1024          # position-embedding vocab
FF = 4 * D        # transformer dim_feedforward
OUT_W = 128       # lane-dense output width

LOG2S = int(math.log2(S))
LOG2D = int(math.log2(D))
assert 1 << LOG2S == S and 1 << LOG2D == D and H * HD == D


# --------------------------------- kernel ---------------------------------
def _layernorm(x, g, b, eps=1e-5):
    mu = jnp.mean(x, axis=-1, keepdims=True)
    var = jnp.mean((x - mu) ** 2, axis=-1, keepdims=True)
    return (x - mu) * jax.lax.rsqrt(var + eps) * g + b


def sasrec_fused_kernel(clk_ref, tid_ref, emb_ref, pos_ref,
                        w_seq, b_seq, w_t1, b_t1, w_t2, b_t2,
                        w_qkv, b_qkv, wo, bo, ln1_g, ln1_b,
                        wf1, bf1, wf2, bf2, ln2_g, ln2_b,
                        gflat_ref, g0_ref, hbw_ref, hbb_ref,
                        out_ref):
    f32 = jnp.float32
    ids = clk_ref[...]                                   # (B*S, 1) int32, flattened click seq
    tid = tid_ref[...]                                   # (B, 1)   int32
    emb = emb_ref[...]                                   # (V, D)

    # ---- embedding lookups as one-hot matmuls (in-kernel gather) ----
    oh_hist = (jax.lax.broadcasted_iota(jnp.int32, (B * S, V), 1) == ids).astype(f32)
    hist = jnp.dot(oh_hist, emb, preferred_element_type=f32)              # (B*S, D)
    pos = pos_ref[...]                                                    # (S, D)
    hist = hist + jnp.concatenate([pos] * B, axis=0)                      # + positional emb

    oh_tgt = (jax.lax.broadcasted_iota(jnp.int32, (B, V), 1) == tid).astype(f32)
    tgt = jnp.dot(oh_tgt, emb, preferred_element_type=f32)                # (B, D)

    # ---- target_trans: Tanh(Linear) -> Linear ----
    tgt = jnp.tanh(jnp.dot(tgt, w_t1[...], preferred_element_type=f32) + b_t1[...])
    tgt = jnp.dot(tgt, w_t2[...], preferred_element_type=f32) + b_t2[...]

    # ---- seq_trans: Tanh(Linear); batch folded into matmul M dim ----
    h = jnp.tanh(jnp.dot(hist, w_seq[...], preferred_element_type=f32) + b_seq[...])  # (B*S, D)

    # ---- TransformerEncoderLayer (post-norm, ReLU FFN, dropout=0, no padding mask) ----
    qkv = jnp.dot(h, w_qkv[...], preferred_element_type=f32) + b_qkv[...]             # (B*S, 3D)
    qi = jax.lax.broadcasted_iota(jnp.int32, (B * S, B * S), 0)
    ki = jax.lax.broadcasted_iota(jnp.int32, (B * S, B * S), 1)
    same_sample = (qi >> LOG2S) == (ki >> LOG2S)          # block-diagonal batch mask
    scale = 1.0 / math.sqrt(HD)

    ctx_heads = []
    for hh in range(H):                                   # static loop over heads
        q = qkv[:, hh * HD:(hh + 1) * HD]
        k = qkv[:, D + hh * HD:D + (hh + 1) * HD]
        v = qkv[:, 2 * D + hh * HD:2 * D + (hh + 1) * HD]
        sc = jax.lax.dot_general(q, k, dimension_numbers=(((1,), (1,)), ((), ())),
                                 preferred_element_type=f32) * scale      # (B*S, B*S)
        sc = jnp.where(same_sample, sc, jnp.float32(-1e30))
        sc = sc - jnp.max(sc, axis=-1, keepdims=True)
        p = jnp.exp(sc)
        p = p * pl.reciprocal(jnp.sum(p, axis=-1, keepdims=True), approx=True)
        ctx_heads.append(jnp.dot(p, v, preferred_element_type=f32))       # (B*S, HD)
    ctx = jnp.concatenate(ctx_heads, axis=1)                              # (B*S, D)
    attn = jnp.dot(ctx, wo[...], preferred_element_type=f32) + bo[...]

    y = _layernorm(h + attn, ln1_g[...], ln1_b[...])
    ff = jnp.maximum(jnp.dot(y, wf1[...], preferred_element_type=f32) + bf1[...], 0.0)
    ff = jnp.dot(ff, wf2[...], preferred_element_type=f32) + bf2[...]
    y2 = _layernorm(y + ff, ln2_g[...], ln2_b[...])                       # (B*S, D)

    # ---- seq_length + row gather at seq_length (block-diagonal one-hot matmul) ----
    bi = jax.lax.broadcasted_iota(jnp.int32, (B, B * S), 0)
    ji = jax.lax.broadcasted_iota(jnp.int32, (B, B * S), 1)
    in_block = (ji >> LOG2S) == bi                                        # (B, B*S) bool
    valid = (ids != 0).astype(f32)                                        # (B*S, 1)
    counts = jnp.dot(in_block.astype(f32), valid, preferred_element_type=f32)  # (B, 1)
    sl = jnp.maximum(counts.astype(jnp.int32) - 1, 0)                     # (B, 1) seq_length
    sel = (in_block & ((ji & (S - 1)) == sl)).astype(f32)                 # (B, B*S)
    us = jnp.dot(sel, y2, preferred_element_type=f32)                     # (B, D) user_state
    zc = jnp.dot(sel, h, preferred_element_type=f32)                      # (B, D) hyper cond.

    # ---- hyper-network generate + apply (fused, outer-product formulation) ----
    # x @ reshape(z@G + g0, (D,D)) == (z ⊗ x) @ Gflat + x @ G0
    lane = jax.lax.broadcasted_iota(jnp.int32, (D, D * D), 1)
    row = jax.lax.broadcasted_iota(jnp.int32, (D, D * D), 0)
    e_z = ((lane >> LOG2D) == row).astype(f32)                            # (D, D*D)
    e_x = ((lane & (D - 1)) == row).astype(f32)                           # (D, D*D)
    zrep = jnp.dot(zc, e_z, preferred_element_type=f32)                   # (B, D*D)

    x = us
    for i in range(L):                                                    # static loop
        xrep = jnp.dot(x, e_x, preferred_element_type=f32)                # (B, D*D)
        xw = jnp.dot(zrep * xrep, gflat_ref[i], preferred_element_type=f32)   # (B, D)
        xw = xw + jnp.dot(x, g0_ref[i], preferred_element_type=f32)
        bias_i = jnp.dot(zc, hbw_ref[i], preferred_element_type=f32) + hbb_ref[i]
        x = xw + bias_i
        if i < L - 1:
            x = jnp.tanh(x)

    # ---- final score: <user_embedding, target_embed>, stored lane-dense ----
    dot = jnp.sum(x * tgt, axis=-1, keepdims=True)                        # (B, 1)
    out_ref[...] = jnp.broadcast_to(dot, (B, OUT_W))


# ------------------------------ parameter init ------------------------------
def init_params(key):
    def nrm(k, shape, s=0.1):
        return jax.random.normal(k, shape, jnp.float32) * s

    ks = jax.random.split(key, 20)
    p = {}
    p["id_emb"] = nrm(ks[0], (V, D))
    p["pos_emb"] = nrm(ks[1], (P, D))
    p["pos_s"] = p["pos_emb"][:S]                                   # only first S rows used
    p["w_seq"] = nrm(ks[2], (D, D)); p["b_seq"] = nrm(ks[3], (1, D), 0.01)
    p["w_t1"] = nrm(ks[4], (D, D)); p["b_t1"] = nrm(ks[5], (1, D), 0.01)
    p["w_t2"] = nrm(ks[6], (D, D)); p["b_t2"] = nrm(ks[7], (1, D), 0.01)
    # MultiheadAttention in_proj (q|k|v concatenated along out dim) and out_proj, (in, out)
    p["w_qkv"] = nrm(ks[8], (D, 3 * D)); p["b_qkv"] = nrm(ks[9], (1, 3 * D), 0.01)
    p["wo"] = nrm(ks[10], (D, D)); p["bo"] = nrm(ks[11], (1, D), 0.01)
    p["ln1_g"] = jnp.ones((1, D), jnp.float32); p["ln1_b"] = jnp.zeros((1, D), jnp.float32)
    p["wf1"] = nrm(ks[12], (D, FF)); p["bf1"] = nrm(ks[13], (1, FF), 0.01)
    p["wf2"] = nrm(ks[14], (FF, D)); p["bf2"] = nrm(ks[15], (1, D), 0.01)
    p["ln2_g"] = jnp.ones((1, D), jnp.float32); p["ln2_b"] = jnp.zeros((1, D), jnp.float32)
    # Hyper-network generators (per layer):
    #   weight-gen Linear(D -> D*D): weight hw_w (D, D*D), bias hw_b (1, D*D)
    #   bias-gen   Linear(D -> D)  : weight hbw  (D, D),   bias hbb  (1, D)
    # Pre-reshaped ONCE here for the in-kernel outer-product formulation:
    #   gflat[i, d*D + r, c] = hw_w[i, d, r*D + c];  g0[i, r, c] = hw_b[i, 0, r*D + c]
    hw_w = nrm(ks[16], (L, D, D * D), 0.05)
    hw_b = nrm(ks[17], (L, 1, D * D), 0.01)
    p["gflat"] = hw_w.reshape(L, D * D, D)
    p["g0"] = hw_b.reshape(L, D, D)
    p["hbw"] = nrm(ks[18], (L, D, D), 0.05)
    p["hbb"] = nrm(ks[19], (L, 1, D), 0.01)
    return p


# ------------------------------ forward wrapper ------------------------------
def sasrec_forward(params, target_id, click_seq):
    clk_flat = click_seq.reshape(B * S, 1).astype(jnp.int32)
    tid = target_id.reshape(B, 1).astype(jnp.int32)

    inputs = [clk_flat, tid, params["id_emb"], params["pos_s"],
              params["w_seq"], params["b_seq"],
              params["w_t1"], params["b_t1"], params["w_t2"], params["b_t2"],
              params["w_qkv"], params["b_qkv"], params["wo"], params["bo"],
              params["ln1_g"], params["ln1_b"],
              params["wf1"], params["bf1"], params["wf2"], params["bf2"],
              params["ln2_g"], params["ln2_b"],
              params["gflat"], params["g0"], params["hbw"], params["hbb"]]

    def full_spec(a):
        nd = a.ndim
        return pl.BlockSpec(a.shape, lambda i, nd=nd: (0,) * nd)

    out = pl.pallas_call(
        sasrec_fused_kernel,
        out_shape=jax.ShapeDtypeStruct((B, OUT_W), jnp.float32),
        grid=(1,),
        in_specs=[full_spec(a) for a in inputs],
        out_specs=pl.BlockSpec((B, OUT_W), lambda i: (0, 0)),
        compiler_params=pltpu.CompilerParams(dimension_semantics=("arbitrary",)),
    )(*inputs)

    output = out[:, :1]                           # dot is broadcast over lanes; take col 0
    ood_pred = jnp.zeros((B, 1), jnp.float32)     # pred=False branch: zeros
    return output, ood_pred


# ----------------------------------- main -----------------------------------
if __name__ == "__main__":
    key = jax.random.PRNGKey(0)
    pk, dk1, dk2 = jax.random.split(key, 3)
    params = init_params(pk)

    click_seq = jax.random.randint(dk1, (B, S), 1, V).astype(jnp.int32)
    click_seq = click_seq.at[:, -2:].set(0)       # trailing padding exercises mask / seq_length
    target_id = jax.random.randint(dk2, (B,), 1, V).astype(jnp.int32)

    fwd = jax.jit(sasrec_forward)
    output, ood_pred = fwd(params, target_id, click_seq)
    jax.block_until_ready((output, ood_pred))

    assert output.shape == (B, 1) and ood_pred.shape == (B, 1)
    assert bool(jnp.all(jnp.isfinite(output)))
    print("KERNEL_OK")
</pallas_src>

<mosaic_0001>
module attributes {stable_mosaic.version = 11 : i64} {
  func.func @sasrec_fused_kernel(%arg0: i32, %arg1: memref<16x1xi32, #tpu.memory_space<vmem>>, %arg2: memref<2x1xi32, #tpu.memory_space<vmem>>, %arg3: memref<64x32xf32, #tpu.memory_space<vmem>>, %arg4: memref<8x32xf32, #tpu.memory_space<vmem>>, %arg5: memref<32x32xf32, #tpu.memory_space<vmem>>, %arg6: memref<1x32xf32, #tpu.memory_space<vmem>>, %arg7: memref<32x32xf32, #tpu.memory_space<vmem>>, %arg8: memref<1x32xf32, #tpu.memory_space<vmem>>, %arg9: memref<32x32xf32, #tpu.memory_space<vmem>>, %arg10: memref<1x32xf32, #tpu.memory_space<vmem>>, %arg11: memref<32x96xf32, #tpu.memory_space<vmem>>, %arg12: memref<1x96xf32, #tpu.memory_space<vmem>>, %arg13: memref<32x32xf32, #tpu.memory_space<vmem>>, %arg14: memref<1x32xf32, #tpu.memory_space<vmem>>, %arg15: memref<1x32xf32, #tpu.memory_space<vmem>>, %arg16: memref<1x32xf32, #tpu.memory_space<vmem>>, %arg17: memref<32x128xf32, #tpu.memory_space<vmem>>, %arg18: memref<1x128xf32, #tpu.memory_space<vmem>>, %arg19: memref<128x32xf32, #tpu.memory_space<vmem>>, %arg20: memref<1x32xf32, #tpu.memory_space<vmem>>, %arg21: memref<1x32xf32, #tpu.memory_space<vmem>>, %arg22: memref<1x32xf32, #tpu.memory_space<vmem>>, %arg23: memref<2x1024x32xf32, #tpu.memory_space<vmem>>, %arg24: memref<2x32x32xf32, #tpu.memory_space<vmem>>, %arg25: memref<2x32x32xf32, #tpu.memory_space<vmem>>, %arg26: memref<2x1x32xf32, #tpu.memory_space<vmem>>, %arg27: memref<2x128xf32, #tpu.memory_space<vmem>>) attributes {dimension_semantics = [#tpu.dimension_semantics<arbitrary>], iteration_bounds = array<i64: 1>, scalar_prefetch = 0 : i64, scratch_operands = 0 : i64, tpu.core_type = #tpu.core_type<tc>, window_params = [{pipeline_mode = #tpu.pipeline_mode<synchronous>, transform_indices = @transform_0, window_bounds = array<i64: 16, 1>}, {pipeline_mode = #tpu.pipeline_mode<synchronous>, transform_indices = @transform_1, window_bounds = array<i64: 2, 1>}, {pipeline_mode = #tpu.pipeline_mode<synchronous>, transform_indices = @transform_2, window_bounds = array<i64: 64, 32>}, {pipeline_mode = #tpu.pipeline_mode<synchronous>, transform_indices = @transform_3, window_bounds = array<i64: 8, 32>}, {pipeline_mode = #tpu.pipeline_mode<synchronous>, transform_indices = @transform_4, window_bounds = array<i64: 32, 32>}, {pipeline_mode = #tpu.pipeline_mode<synchronous>, transform_indices = @transform_5, window_bounds = array<i64: 1, 32>}, {pipeline_mode = #tpu.pipeline_mode<synchronous>, transform_indices = @transform_6, window_bounds = array<i64: 32, 32>}, {pipeline_mode = #tpu.pipeline_mode<synchronous>, transform_indices = @transform_7, window_bounds = array<i64: 1, 32>}, {pipeline_mode = #tpu.pipeline_mode<synchronous>, transform_indices = @transform_8, window_bounds = array<i64: 32, 32>}, {pipeline_mode = #tpu.pipeline_mode<synchronous>, transform_indices = @transform_9, window_bounds = array<i64: 1, 32>}, {pipeline_mode = #tpu.pipeline_mode<synchronous>, transform_indices = @transform_10, window_bounds = array<i64: 32, 96>}, {pipeline_mode = #tpu.pipeline_mode<synchronous>, transform_indices = @transform_11, window_bounds = array<i64: 1, 96>}, {pipeline_mode = #tpu.pipeline_mode<synchronous>, transform_indices = @transform_12, window_bounds = array<i64: 32, 32>}, {pipeline_mode = #tpu.pipeline_mode<synchronous>, transform_indices = @transform_13, window_bounds = array<i64: 1, 32>}, {pipeline_mode = #tpu.pipeline_mode<synchronous>, transform_indices = @transform_14, window_bounds = array<i64: 1, 32>}, {pipeline_mode = #tpu.pipeline_mode<synchronous>, transform_indices = @transform_15, window_bounds = array<i64: 1, 32>}, {pipeline_mode = #tpu.pipeline_mode<synchronous>, transform_indices = @transform_16, window_bounds = array<i64: 32, 128>}, {pipeline_mode = #tpu.pipeline_mode<synchronous>, transform_indices = @transform_17, window_bounds = array<i64: 1, 128>}, {pipeline_mode = #tpu.pipeline_mode<synchronous>, transform_indices = @transform_18, window_bounds = array<i64: 128, 32>}, {pipeline_mode = #tpu.pipeline_mode<synchronous>, transform_indices = @transform_19, window_bounds = array<i64: 1, 32>}, {pipeline_mode = #tpu.pipeline_mode<synchronous>, transform_indices = @transform_20, window_bounds = array<i64: 1, 32>}, {pipeline_mode = #tpu.pipeline_mode<synchronous>, transform_indices = @transform_21, window_bounds = array<i64: 1, 32>}, {pipeline_mode = #tpu.pipeline_mode<synchronous>, transform_indices = @transform_22, window_bounds = array<i64: 2, 1024, 32>}, {pipeline_mode = #tpu.pipeline_mode<synchronous>, transform_indices = @transform_23, window_bounds = array<i64: 2, 32, 32>}, {pipeline_mode = #tpu.pipeline_mode<synchronous>, transform_indices = @transform_24, window_bounds = array<i64: 2, 32, 32>}, {pipeline_mode = #tpu.pipeline_mode<synchronous>, transform_indices = @transform_25, window_bounds = array<i64: 2, 1, 32>}, {pipeline_mode = #tpu.pipeline_mode<synchronous>, transform_indices = @transform_26, window_bounds = array<i64: 2, 128>}]} {
    %c0 = arith.constant 0 : index
    %c0_0 = arith.constant 0 : index
    %0 = vector.load %arg1[%c0, %c0_0] : memref<16x1xi32, #tpu.memory_space<vmem>>, vector<16x1xi32>
    %c0_1 = arith.constant 0 : index
    %c0_2 = arith.constant 0 : index
    %1 = vector.load %arg2[%c0_1, %c0_2] : memref<2x1xi32, #tpu.memory_space<vmem>>, vector<2x1xi32>
    %c0_3 = arith.constant 0 : index
    %c0_4 = arith.constant 0 : index
    %2 = vector.load %arg3[%c0_3, %c0_4] : memref<64x32xf32, #tpu.memory_space<vmem>>, vector<64x32xf32>
    %3 = tpu.iota {dimensions = array<i32: 1>} : vector<16x64xi32>
    %4 = vector.broadcast %0 : vector<16x1xi32> to vector<16x64xi32>
    %5 = arith.cmpi eq, %3, %4 : vector<16x64xi32>
    %6 = arith.extui %5 : vector<16x64xi1> to vector<16x64xi32>
    %7 = arith.sitofp %6 : vector<16x64xi32> to vector<16x64xf32>
    %cst = arith.constant dense<0.000000e+00> : vector<16x32xf32>
    %8 = tpu.matmul %7, %2, %cst {dimension_numbers = #tpu.dot_dimension_numbers<[1], [0], [0], [1], [0, 0, 1, 1], [], []>} : vector<16x64xf32>, vector<64x32xf32>, vector<16x32xf32> -> vector<16x32xf32>
    %c0_5 = arith.constant 0 : index
    %c0_6 = arith.constant 0 : index
    %9 = vector.load %arg4[%c0_5, %c0_6] : memref<8x32xf32, #tpu.memory_space<vmem>>, vector<8x32xf32>
    %10 = tpu.concatenate %9, %9 in 0 : vector<8x32xf32>, vector<8x32xf32> -> vector<16x32xf32>
    %11 = arith.addf %8, %10 : vector<16x32xf32>
    %12 = tpu.iota {dimensions = array<i32: 1>} : vector<2x64xi32>
    %13 = vector.broadcast %1 : vector<2x1xi32> to vector<2x64xi32>
    %14 = arith.cmpi eq, %12, %13 : vector<2x64xi32>
    %15 = arith.extui %14 : vector<2x64xi1> to vector<2x64xi32>
    %16 = arith.sitofp %15 : vector<2x64xi32> to vector<2x64xf32>
    %cst_7 = arith.constant dense<0.000000e+00> : vector<2x32xf32>
    %17 = tpu.matmul %16, %2, %cst_7 {dimension_numbers = #tpu.dot_dimension_numbers<[1], [0], [0], [1], [0, 0, 1, 1], [], []>} : vector<2x64xf32>, vector<64x32xf32>, vector<2x32xf32> -> vector<2x32xf32>
    %c0_8 = arith.constant 0 : index
    %c0_9 = arith.constant 0 : index
    %18 = vector.load %arg7[%c0_8, %c0_9] : memref<32x32xf32, #tpu.memory_space<vmem>>, vector<32x32xf32>
    %cst_10 = arith.constant dense<0.000000e+00> : vector<2x32xf32>
    %19 = tpu.matmul %17, %18, %cst_10 {dimension_numbers = #tpu.dot_dimension_numbers<[1], [0], [0], [1], [0, 0, 1, 1], [], []>} : vector<2x32xf32>, vector<32x32xf32>, vector<2x32xf32> -> vector<2x32xf32>
    %c0_11 = arith.constant 0 : index
    %c0_12 = arith.constant 0 : index
    %20 = vector.load %arg8[%c0_11, %c0_12] : memref<1x32xf32, #tpu.memory_space<vmem>>, vector<1x32xf32>
    %21 = vector.broadcast %20 : vector<1x32xf32> to vector<2x32xf32>
    %22 = arith.addf %19, %21 : vector<2x32xf32>
    %23 = math.tanh %22 : vector<2x32xf32>
    %c0_13 = arith.constant 0 : index
    %c0_14 = arith.constant 0 : index
    %24 = vector.load %arg9[%c0_13, %c0_14] : memref<32x32xf32, #tpu.memory_space<vmem>>, vector<32x32xf32>
    %cst_15 = arith.constant dense<0.000000e+00> : vector<2x32xf32>
    %25 = tpu.matmul %23, %24, %cst_15 {dimension_numbers = #tpu.dot_dimension_numbers<[1], [0], [0], [1], [0, 0, 1, 1], [], []>} : vector<2x32xf32>, vector<32x32xf32>, vector<2x32xf32> -> vector<2x32xf32>
    %c0_16 = arith.constant 0 : index
    %c0_17 = arith.constant 0 : index
    %26 = vector.load %arg10[%c0_16, %c0_17] : memref<1x32xf32, #tpu.memory_space<vmem>>, vector<1x32xf32>
    %27 = vector.broadcast %26 : vector<1x32xf32> to vector<2x32xf32>
    %28 = arith.addf %25, %27 : vector<2x32xf32>
    %c0_18 = arith.constant 0 : index
    %c0_19 = arith.constant 0 : index
    %29 = vector.load %arg5[%c0_18, %c0_19] : memref<32x32xf32, #tpu.memory_space<vmem>>, vector<32x32xf32>
    %cst_20 = arith.constant dense<0.000000e+00> : vector<16x32xf32>
    %30 = tpu.matmul %11, %29, %cst_20 {dimension_numbers = #tpu.dot_dimension_numbers<[1], [0], [0], [1], [0, 0, 1, 1], [], []>} : vector<16x32xf32>, vector<32x32xf32>, vector<16x32xf32> -> vector<16x32xf32>
    %c0_21 = arith.constant 0 : index
    %c0_22 = arith.constant 0 : index
    %31 = vector.load %arg6[%c0_21, %c0_22] : memref<1x32xf32, #tpu.memory_space<vmem>>, vector<1x32xf32>
    %32 = vector.broadcast %31 : vector<1x32xf32> to vector<16x32xf32>
    %33 = arith.addf %30, %32 : vector<16x32xf32>
    %34 = math.tanh %33 : vector<16x32xf32>
    %c0_23 = arith.constant 0 : index
    %c0_24 = arith.constant 0 : index
    %35 = vector.load %arg11[%c0_23, %c0_24] : memref<32x96xf32, #tpu.memory_space<vmem>>, vector<32x96xf32>
    %cst_25 = arith.constant dense<0.000000e+00> : vector<16x96xf32>
    %36 = tpu.matmul %34, %35, %cst_25 {dimension_numbers = #tpu.dot_dimension_numbers<[1], [0], [0], [1], [0, 0, 1, 1], [], []>} : vector<16x32xf32>, vector<32x96xf32>, vector<16x96xf32> -> vector<16x96xf32>
    %c0_26 = arith.constant 0 : index
    %c0_27 = arith.constant 0 : index
    %37 = vector.load %arg12[%c0_26, %c0_27] : memref<1x96xf32, #tpu.memory_space<vmem>>, vector<1x96xf32>
    %38 = vector.broadcast %37 : vector<1x96xf32> to vector<16x96xf32>
    %39 = arith.addf %36, %38 : vector<16x96xf32>
    %40 = tpu.iota {dimensions = array<i32: 0>} : vector<16x16xi32>
    %41 = tpu.iota {dimensions = array<i32: 1>} : vector<16x16xi32>
    %c3_i32 = arith.constant 3 : i32
    %42 = vector.broadcast %c3_i32 : i32 to vector<16x16xi32>
    %43 = arith.shrsi %40, %42 : vector<16x16xi32>
    %c3_i32_28 = arith.constant 3 : i32
    %44 = vector.broadcast %c3_i32_28 : i32 to vector<16x16xi32>
    %45 = arith.shrsi %41, %44 : vector<16x16xi32>
    %46 = arith.cmpi eq, %43, %45 : vector<16x16xi32>
    %47 = vector.extract_strided_slice %39 {offsets = [0, 0], sizes = [16, 16], strides = [1, 1]} : vector<16x96xf32> to vector<16x16xf32>
    %48 = vector.extract_strided_slice %39 {offsets = [0, 32], sizes = [16, 16], strides = [1, 1]} : vector<16x96xf32> to vector<16x16xf32>
    %49 = vector.extract_strided_slice %39 {offsets = [0, 64], sizes = [16, 16], strides = [1, 1]} : vector<16x96xf32> to vector<16x16xf32>
    %cst_29 = arith.constant dense<0.000000e+00> : vector<16x16xf32>
    %50 = tpu.matmul %47, %48, %cst_29 {dimension_numbers = #tpu.dot_dimension_numbers<[1], [1], [0], [0], [0, 0, 1, 0], [], []>} : vector<16x16xf32>, vector<16x16xf32>, vector<16x16xf32> -> vector<16x16xf32>
    %cst_30 = arith.constant 2.500000e-01 : f32
    %51 = vector.broadcast %cst_30 : f32 to vector<16x16xf32>
    %52 = arith.mulf %50, %51 : vector<16x16xf32>
    %cst_31 = arith.constant -1.000000e+30 : f32
    %53 = vector.broadcast %cst_31 : f32 to vector<16x16xf32>
    %54 = arith.select %46, %52, %53 : vector<16x16xi1>, vector<16x16xf32>
    %cst_32 = arith.constant dense<0xFF800000> : vector<16xf32>
    %55 = vector.multi_reduction <maximumf>, %54, %cst_32 [1] : vector<16x16xf32> to vector<16xf32>
    %56 = vector.shape_cast %55 : vector<16xf32> to vector<16x1xf32>
    %57 = vector.broadcast %56 : vector<16x1xf32> to vector<16x16xf32>
    %58 = arith.subf %54, %57 : vector<16x16xf32>
    %59 = math.exp %58 : vector<16x16xf32>
    %cst_33 = arith.constant dense<0.000000e+00> : vector<16xf32>
    %60 = vector.multi_reduction <add>, %59, %cst_33 [1] : vector<16x16xf32> to vector<16xf32>
    %61 = vector.shape_cast %60 : vector<16xf32> to vector<16x1xf32>
    %62 = tpu.reciprocal %61 {approx = true} : vector<16x1xf32> -> vector<16x1xf32>
    %63 = vector.broadcast %62 : vector<16x1xf32> to vector<16x16xf32>
    %64 = arith.mulf %59, %63 : vector<16x16xf32>
    %cst_34 = arith.constant dense<0.000000e+00> : vector<16x16xf32>
    %65 = tpu.matmul %64, %49, %cst_34 {dimension_numbers = #tpu.dot_dimension_numbers<[1], [0], [0], [1], [0, 0, 1, 1], [], []>} : vector<16x16xf32>, vector<16x16xf32>, vector<16x16xf32> -> vector<16x16xf32>
    %66 = vector.extract_strided_slice %39 {offsets = [0, 16], sizes = [16, 16], strides = [1, 1]} : vector<16x96xf32> to vector<16x16xf32>
    %67 = vector.extract_strided_slice %39 {offsets = [0, 48], sizes = [16, 16], strides = [1, 1]} : vector<16x96xf32> to vector<16x16xf32>
    %68 = vector.extract_strided_slice %39 {offsets = [0, 80], sizes = [16, 16], strides = [1, 1]} : vector<16x96xf32> to vector<16x16xf32>
    %cst_35 = arith.constant dense<0.000000e+00> : vector<16x16xf32>
    %69 = tpu.matmul %66, %67, %cst_35 {dimension_numbers = #tpu.dot_dimension_numbers<[1], [1], [0], [0], [0, 0, 1, 0], [], []>} : vector<16x16xf32>, vector<16x16xf32>, vector<16x16xf32> -> vector<16x16xf32>
    %cst_36 = arith.constant 2.500000e-01 : f32
    %70 = vector.broadcast %cst_36 : f32 to vector<16x16xf32>
    %71 = arith.mulf %69, %70 : vector<16x16xf32>
    %cst_37 = arith.constant -1.000000e+30 : f32
    %72 = vector.broadcast %cst_37 : f32 to vector<16x16xf32>
    %73 = arith.select %46, %71, %72 : vector<16x16xi1>, vector<16x16xf32>
    %cst_38 = arith.constant dense<0xFF800000> : vector<16xf32>
    %74 = vector.multi_reduction <maximumf>, %73, %cst_38 [1] : vector<16x16xf32> to vector<16xf32>
    %75 = vector.shape_cast %74 : vector<16xf32> to vector<16x1xf32>
    %76 = vector.broadcast %75 : vector<16x1xf32> to vector<16x16xf32>
    %77 = arith.subf %73, %76 : vector<16x16xf32>
    %78 = math.exp %77 : vector<16x16xf32>
    %cst_39 = arith.constant dense<0.000000e+00> : vector<16xf32>
    %79 = vector.multi_reduction <add>, %78, %cst_39 [1] : vector<16x16xf32> to vector<16xf32>
    %80 = vector.shape_cast %79 : vector<16xf32> to vector<16x1xf32>
    %81 = tpu.reciprocal %80 {approx = true} : vector<16x1xf32> -> vector<16x1xf32>
    %82 = vector.broadcast %81 : vector<16x1xf32> to vector<16x16xf32>
    %83 = arith.mulf %78, %82 : vector<16x16xf32>
    %cst_40 = arith.constant dense<0.000000e+00> : vector<16x16xf32>
    %84 = tpu.matmul %83, %68, %cst_40 {dimension_numbers = #tpu.dot_dimension_numbers<[1], [0], [0], [1], [0, 0, 1, 1], [], []>} : vector<16x16xf32>, vector<16x16xf32>, vector<16x16xf32> -> vector<16x16xf32>
    %85 = tpu.concatenate %65, %84 in 1 : vector<16x16xf32>, vector<16x16xf32> -> vector<16x32xf32>
    %c0_41 = arith.constant 0 : index
    %c0_42 = arith.constant 0 : index
    %86 = vector.load %arg13[%c0_41, %c0_42] : memref<32x32xf32, #tpu.memory_space<vmem>>, vector<32x32xf32>
    %cst_43 = arith.constant dense<0.000000e+00> : vector<16x32xf32>
    %87 = tpu.matmul %85, %86, %cst_43 {dimension_numbers = #tpu.dot_dimension_numbers<[1], [0], [0], [1], [0, 0, 1, 1], [], []>} : vector<16x32xf32>, vector<32x32xf32>, vector<16x32xf32> -> vector<16x32xf32>
    %c0_44 = arith.constant 0 : index
    %c0_45 = arith.constant 0 : index
    %88 = vector.load %arg14[%c0_44, %c0_45] : memref<1x32xf32, #tpu.memory_space<vmem>>, vector<1x32xf32>
    %89 = vector.broadcast %88 : vector<1x32xf32> to vector<16x32xf32>
    %90 = arith.addf %87, %89 : vector<16x32xf32>
    %91 = arith.addf %34, %90 : vector<16x32xf32>
    %c0_46 = arith.constant 0 : index
    %c0_47 = arith.constant 0 : index
    %92 = vector.load %arg15[%c0_46, %c0_47] : memref<1x32xf32, #tpu.memory_space<vmem>>, vector<1x32xf32>
    %c0_48 = arith.constant 0 : index
    %c0_49 = arith.constant 0 : index
    %93 = vector.load %arg16[%c0_48, %c0_49] : memref<1x32xf32, #tpu.memory_space<vmem>>, vector<1x32xf32>
    %cst_50 = arith.constant dense<0.000000e+00> : vector<16xf32>
    %94 = vector.multi_reduction <add>, %91, %cst_50 [1] : vector<16x32xf32> to vector<16xf32>
    %95 = vector.shape_cast %94 : vector<16xf32> to vector<16x1xf32>
    %cst_51 = arith.constant 3.200000e+01 : f32
    %96 = vector.broadcast %cst_51 : f32 to vector<16x1xf32>
    %97 = arith.divf %95, %96 : vector<16x1xf32>
    %98 = vector.broadcast %97 : vector<16x1xf32> to vector<16x32xf32>
    %99 = arith.subf %91, %98 : vector<16x32xf32>
    %100 = arith.mulf %99, %99 : vector<16x32xf32>
    %cst_52 = arith.constant dense<0.000000e+00> : vector<16xf32>
    %101 = vector.multi_reduction <add>, %100, %cst_52 [1] : vector<16x32xf32> to vector<16xf32>
    %102 = vector.shape_cast %101 : vector<16xf32> to vector<16x1xf32>
    %cst_53 = arith.constant 3.200000e+01 : f32
    %103 = vector.broadcast %cst_53 : f32 to vector<16x1xf32>
    %104 = arith.divf %102, %103 : vector<16x1xf32>
    %105 = vector.broadcast %97 : vector<16x1xf32> to vector<16x32xf32>
    %106 = arith.subf %91, %105 : vector<16x32xf32>
    %cst_54 = arith.constant 9.99999974E-6 : f32
    %107 = vector.broadcast %cst_54 : f32 to vector<16x1xf32>
    %108 = arith.addf %104, %107 : vector<16x1xf32>
    %109 = math.rsqrt %108 : vector<16x1xf32>
    %110 = vector.broadcast %109 : vector<16x1xf32> to vector<16x32xf32>
    %111 = arith.mulf %106, %110 : vector<16x32xf32>
    %112 = vector.broadcast %92 : vector<1x32xf32> to vector<16x32xf32>
    %113 = arith.mulf %111, %112 : vector<16x32xf32>
    %114 = vector.broadcast %93 : vector<1x32xf32> to vector<16x32xf32>
    %115 = arith.addf %113, %114 : vector<16x32xf32>
    %c0_55 = arith.constant 0 : index
    %c0_56 = arith.constant 0 : index
    %116 = vector.load %arg17[%c0_55, %c0_56] : memref<32x128xf32, #tpu.memory_space<vmem>>, vector<32x128xf32>
    %cst_57 = arith.constant dense<0.000000e+00> : vector<16x128xf32>
    %117 = tpu.matmul %115, %116, %cst_57 {dimension_numbers = #tpu.dot_dimension_numbers<[1], [0], [0], [1], [0, 0, 1, 1], [], []>} : vector<16x32xf32>, vector<32x128xf32>, vector<16x128xf32> -> vector<16x128xf32>
    %c0_58 = arith.constant 0 : index
    %c0_59 = arith.constant 0 : index
    %118 = vector.load %arg18[%c0_58, %c0_59] : memref<1x128xf32, #tpu.memory_space<vmem>>, vector<1x128xf32>
    %119 = vector.broadcast %118 : vector<1x128xf32> to vector<16x128xf32>
    %120 = arith.addf %117, %119 : vector<16x128xf32>
    %cst_60 = arith.constant 0.000000e+00 : f32
    %121 = vector.broadcast %cst_60 : f32 to vector<16x128xf32>
    %122 = arith.maximumf %120, %121 : vector<16x128xf32>
    %c0_61 = arith.constant 0 : index
    %c0_62 = arith.constant 0 : index
    %123 = vector.load %arg19[%c0_61, %c0_62] : memref<128x32xf32, #tpu.memory_space<vmem>>, vector<128x32xf32>
    %cst_63 = arith.constant dense<0.000000e+00> : vector<16x32xf32>
    %124 = tpu.matmul %122, %123, %cst_63 {dimension_numbers = #tpu.dot_dimension_numbers<[1], [0], [0], [1], [0, 0, 1, 1], [], []>} : vector<16x128xf32>, vector<128x32xf32>, vector<16x32xf32> -> vector<16x32xf32>
    %c0_64 = arith.constant 0 : index
    %c0_65 = arith.constant 0 : index
    %125 = vector.load %arg20[%c0_64, %c0_65] : memref<1x32xf32, #tpu.memory_space<vmem>>, vector<1x32xf32>
    %126 = vector.broadcast %125 : vector<1x32xf32> to vector<16x32xf32>
    %127 = arith.addf %124, %126 : vector<16x32xf32>
    %128 = arith.addf %115, %127 : vector<16x32xf32>
    %c0_66 = arith.constant 0 : index
    %c0_67 = arith.constant 0 : index
    %129 = vector.load %arg21[%c0_66, %c0_67] : memref<1x32xf32, #tpu.memory_space<vmem>>, vector<1x32xf32>
    %c0_68 = arith.constant 0 : index
    %c0_69 = arith.constant 0 : index
    %130 = vector.load %arg22[%c0_68, %c0_69] : memref<1x32xf32, #tpu.memory_space<vmem>>, vector<1x32xf32>
    %cst_70 = arith.constant dense<0.000000e+00> : vector<16xf32>
    %131 = vector.multi_reduction <add>, %128, %cst_70 [1] : vector<16x32xf32> to vector<16xf32>
    %132 = vector.shape_cast %131 : vector<16xf32> to vector<16x1xf32>
    %cst_71 = arith.constant 3.200000e+01 : f32
    %133 = vector.broadcast %cst_71 : f32 to vector<16x1xf32>
    %134 = arith.divf %132, %133 : vector<16x1xf32>
    %135 = vector.broadcast %134 : vector<16x1xf32> to vector<16x32xf32>
    %136 = arith.subf %128, %135 : vector<16x32xf32>
    %137 = arith.mulf %136, %136 : vector<16x32xf32>
    %cst_72 = arith.constant dense<0.000000e+00> : vector<16xf32>
    %138 = vector.multi_reduction <add>, %137, %cst_72 [1] : vector<16x32xf32> to vector<16xf32>
    %139 = vector.shape_cast %138 : vector<16xf32> to vector<16x1xf32>
    %cst_73 = arith.constant 3.200000e+01 : f32
    %140 = vector.broadcast %cst_73 : f32 to vector<16x1xf32>
    %141 = arith.divf %139, %140 : vector<16x1xf32>
    %142 = vector.broadcast %134 : vector<16x1xf32> to vector<16x32xf32>
    %143 = arith.subf %128, %142 : vector<16x32xf32>
    %cst_74 = arith.constant 9.99999974E-6 : f32
    %144 = vector.broadcast %cst_74 : f32 to vector<16x1xf32>
    %145 = arith.addf %141, %144 : vector<16x1xf32>
    %146 = math.rsqrt %145 : vector<16x1xf32>
    %147 = vector.broadcast %146 : vector<16x1xf32> to vector<16x32xf32>
    %148 = arith.mulf %143, %147 : vector<16x32xf32>
    %149 = vector.broadcast %129 : vector<1x32xf32> to vector<16x32xf32>
    %150 = arith.mulf %148, %149 : vector<16x32xf32>
    %151 = vector.broadcast %130 : vector<1x32xf32> to vector<16x32xf32>
    %152 = arith.addf %150, %151 : vector<16x32xf32>
    %153 = tpu.iota {dimensions = array<i32: 0>} : vector<2x16xi32>
    %154 = tpu.iota {dimensions = array<i32: 1>} : vector<2x16xi32>
    %c3_i32_75 = arith.constant 3 : i32
    %155 = vector.broadcast %c3_i32_75 : i32 to vector<2x16xi32>
    %156 = arith.shrsi %154, %155 : vector<2x16xi32>
    %157 = arith.cmpi eq, %156, %153 : vector<2x16xi32>
    %c0_i32 = arith.constant 0 : i32
    %158 = vector.broadcast %c0_i32 : i32 to vector<16x1xi32>
    %159 = arith.cmpi ne, %0, %158 : vector<16x1xi32>
    %160 = arith.extui %159 : vector<16x1xi1> to vector<16x1xi32>
    %161 = arith.sitofp %160 : vector<16x1xi32> to vector<16x1xf32>
    %162 = arith.extui %157 : vector<2x16xi1> to vector<2x16xi32>
    %163 = arith.sitofp %162 : vector<2x16xi32> to vector<2x16xf32>
    %cst_76 = arith.constant dense<0.000000e+00> : vector<2x1xf32>
    %164 = tpu.matmul %163, %161, %cst_76 {dimension_numbers = #tpu.dot_dimension_numbers<[1], [0], [0], [1], [0, 0, 1, 1], [], []>} : vector<2x16xf32>, vector<16x1xf32>, vector<2x1xf32> -> vector<2x1xf32>
    %165 = arith.fptosi %164 : vector<2x1xf32> to vector<2x1xi32>
    %c1_i32 = arith.constant 1 : i32
    %166 = vector.broadcast %c1_i32 : i32 to vector<2x1xi32>
    %167 = arith.subi %165, %166 : vector<2x1xi32>
    %c0_i32_77 = arith.constant 0 : i32
    %168 = vector.broadcast %c0_i32_77 : i32 to vector<2x1xi32>
    %169 = arith.maxsi %167, %168 : vector<2x1xi32>
    %c7_i32 = arith.constant 7 : i32
    %170 = vector.broadcast %c7_i32 : i32 to vector<2x16xi32>
    %171 = arith.andi %154, %170 : vector<2x16xi32>
    %172 = vector.broadcast %169 : vector<2x1xi32> to vector<2x16xi32>
    %173 = arith.cmpi eq, %171, %172 : vector<2x16xi32>
    %174 = arith.andi %157, %173 : vector<2x16xi1>
    %175 = arith.extui %174 : vector<2x16xi1> to vector<2x16xi32>
    %176 = arith.sitofp %175 : vector<2x16xi32> to vector<2x16xf32>
    %cst_78 = arith.constant dense<0.000000e+00> : vector<2x32xf32>
    %177 = tpu.matmul %176, %152, %cst_78 {dimension_numbers = #tpu.dot_dimension_numbers<[1], [0], [0], [1], [0, 0, 1, 1], [], []>} : vector<2x16xf32>, vector<16x32xf32>, vector<2x32xf32> -> vector<2x32xf32>
    %cst_79 = arith.constant dense<0.000000e+00> : vector<2x32xf32>
    %178 = tpu.matmul %176, %34, %cst_79 {dimension_numbers = #tpu.dot_dimension_numbers<[1], [0], [0], [1], [0, 0, 1, 1], [], []>} : vector<2x16xf32>, vector<16x32xf32>, vector<2x32xf32> -> vector<2x32xf32>
    %179 = tpu.iota {dimensions = array<i32: 1>} : vector<32x1024xi32>
    %180 = tpu.iota {dimensions = array<i32: 0>} : vector<32x1024xi32>
    %c5_i32 = arith.constant 5 : i32
    %181 = vector.broadcast %c5_i32 : i32 to vector<32x1024xi32>
    %182 = arith.shrsi %179, %181 : vector<32x1024xi32>
    %183 = arith.cmpi eq, %182, %180 : vector<32x1024xi32>
    %184 = arith.extui %183 : vector<32x1024xi1> to vector<32x1024xi32>
    %185 = arith.sitofp %184 : vector<32x1024xi32> to vector<32x1024xf32>
    %c31_i32 = arith.constant 31 : i32
    %186 = vector.broadcast %c31_i32 : i32 to vector<32x1024xi32>
    %187 = arith.andi %179, %186 : vector<32x1024xi32>
    %188 = arith.cmpi eq, %187, %180 : vector<32x1024xi32>
    %189 = arith.extui %188 : vector<32x1024xi1> to vector<32x1024xi32>
    %190 = arith.sitofp %189 : vector<32x1024xi32> to vector<32x1024xf32>
    %cst_80 = arith.constant dense<0.000000e+00> : vector<2x1024xf32>
    %191 = tpu.matmul %178, %185, %cst_80 {dimension_numbers = #tpu.dot_dimension_numbers<[1], [0], [0], [1], [0, 0, 1, 1], [], []>} : vector<2x32xf32>, vector<32x1024xf32>, vector<2x1024xf32> -> vector<2x1024xf32>
    %cst_81 = arith.constant dense<0.000000e+00> : vector<2x1024xf32>
    %192 = tpu.matmul %177, %190, %cst_81 {dimension_numbers = #tpu.dot_dimension_numbers<[1], [0], [0], [1], [0, 0, 1, 1], [], []>} : vector<2x32xf32>, vector<32x1024xf32>, vector<2x1024xf32> -> vector<2x1024xf32>
    %193 = arith.mulf %191, %192 : vector<2x1024xf32>
    %c0_82 = arith.constant 0 : index
    %c0_83 = arith.constant 0 : index
    %c0_84 = arith.constant 0 : index
    %194 = vector.load %arg23[%c0_82, %c0_83, %c0_84] : memref<2x1024x32xf32, #tpu.memory_space<vmem>>, vector<1x1024x32xf32>
    %195 = vector.shape_cast %194 : vector<1x1024x32xf32> to vector<1024x32xf32>
    %cst_85 = arith.constant dense<0.000000e+00> : vector<2x32xf32>
    %196 = tpu.matmul %193, %195, %cst_85 {dimension_numbers = #tpu.dot_dimension_numbers<[1], [0], [0], [1], [0, 0, 1, 1], [], []>} : vector<2x1024xf32>, vector<1024x32xf32>, vector<2x32xf32> -> vector<2x32xf32>
    %c0_86 = arith.constant 0 : index
    %c0_87 = arith.constant 0 : index
    %c0_88 = arith.constant 0 : index
    %197 = vector.load %arg24[%c0_86, %c0_87, %c0_88] : memref<2x32x32xf32, #tpu.memory_space<vmem>>, vector<1x32x32xf32>
    %198 = vector.shape_cast %197 : vector<1x32x32xf32> to vector<32x32xf32>
    %cst_89 = arith.constant dense<0.000000e+00> : vector<2x32xf32>
    %199 = tpu.matmul %177, %198, %cst_89 {dimension_numbers = #tpu.dot_dimension_numbers<[1], [0], [0], [1], [0, 0, 1, 1], [], []>} : vector<2x32xf32>, vector<32x32xf32>, vector<2x32xf32> -> vector<2x32xf32>
    %200 = arith.addf %196, %199 : vector<2x32xf32>
    %c0_90 = arith.constant 0 : index
    %c0_91 = arith.constant 0 : index
    %c0_92 = arith.constant 0 : index
    %201 = vector.load %arg25[%c0_90, %c0_91, %c0_92] : memref<2x32x32xf32, #tpu.memory_space<vmem>>, vector<1x32x32xf32>
    %202 = vector.shape_cast %201 : vector<1x32x32xf32> to vector<32x32xf32>
    %cst_93 = arith.constant dense<0.000000e+00> : vector<2x32xf32>
    %203 = tpu.matmul %178, %202, %cst_93 {dimension_numbers = #tpu.dot_dimension_numbers<[1], [0], [0], [1], [0, 0, 1, 1], [], []>} : vector<2x32xf32>, vector<32x32xf32>, vector<2x32xf32> -> vector<2x32xf32>
    %c0_94 = arith.constant 0 : index
    %c0_95 = arith.constant 0 : index
    %c0_96 = arith.constant 0 : index
    %204 = vector.load %arg26[%c0_94, %c0_95, %c0_96] : memref<2x1x32xf32, #tpu.memory_space<vmem>>, vector<1x1x32xf32>
    %205 = vector.shape_cast %204 : vector<1x1x32xf32> to vector<1x32xf32>
    %206 = vector.broadcast %205 : vector<1x32xf32> to vector<2x32xf32>
    %207 = arith.addf %203, %206 : vector<2x32xf32>
    %208 = arith.addf %200, %207 : vector<2x32xf32>
    %209 = math.tanh %208 : vector<2x32xf32>
    %cst_97 = arith.constant dense<0.000000e+00> : vector<2x1024xf32>
    %210 = tpu.matmul %209, %190, %cst_97 {dimension_numbers = #tpu.dot_dimension_numbers<[1], [0], [0], [1], [0, 0, 1, 1], [], []>} : vector<2x32xf32>, vector<32x1024xf32>, vector<2x1024xf32> -> vector<2x1024xf32>
    %211 = arith.mulf %191, %210 : vector<2x1024xf32>
    %c1 = arith.constant 1 : index
    %c0_98 = arith.constant 0 : index
    %c0_99 = arith.constant 0 : index
    %212 = vector.load %arg23[%c1, %c0_98, %c0_99] : memref<2x1024x32xf32, #tpu.memory_space<vmem>>, vector<1x1024x32xf32>
    %213 = vector.shape_cast %212 : vector<1x1024x32xf32> to vector<1024x32xf32>
    %cst_100 = arith.constant dense<0.000000e+00> : vector<2x32xf32>
    %214 = tpu.matmul %211, %213, %cst_100 {dimension_numbers = #tpu.dot_dimension_numbers<[1], [0], [0], [1], [0, 0, 1, 1], [], []>} : vector<2x1024xf32>, vector<1024x32xf32>, vector<2x32xf32> -> vector<2x32xf32>
    %c1_101 = arith.constant 1 : index
    %c0_102 = arith.constant 0 : index
    %c0_103 = arith.constant 0 : index
    %215 = vector.load %arg24[%c1_101, %c0_102, %c0_103] : memref<2x32x32xf32, #tpu.memory_space<vmem>>, vector<1x32x32xf32>
    %216 = vector.shape_cast %215 : vector<1x32x32xf32> to vector<32x32xf32>
    %cst_104 = arith.constant dense<0.000000e+00> : vector<2x32xf32>
    %217 = tpu.matmul %209, %216, %cst_104 {dimension_numbers = #tpu.dot_dimension_numbers<[1], [0], [0], [1], [0, 0, 1, 1], [], []>} : vector<2x32xf32>, vector<32x32xf32>, vector<2x32xf32> -> vector<2x32xf32>
    %218 = arith.addf %214, %217 : vector<2x32xf32>
    %c1_105 = arith.constant 1 : index
    %c0_106 = arith.constant 0 : index
    %c0_107 = arith.constant 0 : index
    %219 = vector.load %arg25[%c1_105, %c0_106, %c0_107] : memref<2x32x32xf32, #tpu.memory_space<vmem>>, vector<1x32x32xf32>
    %220 = vector.shape_cast %219 : vector<1x32x32xf32> to vector<32x32xf32>
    %cst_108 = arith.constant dense<0.000000e+00> : vector<2x32xf32>
    %221 = tpu.matmul %178, %220, %cst_108 {dimension_numbers = #tpu.dot_dimension_numbers<[1], [0], [0], [1], [0, 0, 1, 1], [], []>} : vector<2x32xf32>, vector<32x32xf32>, vector<2x32xf32> -> vector<2x32xf32>
    %c1_109 = arith.constant 1 : index
    %c0_110 = arith.constant 0 : index
    %c0_111 = arith.constant 0 : index
    %222 = vector.load %arg26[%c1_109, %c0_110, %c0_111] : memref<2x1x32xf32, #tpu.memory_space<vmem>>, vector<1x1x32xf32>
    %223 = vector.shape_cast %222 : vector<1x1x32xf32> to vector<1x32xf32>
    %224 = vector.broadcast %223 : vector<1x32xf32> to vector<2x32xf32>
    %225 = arith.addf %221, %224 : vector<2x32xf32>
    %226 = arith.addf %218, %225 : vector<2x32xf32>
    %227 = arith.mulf %226, %28 : vector<2x32xf32>
    %cst_112 = arith.constant dense<0.000000e+00> : vector<2xf32>
    %228 = vector.multi_reduction <add>, %227, %cst_112 [1] : vector<2x32xf32> to vector<2xf32>
    %229 = vector.shape_cast %228 : vector<2xf32> to vector<2x1xf32>
    %230 = vector.shape_cast %229 : vector<2x1xf32> to vector<2x1xf32>
    %231 = vector.broadcast %230 : vector<2x1xf32> to vector<2x128xf32>
    %c0_113 = arith.constant 0 : index
    %c0_114 = arith.constant 0 : index
    %232 = vector.load %arg27[%c0_113, %c0_114] : memref<2x128xf32, #tpu.memory_space<vmem>>, vector<2x128xf32>
    tpu.vector_store %arg27[%c0_113, %c0_114], %231 {strides = array<i32>} : memref<2x128xf32, #tpu.memory_space<vmem>>, vector<2x128xf32>,
    return
  }
  func.func @transform_0(%arg0: i32) -> (i32, i32) {
    %c0_i32 = arith.constant 0 : i32
    %c0_i32_0 = arith.constant 0 : i32
    %c0_i32_1 = arith.constant 0 : i32
    return %c0_i32, %c0_i32_0 : i32, i32
  }
  func.func @transform_1(%arg0: i32) -> (i32, i32) {
    %c0_i32 = arith.constant 0 : i32
    %c0_i32_0 = arith.constant 0 : i32
    %c0_i32_1 = arith.constant 0 : i32
    return %c0_i32, %c0_i32_0 : i32, i32
  }
  func.func @transform_2(%arg0: i32) -> (i32, i32) {
    %c0_i32 = arith.constant 0 : i32
    %c0_i32_0 = arith.constant 0 : i32
    %c0_i32_1 = arith.constant 0 : i32
    return %c0_i32, %c0_i32_0 : i32, i32
  }
  func.func @transform_3(%arg0: i32) -> (i32, i32) {
    %c0_i32 = arith.constant 0 : i32
    %c0_i32_0 = arith.constant 0 : i32
    %c0_i32_1 = arith.constant 0 : i32
    return %c0_i32, %c0_i32_0 : i32, i32
  }
  func.func @transform_4(%arg0: i32) -> (i32, i32) {
    %c0_i32 = arith.constant 0 : i32
    %c0_i32_0 = arith.constant 0 : i32
    %c0_i32_1 = arith.constant 0 : i32
    return %c0_i32, %c0_i32_0 : i32, i32
  }
  func.func @transform_5(%arg0: i32) -> (i32, i32) {
    %c0_i32 = arith.constant 0 : i32
    %c0_i32_0 = arith.constant 0 : i32
    %c0_i32_1 = arith.constant 0 : i32
    return %c0_i32, %c0_i32_0 : i32, i32
  }
  func.func @transform_6(%arg0: i32) -> (i32, i32) {
    %c0_i32 = arith.constant 0 : i32
    %c0_i32_0 = arith.constant 0 : i32
    %c0_i32_1 = arith.constant 0 : i32
    return %c0_i32, %c0_i32_0 : i32, i32
  }
  func.func @transform_7(%arg0: i32) -> (i32, i32) {
    %c0_i32 = arith.constant 0 : i32
    %c0_i32_0 = arith.constant 0 : i32
    %c0_i32_1 = arith.constant 0 : i32
    return %c0_i32, %c0_i32_0 : i32, i32
  }
  func.func @transform_8(%arg0: i32) -> (i32, i32) {
    %c0_i32 = arith.constant 0 : i32
    %c0_i32_0 = arith.constant 0 : i32
    %c0_i32_1 = arith.constant 0 : i32
    return %c0_i32, %c0_i32_0 : i32, i32
  }
  func.func @transform_9(%arg0: i32) -> (i32, i32) {
    %c0_i32 = arith.constant 0 : i32
    %c0_i32_0 = arith.constant 0 : i32
    %c0_i32_1 = arith.constant 0 : i32
    return %c0_i32, %c0_i32_0 : i32, i32
  }
  func.func @transform_10(%arg0: i32) -> (i32, i32) {
    %c0_i32 = arith.constant 0 : i32
    %c0_i32_0 = arith.constant 0 : i32
    %c0_i32_1 = arith.constant 0 : i32
    return %c0_i32, %c0_i32_0 : i32, i32
  }
  func.func @transform_11(%arg0: i32) -> (i32, i32) {
    %c0_i32 = arith.constant 0 : i32
    %c0_i32_0 = arith.constant 0 : i32
    %c0_i32_1 = arith.constant 0 : i32
    return %c0_i32, %c0_i32_0 : i32, i32
  }
  func.func @transform_12(%arg0: i32) -> (i32, i32) {
    %c0_i32 = arith.constant 0 : i32
    %c0_i32_0 = arith.constant 0 : i32
    %c0_i32_1 = arith.constant 0 : i32
    return %c0_i32, %c0_i32_0 : i32, i32
  }
  func.func @transform_13(%arg0: i32) -> (i32, i32) {
    %c0_i32 = arith.constant 0 : i32
    %c0_i32_0 = arith.constant 0 : i32
    %c0_i32_1 = arith.constant 0 : i32
    return %c0_i32, %c0_i32_0 : i32, i32
  }
  func.func @transform_14(%arg0: i32) -> (i32, i32) {
    %c0_i32 = arith.constant 0 : i32
    %c0_i32_0 = arith.constant 0 : i32
    %c0_i32_1 = arith.constant 0 : i32
    return %c0_i32, %c0_i32_0 : i32, i32
  }
  func.func @transform_15(%arg0: i32) -> (i32, i32) {
    %c0_i32 = arith.constant 0 : i32
    %c0_i32_0 = arith.constant 0 : i32
    %c0_i32_1 = arith.constant 0 : i32
    return %c0_i32, %c0_i32_0 : i32, i32
  }
  func.func @transform_16(%arg0: i32) -> (i32, i32) {
    %c0_i32 = arith.constant 0 : i32
    %c0_i32_0 = arith.constant 0 : i32
    %c0_i32_1 = arith.constant 0 : i32
    return %c0_i32, %c0_i32_0 : i32, i32
  }
  func.func @transform_17(%arg0: i32) -> (i32, i32) {
    %c0_i32 = arith.constant 0 : i32
    %c0_i32_0 = arith.constant 0 : i32
    %c0_i32_1 = arith.constant 0 : i32
    return %c0_i32, %c0_i32_0 : i32, i32
  }
  func.func @transform_18(%arg0: i32) -> (i32, i32) {
    %c0_i32 = arith.constant 0 : i32
    %c0_i32_0 = arith.constant 0 : i32
    %c0_i32_1 = arith.constant 0 : i32
    return %c0_i32, %c0_i32_0 : i32, i32
  }
  func.func @transform_19(%arg0: i32) -> (i32, i32) {
    %c0_i32 = arith.constant 0 : i32
    %c0_i32_0 = arith.constant 0 : i32
    %c0_i32_1 = arith.constant 0 : i32
    return %c0_i32, %c0_i32_0 : i32, i32
  }
  func.func @transform_20(%arg0: i32) -> (i32, i32) {
    %c0_i32 = arith.constant 0 : i32
    %c0_i32_0 = arith.constant 0 : i32
    %c0_i32_1 = arith.constant 0 : i32
    return %c0_i32, %c0_i32_0 : i32, i32
  }
  func.func @transform_21(%arg0: i32) -> (i32, i32) {
    %c0_i32 = arith.constant 0 : i32
    %c0_i32_0 = arith.constant 0 : i32
    %c0_i32_1 = arith.constant 0 : i32
    return %c0_i32, %c0_i32_0 : i32, i32
  }
  func.func @transform_22(%arg0: i32) -> (i32, i32, i32) {
    %c0_i32 = arith.constant 0 : i32
    %c0_i32_0 = arith.constant 0 : i32
    %c0_i32_1 = arith.constant 0 : i32
    %c0_i32_2 = arith.constant 0 : i32
    return %c0_i32, %c0_i32_0, %c0_i32_1 : i32, i32, i32
  }
  func.func @transform_23(%arg0: i32) -> (i32, i32, i32) {
    %c0_i32 = arith.constant 0 : i32
    %c0_i32_0 = arith.constant 0 : i32
    %c0_i32_1 = arith.constant 0 : i32
    %c0_i32_2 = arith.constant 0 : i32
    return %c0_i32, %c0_i32_0, %c0_i32_1 : i32, i32, i32
  }
  func.func @transform_24(%arg0: i32) -> (i32, i32, i32) {
    %c0_i32 = arith.constant 0 : i32
    %c0_i32_0 = arith.constant 0 : i32
    %c0_i32_1 = arith.constant 0 : i32
    %c0_i32_2 = arith.constant 0 : i32
    return %c0_i32, %c0_i32_0, %c0_i32_1 : i32, i32, i32
  }
  func.func @transform_25(%arg0: i32) -> (i32, i32, i32) {
    %c0_i32 = arith.constant 0 : i32
    %c0_i32_0 = arith.constant 0 : i32
    %c0_i32_1 = arith.constant 0 : i32
    %c0_i32_2 = arith.constant 0 : i32
    return %c0_i32, %c0_i32_0, %c0_i32_1 : i32, i32, i32
  }
  func.func @transform_26(%arg0: i32) -> (i32, i32) {
    %c0_i32 = arith.constant 0 : i32
    %c0_i32_0 = arith.constant 0 : i32
    %c0_i32_1 = arith.constant 0 : i32
    return %c0_i32, %c0_i32_0 : i32, i32
  }
}

</mosaic_0001>

<bundles_post_ra>
// kernel: sasrec_forward.1
= control target key start
LH: loop header
LB: loop body
LE: loop exit
PB: predicated region body
PF: predicated region fallthrough
CT: control target
= control target key end

     0   :  { %v4940_v0 = vmov 0   ;;  %v4941_v5 = vmov 0.0   ;;  %vm4942_vm0 = vmmov 0   ;;  %v94_v13 = vlaneseq  ;;  %s6848_s1 = inlined_call_operand.vmem [shape: s32[2,1], index: 1, kind: input, shape index: {}]   ;;  %s6849_s0 = inlined_call_operand.vmem [shape: s32[16,1], index: 0, kind: input, shape index: {}]   ;;  %s6850_s2 = inlined_call_operand.vmem [shape: f32[64,32], index: 2, kind: input, shape index: {}]   ;;  %s6851_s6 = inlined_call_operand.vmem [shape: f32[32,32], index: 6, kind: input, shape index: {}]   ;;  %s6852_s4 = inlined_call_operand.vmem [shape: f32[32,32], index: 4, kind: input, shape index: {}]   ;;  %s6853_s3 = inlined_call_operand.vmem [shape: f32[8,32], index: 3, kind: input, shape index: {}]   ;;  %s6854_s8 = inlined_call_operand.vmem [shape: f32[32,32], index: 8, kind: input, shape index: {}]   ;;  %s6855_s10 = inlined_call_operand.vmem [shape: f32[32,96], index: 10, kind: input, shape index: {}]   ;;  %s6856_s7 = inlined_call_operand.vmem [shape: f32[1,32], index: 7, kind: input, shape index: {}]   ;;  %s6857_s5 = inlined_call_operand.vmem [shape: f32[1,32], index: 5, kind: input, shape index: {}]   ;;  %s6858_s11 = inlined_call_operand.vmem [shape: f32[1,96], index: 11, kind: input, shape index: {}]   ;;  %s6859_s12 = inlined_call_operand.vmem [shape: f32[32,32], index: 12, kind: input, shape index: {}]   ;;  %s6860_s13 = inlined_call_operand.vmem [shape: f32[1,32], index: 13, kind: input, shape index: {}]   ;;  %s6861_s16 = inlined_call_operand.vmem [shape: f32[32,128], index: 16, kind: input, shape index: {}]   ;;  %s6862_s18 = inlined_call_operand.vmem [shape: f32[128,32], index: 18, kind: input, shape index: {}]   ;;  %s6863_s14 = inlined_call_operand.vmem [shape: f32[1,32], index: 14, kind: input, shape index: {}]   ;;  %s6864_s15 = inlined_call_operand.vmem [shape: f32[1,32], index: 15, kind: input, shape index: {}]   ;;  %s6865_s17 = inlined_call_operand.vmem [shape: f32[1,128], index: 17, kind: input, shape index: {}]   ;;  %s6866_s19 = inlined_call_operand.vmem [shape: f32[1,32], index: 19, kind: input, shape index: {}]   ;;  %s6867_s20 = inlined_call_operand.vmem [shape: f32[1,32], index: 20, kind: input, shape index: {}]   ;;  %s6868_s21 = inlined_call_operand.vmem [shape: f32[1,32], index: 21, kind: input, shape index: {}]   ;;  %s6869_s22 = inlined_call_operand.vmem [shape: f32[2,1024,32], index: 22, kind: input, shape index: {}]   ;;  %s6870_s23 = inlined_call_operand.vmem [shape: f32[2,32,32], index: 23, kind: input, shape index: {}]   ;;  %s6871_s24 = inlined_call_operand.vmem [shape: f32[2,32,32], index: 24, kind: input, shape index: {}]   ;;  %s6872_s25 = inlined_call_operand.vmem [shape: f32[2,1,32], index: 25, kind: input, shape index: {}]   ;;  %s6873_s9 = inlined_call_operand.vmem [shape: f32[1,32], index: 9, kind: input, shape index: {}]   ;;  %s6874_s26 = inlined_call_operand.vmem [shape: f32[2,128], index: 26, kind: output, shape index: {}]  }
   0x1   :  { %6899 = sst [smem:[#allocation2_spill]] %s6848_s1  ;;  %4906 = vset.pattern.permute.xlu0 %v4940_v0  ;;  %4907 = vset.pattern.permute.xlu1 %v4940_v0  ;;  %vm109_vm1 = vcmask 523264   ;;  %vm281_vm5 = vcmask 261120   ;;  %vm640_vm6 = vcmask 130048  }
   0x2   :  { %6900 = sst [smem:[#allocation3_spill]] %s6849_s0  ;;  %4681 = vmatprep.subr.mxu1 %v4941_v5  ;;  %4697 = vmatprep.mubr.msk.f32.mxu1 %vm4942_vm0, %v4941_v5  ;;  %v5137_v14 = vand.u32 127, %v94_v13  ;;  %s4944_s0 = smov 64  }
   0x3   :  { %6901 = sst [smem:[#allocation4_spill]] %s6850_s2 }
   0x4   :  { %6902 = sst [smem:[#allocation5_spill]] %s6851_s6  ;;  %s4946_s6 = smov 112  }
   0x5   :  { %6903 = sst [smem:[#allocation6_spill]] %s6852_s4 }
   0x6   :  { %6904 = sst [smem:[#allocation7_spill]] %s6853_s3  ;;  %s4948_s3 = smov 16  }
   0x7   :  { %6905 = sst [smem:[#allocation8_spill]] %s6854_s8  ;;  %s4943_s8 = smov 96  }
   0x8   :  { %6906 = sst [smem:[#allocation9_spill]] %s6855_s10 }
   0x9   :  { %6907 = sst [smem:[#allocation10_spill]] %s6856_s7 }
   0xa   :  { %6908 = sst [smem:[#allocation11_spill]] %s6857_s5 }
   0xb   :  { %6909 = sst [smem:[#allocation12_spill]] %s6858_s11 }
   0xc   :  { %s6910_s10 = sld [smem:[#allocation2_spill]] }
   0xd   :  { %s6911_s4 = sld [smem:[#allocation3_spill]] }
   0xe   :  { %s6912_s5 = sld [smem:[#allocation4_spill]] }
   0xf   :  { %s6913_s11 = sld [smem:[#allocation5_spill]] }
  0x10   :  { %s6914_s29 = sld [smem:[#allocation6_spill]] }
  0x11   :  { %s6915_s27 = sld [smem:[#allocation7_spill]] }
  0x12   :  { %v85_v1 = vld [vmem:[%s6910_s10] sm:$0x3]  ;;  %s6916_s28 = sld [smem:[#allocation8_spill]]  ;;  %s4947_s10 = smov 48  }
  0x13   :  { %v5091_v2 = vld [vmem:[%s6911_s4 + $0x8] sm:$0xff]  ;;  %192 = vperm.xlu0 %4906, %v85_v1   ;;  %v5100_v4 = vld [vmem:[%s6911_s4] sm:$0xff]  ;;  %s6919_s7 = sld [smem:[#allocation11_spill]]  ;;  %v5244_v1 = vshrl.u32 %v94_v13, 7 }
  0x14   :  { %100 = vperm.xlu1 %4907, %v5091_v2   ;;  %v93_v3 = vld [vmem:[%s6912_s5 + $0x38] sm:$0xff]  ;;  %v92_v6 = vld [vmem:[%s6912_s5 + $0x30] sm:$0xff]  ;;  %v91_v7 = vld [vmem:[%s6912_s5 + $0x28] sm:$0xff]  ;;  %vm1430_vm9 = vcmp.ne.s32.totalorder %v5091_v2, 0  ;;  %vm1429_vm10 = vcmp.ne.s32.totalorder %v5100_v4, 0 }
  0x15   :  { %4662 = vmatprep.subr.mxu0 %v93_v3  ;;  %4682 = vmatpush3.msra.mxu1 %v93_v3  ;;  %v90_v8 = vld [vmem:[%s6912_s5 + $0x20] sm:$0xff]  ;;  %v89_v9 = vld [vmem:[%s6912_s5 + $0x18] sm:$0xff]  ;;  %v88_v10 = vld [vmem:[%s6912_s5 + $0x10] sm:$0xff] }
  0x16   :  { %4663 = vmatpush3.msra.mxu0 %v93_v3  ;;  %4683 = vmatprep.subr.mxu1 %v4941_v5  ;;  %v87_v11 = vld [vmem:[%s6912_s5 + $0x8] sm:$0xff]  ;;  %v86_v12 = vld [vmem:[%s6912_s5] sm:$0xff]  ;;  %v273_v21 = vld [vmem:[%s6913_s11 + $0x18] sm:$0xff]  ;;  %v5247_v3 = vadd.s32 8, %v5244_v1 }
  0x17   :  { %4664 = vmatprep.subr.mxu0 %v92_v6  ;;  %97 = vperm.xlu0 %4906, %v5100_v4   ;;  %v272_v22 = vld [vmem:[%s6913_s11 + $0x10] sm:$0xff]  ;;  %v271_v23 = vld [vmem:[%s6913_s11 + $0x8] sm:$0xff]  ;;  %v270_v24 = vld [vmem:[%s6913_s11] sm:$0xff]  ;;  %s6917_s11 = sld [smem:[#allocation9_spill]] }
  0x18   :  { %4684 = vmatpush3.msra.mxu1 %v92_v6  ;;  %4665 = vmatpush3.msra.mxu0 %v92_v6  ;;  %v443_v25 = vld [vmem:[%s6914_s29 + $0x18] sm:$0xff]  ;;  %v442_v27 = vld [vmem:[%s6914_s29 + $0x10] sm:$0xff]  ;;  %v441_v29 = vld [vmem:[%s6914_s29 + $0x8] sm:$0xff]  ;;  %v630_v6 = vshra.s32 %v5247_v3, 3 }
  0x19   :  { %4685 = vmatprep.subr.mxu1 %v4941_v5  ;;  %4666 = vmatprep.subr.mxu0 %v91_v7  ;;  %v440_v30 = vld [vmem:[%s6914_s29] sm:$0xff]  ;;  %v359_v36 = vld [vmem:[%s6916_s28 + $0x18] sm:$0xff]  ;;  %v358_v37 = vld [vmem:[%s6916_s28 + $0x10] sm:$0xff] }
  0x1a   :  { %4686 = vmatpush3.msra.mxu1 %v91_v7  ;;  %4667 = vmatpush3.msra.mxu0 %v91_v7  ;;  %v108_v32 = vld [vmem:[%s6915_s27] sm:$0xff]  ;;  %v357_v38 = vld [vmem:[%s6916_s28 + $0x8] sm:$0xff]  ;;  %s6918_s27 = sld [smem:[#allocation10_spill]]  ;;  %v5251_v7 = vshra.s32 %v5137_v14, 3 }
  0x1b   :  { %4687 = vmatprep.subr.mxu1 %v4941_v5  ;;  %4668 = vmatprep.subr.mxu0 %v90_v8  ;;  %v356_v39 = vld [vmem:[%s6916_s28] sm:$0xff] }
  0x1c   :  { %4688 = vmatpush3.msra.mxu1 %v90_v8  ;;  %4669 = vmatpush3.msra.mxu0 %v90_v8  ;;  %v3912_v45 = vld [vmem:[%s6919_s7] ss:$0 sm:$0xff]  ;;  %v629_v8 = vshra.s32 %v5244_v1, 3  ;;  %vm5255_vm7 = vcmp.eq.s32.totalorder %v630_v6, %v5251_v7  ;;  %vm1428_vm11 = vcmp.eq.s32.totalorder %v5251_v7, %v5244_v1 }
  0x1d   :  { %4689 = vmatprep.subr.mxu1 %v4941_v5  ;;  %4670 = vmatprep.subr.mxu0 %v89_v9  ;;  %v537_v40 = vld [vmem:[%s6917_s11 + $0x18] sm:$0xff]  ;;  %v536_v51 = vld [vmem:[%s6917_s11 + $0x10] sm:$0xff]  ;;  %v535_v52 = vld [vmem:[%s6917_s11 + $0x8] sm:$0xff] }
  0x1e   :  { %4690 = vmatpush3.msra.mxu1 %v89_v9  ;;  %4671 = vmatpush3.msra.mxu0 %v89_v9  ;;  %v534_v53 = vld [vmem:[%s6917_s11] sm:$0xff]  ;;  %s6920_s11 = sld [smem:[#allocation12_spill]]  ;;  %vm5260_vm8 = vcmp.eq.s32.totalorder %v629_v8, %v5251_v7 }
  0x1f   :  { %4691 = vmatprep.subr.mxu1 %v4941_v5  ;;  %4672 = vmatprep.subr.mxu0 %v88_v10  ;;  %v3935_v2 = vld [vmem:[%s6865_s17] ss:$0 sm:$0xff] }
  0x20   :  { %4692 = vmatpush3.msra.mxu1 %v88_v10  ;;  %4673 = vmatpush3.msra.mxu0 %v88_v10  ;;  %v3908_v41 = vld [vmem:[%s6918_s27] ss:$0 sm:$0xff]  ;;  %s4945_s27 = smov 80  }
  0x21   :  { %4693 = vmatprep.subr.mxu1 %v4941_v5  ;;  %4674 = vmatprep.subr.mxu0 %v87_v11 }
  0x22   :  { %4694 = vmatpush3.msra.mxu1 %v87_v11  ;;  %4675 = vmatpush3.msra.mxu0 %v87_v11 }
  0x23   :  { %4695 = vmatprep.subr.mxu1 %v4941_v5  ;;  %4676 = vmatprep.subr.mxu0 %v86_v12 }
  0x24   :  { %4696 = vmatpush3.msra.mxu1 %v86_v12  ;;  %4677 = vmatpush3.msra.mxu0 %v86_v12  ;;  %v3915_v58 = vld [vmem:[%s6920_s11] ss:$0 sm:$0xff] }
  0x25   :  { %4711 = vmatprep.subr.mxu1 %v4941_v5  ;;  %4700 = vmatprep.subr.mxu0 %v4941_v5 }
  0x8e   :  { %v193_v15 = vpop.permute.xlu0 %192 }
  0x8f   :  { %v101_v16 = vpop.permute.xlu1 %100  ;;  %vm194_vm2 = vcmp.eq.s32.totalorder %v5137_v14, %v193_v15 }
  0x90   :  { %v3906_v17 = vsel %vm194_vm2, 1.0, %v4941_v5  ;;  %vm103_vm3 = vcmp.eq.s32.totalorder %v5137_v14, %v101_v16 }
  0x91   :  { %4698 = vmatmul.mubr.msk.f32.vlgmr.msra.gmra.mxu1 %vm109_vm1, %v3906_v17  ;;  %v3903_v19 = vsel %vm103_vm3, 1.0, %v4941_v5 }
  0x92   :  { %v98_v18 = vpop.permute.xlu0 %97  ;;  %4719 = vmatprep.mubr.msk.f32.mxu1 %vm4942_vm0, %v4941_v5  ;;  %4712 = vmatpush3.msra.mxu1 %v359_v36 }
  0x93   :  { %vm102_vm4 = vcmp.eq.s32.totalorder %v5137_v14, %v98_v18  ;;  %4713 = vmatprep.subr.mxu1 %v4941_v5 }
  0x94   :  { %v3902_v20 = vsel %vm102_vm4, 1.0, %v4941_v5  ;;  %4714 = vmatpush3.msra.mxu1 %v358_v37 }
  0x95   :  { %4678 = vmatprep.mubr.msk.f32.mxu0 %vm109_vm1, %v3902_v20  ;;  %4715 = vmatprep.subr.mxu1 %v4941_v5 }
  0x96   :  { %4679 = vmatmul.mubr.msk.f32.vlgmr.msra.gmra.mxu0 %vm109_vm1, %v3903_v19  ;;  %4716 = vmatpush3.msra.mxu1 %v357_v38 }
  0x97   :  { %4701 = vmatpush3.msra.mxu0 %v273_v21  ;;  %4708 = vmatprep.mubr.msk.f32.mxu0 %vm4942_vm0, %v4941_v5 }
  0x98   :  { %4702 = vmatprep.subr.mxu0 %v4941_v5  ;;  %4717 = vmatprep.subr.mxu1 %v4941_v5 }
  0x99   :  { %4703 = vmatpush3.msra.mxu0 %v272_v22  ;;  %4718 = vmatpush3.msra.mxu1 %v356_v39 }
  0x9a   :  { %4704 = vmatprep.subr.mxu0 %v4941_v5  ;;  %4733 = vmatprep.subr.mxu1 %v537_v40 }
  0x9b   :  { %4705 = vmatpush3.msra.mxu0 %v271_v23 }
  0x9c   :  { %4706 = vmatprep.subr.mxu0 %v4941_v5 }
  0x9d   :  { %4707 = vmatpush3.msra.mxu0 %v270_v24 }
  0x9e   :  { %4722 = vmatprep.subr.mxu0 %v443_v25 }
 0x151   :  { %v266_v26 = vpop.f32.mrf.mxu1 }
 0x152   :  { %4709 = vmatmul.mubr.msk.f32.vlgmr.msra.gmra.mxu0 %vm281_vm5, %v266_v26 }
 0x153   :  { %v4699_v28 = vpop.f32.mrf.mxu1  ;;  %4723 = vmatpush3.msra.mxu0 %v443_v25 }
 0x154   :  { %4724 = vmatprep.subr.mxu0 %v442_v27 }
 0x155   :  { %4725 = vmatpush3.msra.mxu0 %v442_v27 }
 0x156   :  { %v4680_v31 = vpop.f32.mrf.mxu0  ;;  %4726 = vmatprep.subr.mxu0 %v441_v29 }
 0x157   :  { %4727 = vmatpush3.msra.mxu0 %v441_v29  ;;  %v188_v35 = vadd.f32 %v4680_v31, %v108_v32 }
 0x158   :  { %v182_v33 = vpop.f32.mrf.mxu0  ;;  %4728 = vmatprep.subr.mxu0 %v440_v30 }
 0x159   :  { %v183_v34 = vadd.f32 %v182_v33, %v108_v32  ;;  %4729 = vmatpush3.msra.mxu0 %v440_v30 }
 0x15b   :  { %4730 = vmatprep.mubr.msk.f32.mxu0 %vm281_vm5, %v183_v34 }
 0x15c   :  { %4731 = vmatmul.mubr.msk.f32.vlgmr.msra.gmra.mxu0 %vm281_vm5, %v188_v35 }
 0x212   :  { %v351_v42 = vpop.f32.mrf.mxu0 }
 0x213   :  { %v352_v43 = vadd.f32 %v3908_v41, %v351_v42 }
 0x214   :  { %v4710_v44 = vpop.f32.mrf.mxu0 }
 0x215   :  { %4908 = vtanh.f32 %v352_v43 }
 0x21c   :  { %v4732_v46 = vpop.f32.mrf.mxu0 }
 0x21d   :  { %v529_v47 = vadd.f32 %v4732_v46, %v3912_v45 }
 0x21e   :  { %v523_v48 = vpop.f32.mrf.mxu0 }
 0x21f   :  { %v524_v49 = vadd.f32 %v3912_v45, %v523_v48 }
 0x221   :  { %4910 = vtanh.f32 %v524_v49 }
 0x222   :  { %v4909_v50 = vpop.eup %4908  ;;  %4912 = vtanh.f32 %v529_v47 }
 0x223   :  { %4720 = vmatmul.mubr.msk.f32.vlgmr.msra.gmra.mxu1 %vm281_vm5, %v4909_v50 }
 0x224   :  { %4734 = vmatpush3.msra.mxu1 %v537_v40 }
 0x225   :  { %4735 = vmatprep.subr.mxu1 %v536_v51 }
 0x226   :  { %4736 = vmatpush3.msra.mxu1 %v536_v51 }
 0x227   :  { %4737 = vmatprep.subr.mxu1 %v535_v52 }
 0x228   :  { %4738 = vmatpush3.msra.mxu1 %v535_v52 }
 0x229   :  { %4739 = vmatprep.subr.mxu1 %v534_v53 }
 0x22a   :  { %4740 = vmatpush3.msra.mxu1 %v534_v53 }
 0x22e   :  { %v5216_v54 = vpop.eup %4910 }
 0x22f   :  { %v5218_v55 = vpop.eup %4912  ;;  %4741 = vmatprep.mubr.msk.f32.mxu1 %vm281_vm5, %v5216_v54 }
 0x230   :  { %4742 = vmatmul.mubr.msk.f32.vlgmr.msra.gmra.mxu1 %vm281_vm5, %v5218_v55 }
 0x2e3   :  { %v5224_v56 = vpop.f32.mrf.mxu1 }
 0x2e5   :  { %v4721_v57 = vpop.f32.mrf.mxu1 }
 0x2f0   :  { %v4743_v59 = vpop.f32.mrf.mxu1 }
 0x2f1   :  { %v5229_v60 = vadd.f32 %v4743_v59, %v3915_v58 }
 0x2f2   :  { %v617_v61 = vpop.f32.mrf.mxu1 }
 0x2f3   :  { %v5231_v62 = vadd.f32 %v3915_v58, %v617_v61  ;;  %638 = vrot.lane.b32.xlu1 %v5229_v60, %s4943_s8 }
 0x2f5   :  { %636 = vrot.lane.b32.xlu0 %v5231_v62, %s4943_s8  ;;  %4748 = vmatprep.mubr.msk.f32.mxu0 %vm640_vm6, %v5231_v62 }
 0x365   :  { %v639_v63 = vpop.permute.xlu1 %638 }
 0x366   :  { %4744 = vmatprep.subr.msk.mxu0 %vm640_vm6, %v639_v63 }
 0x367   :  { %4745 = vmatpush3.xpose.msk.msra.mxu0 %vm640_vm6, %v639_v63  ;;  %v637_v0 = vpop.permute.xlu0 %636 }
 0x368   :  { %4746 = vmatprep.subr.msk.mxu0 %vm640_vm6, %v637_v0 }
 0x36b   :  { %4747 = vmatpush3.xpose.msk.msra.mxu0 %vm640_vm6, %v637_v0 }
 0x36e   :  { %4749 = vmatmul.mubr.msk.f32.vlgmr.msra.gmra.mxu0 %vm640_vm6, %v5229_v60 }
 0x42e   :  { %v4750_v9 = vpop.f32.mrf.mxu0 }
 0x42f   :  { %v725_v11 = vmul.f32 0.25, %v4750_v9 }
 0x430   :  { %v715_v12 = vpop.f32.mrf.mxu0 }
 0x431   :  { %v724_v15 = vmul.f32 0.25, %v715_v12  ;;  %v727_v16 = vsel %vm5255_vm7, %v725_v11, -1e+30 }
 0x432   :  { %v731_v17 = vsel %vm640_vm6, %v727_v16, -inf }
 0x433   :  { %732 = vmax.xlane.f32.xlu0 %v731_v17  ;;  %v726_v18 = vsel %vm5260_vm8, %v724_v15, -1e+30 }
 0x434   :  { %v728_v19 = vsel %vm640_vm6, %v726_v18, -inf }
 0x435   :  { %729 = vmax.xlane.f32.xlu1 %v728_v19  ;;  %v1051_v19 = vld [vmem:[%s6859_s12] sm:$0xff] }
 0x4bc   :  { %v733_v20 = vpop.xlane.xlu0 %732 }
 0x4bd   :  { %v735_v21 = vsub.f32 %v727_v16, %v733_v20 }
 0x4be   :  { %v730_v22 = vpop.xlane.xlu1 %729 }
 0x4bf   :  { %v738_v23 = vmul.f32 1.442695, %v735_v21  ;;  %v734_v24 = vsub.f32 %v726_v18, %v730_v22  ;;  %v1052_v18 = vld [vmem:[%s6859_s12 + $0x8] sm:$0xff] }
 0x4c1   :  { %4914 = vpow2.f32 %v738_v23  ;;  %v736_v25 = vmul.f32 1.442695, %v734_v24 }
 0x4c3   :  { %4916 = vpow2.f32 %v736_v25 }
 0x4ce   :  { %v4915_v26 = vpop.eup %4914 }
 0x4cf   :  { %v743_v27 = vsel %vm640_vm6, %v4915_v26, 0.0 }
 0x4d0   :  { %v4917_v28 = vpop.eup %4916  ;;  %744 = vadd.xlane.f32.xlu1 %v743_v27 }
 0x4d1   :  { %v740_v29 = vsel %vm640_vm6, %v4917_v28, 0.0 }
 0x4d2   :  { %741 = vadd.xlane.f32.xlu0 %v740_v29 }
 0x4e1   :  { %750 = vrot.lane.b32.xlu1 %v5231_v62, %s4944_s0 }
 0x4e5   :  { %843 = vrot.lane.b32.xlu1 %v5229_v60, %s4945_s27 }
 0x4e8   :  { %752 = vrot.lane.b32.xlu0 %v5229_v60, %s4944_s0 }
 0x4e9   :  { %837 = vrot.lane.b32.xlu1 %v5231_v62, %s4946_s6 }
 0x4ec   :  { %841 = vrot.lane.b32.xlu0 %v5231_v62, %s4945_s27 }
 0x4f0   :  { %839 = vrot.lane.b32.xlu0 %v5229_v60, %s4946_s6 }
 0x559   :  { %v745_v30 = vpop.xlane.xlu1 %744 }
 0x55a   :  { %4918 = vrcp.f32 %v745_v30 }
 0x55b   :  { %v742_v31 = vpop.xlane.xlu0 %741 }
 0x55c   :  { %4920 = vrcp.f32 %v742_v31 }
 0x55d   :  { %v751_v32 = vpop.permute.xlu1 %750 }
 0x55f   :  { %v753_v33 = vpop.permute.xlu0 %752 }
 0x560   :  { %4751 = vmatprep.subr.mxu1 %v753_v33 }
 0x561   :  { %4752 = vmatpush3.msra.mxu1 %v753_v33  ;;  %v844_v34 = vpop.permute.xlu1 %843 }
 0x562   :  { %4753 = vmatprep.subr.mxu1 %v751_v32 }
 0x563   :  { %4754 = vmatpush3.msra.mxu1 %v751_v32  ;;  %v842_v40 = vpop.permute.xlu0 %841 }
 0x564   :  { %4758 = vmatprep.subr.msk.mxu1 %vm640_vm6, %v844_v34 }
 0x565   :  { %v838_v39 = vpop.permute.xlu1 %837 }
 0x567   :  { %v4919_v35 = vpop.eup %4918  ;;  %v840_v41 = vpop.permute.xlu0 %839 }
 0x568   :  { %v749_v38 = vmul.f32 %v4919_v35, %v4915_v26  ;;  %v3930_v26 = vld [vmem:[%s6860_s13] ss:$0 sm:$0xff] }
 0x569   :  { %v4921_v36 = vpop.eup %4920 }
 0x56a   :  { %v748_v37 = vmul.f32 %v4921_v36, %v4917_v28 }
 0x56c   :  { %4755 = vmatprep.mubr.msk.f32.mxu1 %vm640_vm6, %v748_v37 }
 0x56d   :  { %4756 = vmatmul.mubr.msk.f32.vlgmr.msra.gmra.mxu1 %vm640_vm6, %v749_v38 }
 0x56e   :  { %4759 = vmatpush3.xpose.msk.msra.mxu1 %vm640_vm6, %v844_v34  ;;  %4762 = vmatprep.mubr.msk.f32.mxu1 %vm640_vm6, %v838_v39 }
 0x56f   :  { %4760 = vmatprep.subr.msk.mxu1 %vm640_vm6, %v842_v40 }
 0x572   :  { %4761 = vmatpush3.xpose.msk.msra.mxu1 %vm640_vm6, %v842_v40 }
 0x575   :  { %4763 = vmatmul.mubr.msk.f32.vlgmr.msra.gmra.mxu1 %vm640_vm6, %v840_v41 }
 0x62d   :  { %v5286_v42 = vpop.f32.mrf.mxu1 }
 0x62f   :  { %v5288_v43 = vpop.f32.mrf.mxu1 }
 0x635   :  { %v4764_v44 = vpop.f32.mrf.mxu1 }
 0x636   :  { %v929_v45 = vmul.f32 0.25, %v4764_v44 }
 0x637   :  { %v919_v46 = vpop.f32.mrf.mxu1 }
 0x638   :  { %v928_v47 = vmul.f32 0.25, %v919_v46  ;;  %v931_v48 = vsel %vm5255_vm7, %v929_v45, -1e+30  ;;  %v1193_v45 = vld [vmem:[%s6861_s16 + $0x18] sm:$0xff]  ;;  %v1192_v46 = vld [vmem:[%s6861_s16 + $0x10] sm:$0xff] }
 0x639   :  { %v935_v49 = vsel %vm640_vm6, %v931_v48, -inf  ;;  %4783 = vmatprep.subr.mxu1 %v1193_v45 }
 0x63a   :  { %936 = vmax.xlane.f32.xlu0 %v935_v49  ;;  %v930_v50 = vsel %vm5260_vm8, %v928_v47, -1e+30  ;;  %4784 = vmatpush3.msra.mxu1 %v1193_v45  ;;  %v1191_v47 = vld [vmem:[%s6861_s16 + $0x8] sm:$0xff]  ;;  %v1299_v49 = vld [vmem:[%s6862_s18 + $0x78] sm:$0xff] }
 0x63b   :  { %v932_v51 = vsel %vm640_vm6, %v930_v50, -inf  ;;  %4785 = vmatprep.subr.mxu1 %v1192_v46 }
 0x63c   :  { %933 = vmax.xlane.f32.xlu1 %v932_v51  ;;  %4786 = vmatpush3.msra.mxu1 %v1192_v46  ;;  %v1297_v51 = vld [vmem:[%s6862_s18 + $0x68] sm:$0xff] }
 0x63d   :  { %4787 = vmatprep.subr.mxu1 %v1191_v47 }
 0x63e   :  { %4788 = vmatpush3.msra.mxu1 %v1191_v47 }
 0x6c3   :  { %v937_v52 = vpop.xlane.xlu0 %936 }
 0x6c4   :  { %v939_v53 = vsub.f32 %v931_v48, %v937_v52  ;;  %v1190_v48 = vld [vmem:[%s6861_s16] sm:$0xff] }
 0x6c5   :  { %v934_v57 = vpop.xlane.xlu1 %933  ;;  %4789 = vmatprep.subr.mxu1 %v1190_v48  ;;  %v1296_v52 = vld [vmem:[%s6862_s18 + $0x60] sm:$0xff] }
 0x6c6   :  { %v942_v58 = vmul.f32 1.442695, %v939_v53  ;;  %v938_v59 = vsub.f32 %v930_v50, %v934_v57  ;;  %4790 = vmatpush3.msra.mxu1 %v1190_v48  ;;  %v1298_v50 = vld [vmem:[%s6862_s18 + $0x70] sm:$0xff]  ;;  %v1295_v53 = vld [vmem:[%s6862_s18 + $0x58] sm:$0xff] }
 0x6c7   :  { %4829 = vmatprep.subr.mxu1 %v4941_v5  ;;  %v1294_v57 = vld [vmem:[%s6862_s18 + $0x50] sm:$0xff] }
 0x6c8   :  { %4922 = vpow2.f32 %v942_v58  ;;  %v940_v61 = vmul.f32 1.442695, %v938_v59  ;;  %v1293_v58 = vld [vmem:[%s6862_s18 + $0x48] sm:$0xff]  ;;  %v1292_v59 = vld [vmem:[%s6862_s18 + $0x40] sm:$0xff] }
 0x6ca   :  { %4924 = vpow2.f32 %v940_v61  ;;  %v1291_v61 = vld [vmem:[%s6862_s18 + $0x38] sm:$0xff] }
 0x6d5   :  { %v4923_v63 = vpop.eup %4922 }
 0x6d6   :  { %v947_v0 = vsel %vm640_vm6, %v4923_v63, 0.0 }
 0x6d7   :  { %v4925_v6 = vpop.eup %4924  ;;  %948 = vadd.xlane.f32.xlu1 %v947_v0  ;;  %v1289_v0 = vld [vmem:[%s6862_s18 + $0x28] sm:$0xff] }
 0x6d8   :  { %v944_v8 = vsel %vm640_vm6, %v4925_v6, 0.0 }
 0x6d9   :  { %945 = vadd.xlane.f32.xlu0 %v944_v8 }
 0x6e8   :  { %954 = vrot.lane.b32.xlu1 %v5231_v62, %s4947_s10  ;;  %v1053_v62 = vld [vmem:[%s6859_s12 + $0x10] sm:$0xff] }
 0x6ef   :  { %956 = vrot.lane.b32.xlu0 %v5229_v60, %s4947_s10  ;;  %v1054_v60 = vld [vmem:[%s6859_s12 + $0x18] sm:$0xff] }
 0x760   :  { %v949_v9 = vpop.xlane.xlu1 %948 }
 0x761   :  { %4926 = vrcp.f32 %v949_v9 }
 0x762   :  { %v946_v10 = vpop.xlane.xlu0 %945 }
 0x763   :  { %4928 = vrcp.f32 %v946_v10 }
 0x764   :  { %v955_v12 = vpop.permute.xlu1 %954 }
 0x766   :  { %v957_v11 = vpop.permute.xlu0 %956 }
 0x767   :  { %4765 = vmatprep.subr.mxu0 %v957_v11 }
 0x768   :  { %4766 = vmatpush3.msra.mxu0 %v957_v11 }
 0x769   :  { %4767 = vmatprep.subr.mxu0 %v955_v12 }
 0x76a   :  { %4768 = vmatpush3.msra.mxu0 %v955_v12 }
 0x76b   :  { %4772 = vmatprep.subr.mxu0 %v1054_v60 }
 0x76e   :  { %v4927_v13 = vpop.eup %4926 }
 0x76f   :  { %v953_v17 = vmul.f32 %v4927_v13, %v4923_v63  ;;  %v1290_v63 = vld [vmem:[%s6862_s18 + $0x30] sm:$0xff] }
 0x770   :  { %v4929_v15 = vpop.eup %4928 }
 0x771   :  { %v952_v16 = vmul.f32 %v4929_v15, %v4925_v6  ;;  %v1288_v6 = vld [vmem:[%s6862_s18 + $0x20] sm:$0xff] }
 0x773   :  { %4769 = vmatprep.mubr.msk.f32.mxu0 %vm640_vm6, %v952_v16  ;;  %v3933_v16 = vld [vmem:[%s6863_s14] ss:$0 sm:$0xff] }
 0x774   :  { %4770 = vmatmul.mubr.msk.f32.vlgmr.msra.gmra.mxu0 %vm640_vm6, %v953_v17 }
 0x775   :  { %4773 = vmatpush3.msra.mxu0 %v1054_v60 }
 0x776   :  { %4774 = vmatprep.subr.mxu0 %v1053_v62 }
 0x777   :  { %4775 = vmatpush3.msra.mxu0 %v1053_v62 }
 0x778   :  { %4776 = vmatprep.subr.mxu0 %v1052_v18 }
 0x779   :  { %4777 = vmatpush3.msra.mxu0 %v1052_v18 }
 0x77a   :  { %4778 = vmatprep.subr.mxu0 %v1051_v19 }
 0x77b   :  { %4779 = vmatpush3.msra.mxu0 %v1051_v19  ;;  %v3934_v19 = vld [vmem:[%s6864_s15] ss:$0 sm:$0xff] }
 0x77c   :  { %4794 = vmatprep.subr.mxu0 %v1299_v49 }
 0x834   :  { %v4771_v20 = vpop.f32.mrf.mxu0 }
 0x835   :  { %1045 = vrot.lane.b32.xlu0 %v4771_v20, %s4948_s3 }
 0x836   :  { %v1032_v21 = vpop.f32.mrf.mxu0 }
 0x837   :  { %1043 = vrot.lane.b32.xlu1 %v1032_v21, %s4948_s3 }
 0x8a7   :  { %v1046_v22 = vpop.permute.xlu0 %1045 }
 0x8a8   :  { %v1050_v25 = vsel %vm640_vm6, %v5286_v42, %v1046_v22 }
 0x8a9   :  { %v1044_v23 = vpop.permute.xlu1 %1043 }
 0x8aa   :  { %v1049_v24 = vsel %vm640_vm6, %v5288_v43, %v1044_v23  ;;  %v1287_v23 = vld [vmem:[%s6862_s18 + $0x18] sm:$0xff] }
 0x8ab   :  { %4780 = vmatprep.mubr.msk.f32.mxu0 %vm281_vm5, %v1049_v24  ;;  %v1286_v24 = vld [vmem:[%s6862_s18 + $0x10] sm:$0xff] }
 0x8ac   :  { %4781 = vmatmul.mubr.msk.f32.vlgmr.msra.gmra.mxu0 %vm281_vm5, %v1050_v25  ;;  %v1285_v25 = vld [vmem:[%s6862_s18 + $0x8] sm:$0xff] }
 0x8ad   :  { %4795 = vmatpush3.msra.mxu0 %v1299_v49 }
 0x8ae   :  { %4796 = vmatprep.subr.mxu0 %v1298_v50 }
 0x8af   :  { %4797 = vmatpush3.msra.mxu0 %v1298_v50 }
 0x8b0   :  { %4798 = vmatprep.subr.mxu0 %v1297_v51 }
 0x8b1   :  { %4799 = vmatpush3.msra.mxu0 %v1297_v51 }
 0x8b2   :  { %4800 = vmatprep.subr.mxu0 %v1296_v52 }
 0x8b3   :  { %4801 = vmatpush3.msra.mxu0 %v1296_v52 }
 0x8b4   :  { %4802 = vmatprep.subr.mxu0 %v1295_v53 }
 0x8b5   :  { %4803 = vmatpush3.msra.mxu0 %v1295_v53 }
 0x8b6   :  { %4804 = vmatprep.subr.mxu0 %v1294_v57 }
 0x8b7   :  { %4805 = vmatpush3.msra.mxu0 %v1294_v57 }
 0x8b8   :  { %4806 = vmatprep.subr.mxu0 %v1293_v58 }
 0x8b9   :  { %4807 = vmatpush3.msra.mxu0 %v1293_v58 }
 0x8ba   :  { %4808 = vmatprep.subr.mxu0 %v1292_v59 }
 0x8bb   :  { %4809 = vmatpush3.msra.mxu0 %v1292_v59 }
 0x8bc   :  { %4810 = vmatprep.subr.mxu0 %v1291_v61 }
 0x8bd   :  { %4811 = vmatpush3.msra.mxu0 %v1291_v61 }
 0x8be   :  { %4812 = vmatprep.subr.mxu0 %v1290_v63 }
 0x8bf   :  { %4813 = vmatpush3.msra.mxu0 %v1290_v63 }
 0x8c0   :  { %4814 = vmatprep.subr.mxu0 %v1289_v0 }
 0x8c1   :  { %4815 = vmatpush3.msra.mxu0 %v1289_v0  ;;  %v5437_v0 = vadd.s32 24, %v5244_v1 }
 0x8c2   :  { %4816 = vmatprep.subr.mxu0 %v1288_v6 }
 0x8c3   :  { %4817 = vmatpush3.msra.mxu0 %v1288_v6  ;;  %v5440_v6 = vadd.s32 896, %v5137_v14 }
 0x8c4   :  { %4818 = vmatprep.subr.mxu0 %v1287_v23 }
 0x8c5   :  { %4819 = vmatpush3.msra.mxu0 %v1287_v23  ;;  %v3940_v23 = vld [vmem:[%s6868_s21] ss:$0 sm:$0xff] }
 0x8c6   :  { %4820 = vmatprep.subr.mxu0 %v1286_v24 }
 0x8c7   :  { %4821 = vmatpush3.msra.mxu0 %v1286_v24 }
 0x8c8   :  { %4822 = vmatprep.subr.mxu0 %v1285_v25 }
 0x8c9   :  { %4823 = vmatpush3.msra.mxu0 %v1285_v25 }
 0x96c   :  { %v4782_v27 = vpop.f32.mrf.mxu0 }
 0x96d   :  { %v1140_v28 = vadd.f32 %v4782_v27, %v3930_v26  ;;  %v4949_v27 = vmov 1.0  }
 0x96e   :  { %v1134_v29 = vpop.f32.mrf.mxu0 }
 0x96f   :  { %v1135_v30 = vadd.f32 %v3930_v26, %v1134_v29  ;;  %v1144_v31 = vadd.f32 %v5218_v55, %v1140_v28  ;;  %v1284_v26 = vld [vmem:[%s6862_s18] sm:$0xff]  ;;  %v3943_v28 = vsel %vm1428_vm11, 1.0, %v4941_v5 }
 0x970   :  { %4824 = vmatprep.subr.mxu0 %v1284_v26 }
 0x971   :  { %v1150_v32 = vsel %vm281_vm5, %v1144_v31, 0.0  ;;  %v1143_v33 = vadd.f32 %v5216_v54, %v1135_v30  ;;  %4825 = vmatpush3.msra.mxu0 %v1284_v26  ;;  %v5474_v26 = vadd.s32 128, %v5137_v14 }
 0x972   :  { %1151 = vadd.xlane.f32.xlu0 %v1150_v32 }
 0x973   :  { %v1147_v34 = vsel %vm281_vm5, %v1143_v33, 0.0 }
 0x974   :  { %1148 = vadd.xlane.f32.xlu1 %v1147_v34  ;;  %v3938_v34 = vld [vmem:[%s6866_s19] ss:$0 sm:$0xff] }
 0x9fb   :  { %v1152_v35 = vpop.xlane.xlu0 %1151 }
 0x9fc   :  { %v1155_v36 = vmul.f32 0.03125, %v1152_v35 }
 0x9fd   :  { %v1149_v37 = vpop.xlane.xlu1 %1148 }
 0x9fe   :  { %v5327_v38 = vsub.f32 %v1144_v31, %v1155_v36  ;;  %v1154_v39 = vmul.f32 0.03125, %v1149_v37 }
 0xa00   :  { %v5329_v40 = vsub.f32 %v1143_v33, %v1154_v39  ;;  %v1159_v41 = vmul.f32 %v5327_v38, %v5327_v38 }
 0xa02   :  { %v1163_v42 = vsel %vm281_vm5, %v1159_v41, 0.0  ;;  %v1158_v43 = vmul.f32 %v5329_v40, %v5329_v40 }
 0xa03   :  { %1164 = vadd.xlane.f32.xlu1 %v1163_v42 }
 0xa04   :  { %v1160_v44 = vsel %vm281_vm5, %v1158_v43, 0.0 }
 0xa05   :  { %1161 = vadd.xlane.f32.xlu0 %v1160_v44 }
 0xa8c   :  { %v1165_v8 = vpop.xlane.xlu1 %1164 }
 0xa8d   :  { %v1167_v9 = vmul.f32 0.03125, %v1165_v8  ;;  %v5443_v8 = vadd.s32 768, %v5137_v14 }
 0xa8e   :  { %v1162_v10 = vpop.xlane.xlu0 %1161 }
 0xa8f   :  { %v1169_v11 = vadd.f32 1e-05, %v1167_v9  ;;  %v1166_v12 = vmul.f32 0.03125, %v1162_v10  ;;  %v5446_v9 = vadd.s32 16, %v5244_v1  ;;  %v5449_v10 = vshra.s32 %v5440_v6, 5 }
 0xa91   :  { %4930 = vrsqrt.f32 %v1169_v11  ;;  %v1168_v13 = vadd.f32 1e-05, %v1166_v12  ;;  %v5452_v11 = vshra.s32 %v5443_v8, 5  ;;  %vm1713_vm13 = vcmp.eq.s32.totalorder %v5449_v10, %v5437_v0 }
 0xa92   :  { %vm1705_vm14 = vcmp.eq.s32.totalorder %v5449_v10, %v5446_v9  ;;  %4042 = vmatprep.subr.msk.mxu0 %vm1713_vm13, %v4949_v27 }
 0xa93   :  { %4932 = vrsqrt.f32 %v1168_v13  ;;  %vm1712_vm15 = vcmp.eq.s32.totalorder %v5452_v11, %v5437_v0  ;;  %vm1704_vm1 = vcmp.eq.s32.totalorder %v5452_v11, %v5446_v9 }
 0xa9e   :  { %v4931_v15 = vpop.eup %4930 }
 0xa9f   :  { %v1173_v17 = vmul.f32 %v4931_v15, %v5327_v38 }
 0xaa0   :  { %v4933_v60 = vpop.eup %4932 }
 0xaa1   :  { %v1172_v62 = vmul.f32 %v4933_v60, %v5329_v40  ;;  %v1181_v18 = vmul.f32 %v3933_v16, %v1173_v17 }
 0xaa3   :  { %v1180_v20 = vmul.f32 %v3933_v16, %v1172_v62  ;;  %v1189_v22 = vadd.f32 %v3934_v19, %v1181_v18  ;;  %v1514_v62 = vand.u32 7, %v5137_v14 }
 0xaa5   :  { %v1188_v21 = vadd.f32 %v3934_v19, %v1180_v20  ;;  %v3939_v20 = vld [vmem:[%s6867_s20] ss:$0 sm:$0xff] }
 0xaa7   :  { %4791 = vmatprep.mubr.msk.f32.mxu1 %vm281_vm5, %v1188_v21 }
 0xaa8   :  { %4792 = vmatmul.mubr.msk.f32.vlgmr.msra.gmra.mxu1 %vm281_vm5, %v1189_v22 }
 0xaa9   :  { %4833 = vmatprep.mubr.msk.f32.mxu1 %vm4942_vm0, %v4941_v5  ;;  %4830 = vmatpush3.msk.msra.mxu1 %vm1430_vm9, %v4949_v27 }
 0xaaa   :  { %4831 = vmatprep.subr.mxu1 %v4941_v5 }
 0xaab   :  { %4832 = vmatpush3.msk.msra.mxu1 %vm1429_vm10, %v4949_v27 }
 0xaac   :  { %4834 = vmatmul.mubr.msk.f32.vlgmr.msra.gmra.mxu1 %vm640_vm6, %v3943_v28  ;;  %4836 = vmatprep.subr.mxu1 %v4941_v5 }
 0xaad   :  { %4840 = vmatprep.mubr.msk.f32.mxu1 %vm4942_vm0, %v4941_v5 }
 0xb68   :  { %v4793_v4 = vpop.f32.mrf.mxu1 }
 0xb69   :  { %v1279_v29 = vadd.f32 %v4793_v4, %v3935_v2 }
 0xb6a   :  { %v1273_v30 = vpop.f32.mrf.mxu1 }
 0xb6b   :  { %v1274_v31 = vadd.f32 %v3935_v2, %v1273_v30  ;;  %v1283_v33 = vmax.f32 %v1279_v29, 0.0  ;;  %v1675_v29 = vshra.s32 %v5474_v26, 5  ;;  %v1674_v30 = vshra.s32 %v5137_v14, 5 }
 0xb6c   :  { %v1506_v43 = vpop.f32.mrf.mxu1 }
 0xb6d   :  { %v1282_v32 = vmax.f32 %v1274_v31, 0.0  ;;  %v4894_v58 = vtrunc.f32 %v1506_v43  ;;  %vm1707_vm4 = vcmp.eq.s32.totalorder %v1675_v29, %v5437_v0  ;;  %vm1706_vm7 = vcmp.eq.s32.totalorder %v1674_v30, %v5437_v0 }
 0xb6e   :  { %v4835_v44 = vpop.f32.mrf.mxu1  ;;  %vm1699_vm8 = vcmp.eq.s32.totalorder %v1675_v29, %v5446_v9  ;;  %vm1698_vm9 = vcmp.eq.s32.totalorder %v1674_v30, %v5446_v9  ;;  %vm1691_vm10 = vcmp.eq.s32.totalorder %v1675_v29, %v5247_v3  ;;  %vm1683_vm13 = vcmp.eq.s32.totalorder %v1675_v29, %v5244_v1  ;;  %v2476_v29 = vld [vmem:[%s6869_s22 + $0x60] sm:$0xff] }
 0xb6f   :  { %4826 = vmatprep.mubr.f32.mxu0 %v1282_v32  ;;  %v4895_v59 = vcvt.f32.s32 %v4894_v58  ;;  %v1666_v32 = vadd.s32 256, %v5137_v14  ;;  %v5593_v44 = vand.u32 31, %v5443_v8  ;;  %v2592_v58 = vld [vmem:[%s6870_s23] sm:$0xff]  ;;  %v2525_v8 = vld [vmem:[%s6869_s22 + $0x1e8] sm:$0xff] }
 0xb70   :  { %4827 = vmatmul.mubr.f32.vlgmr.msra.gmra.mxu0 %v1283_v33 }
 0xb71   :  { %2162 = vmatprep.mubr.f32.mxu0 %v4941_v5  ;;  %v3947_v61 = vadd.s32 4294967295, %v4895_v59  ;;  %4043 = vmatpush1.msk.msra.mxu0 %vm1712_vm15, %v4949_v27  ;;  %vm1682_vm15 = vcmp.eq.s32.totalorder %v1674_v30, %v5244_v1  ;;  %v1676_v33 = vshra.s32 %v1666_v32, 5  ;;  %v2527_v59 = vld [vmem:[%s6869_s22 + $0x1f8] sm:$0xff] }
 0xb72   :  { %4044 = vmatprep.subr.msk.mxu0 %vm1705_vm14, %v4949_v27  ;;  %vm1689_vm14 = vcmp.eq.s32.totalorder %v5449_v10, %v5244_v1 }
 0xb73   :  { %vm1512_vm12 = vcmp.gt.s32.totalorder %v3947_v61, 0  ;;  %4045 = vmatpush1.msk.msra.mxu0 %vm1704_vm1, %v4949_v27  ;;  %vm1688_vm1 = vcmp.eq.s32.totalorder %v5452_v11, %v5244_v1 }
 0xb74   :  { %v1513_v63 = vsel %vm1512_vm12, %v3947_v61, 0  ;;  %vm1696_vm12 = vcmp.eq.s32.totalorder %v5452_v11, %v5247_v3  ;;  %v2511_v61 = vld [vmem:[%s6869_s22 + $0x178] sm:$0xff]  ;;  %v2524_v11 = vld [vmem:[%s6869_s22 + $0x1e0] sm:$0xff] }
 0xc30   :  { %v4828_v35 = vpop.f32.mrf.mxu0 }
 0xc31   :  { %v1379_v36 = vadd.f32 %v4828_v35, %v3938_v34 }
 0xc32   :  { %v1373_v37 = vpop.f32.mrf.mxu0 }
 0xc33   :  { %v1374_v38 = vadd.f32 %v3938_v34, %v1373_v37  ;;  %v1383_v39 = vadd.f32 %v1379_v36, %v1189_v22  ;;  %v5532_v34 = vand.u32 31, %v1666_v32  ;;  %v5540_v37 = vadd.s32 640, %v5137_v14  ;;  %v2499_v32 = vld [vmem:[%s6869_s22 + $0x118] sm:$0xff] }
 0xc35   :  { %v1389_v40 = vsel %vm281_vm5, %v1383_v39, 0.0  ;;  %v1382_v41 = vadd.f32 %v1374_v38, %v1188_v21 }
 0xc36   :  { %1390 = vadd.xlane.f32.xlu0 %v1389_v40 }
 0xc37   :  { %v1386_v42 = vsel %vm281_vm5, %v1382_v41, 0.0 }
 0xc38   :  { %1387 = vadd.xlane.f32.xlu1 %v1386_v42  ;;  %v5583_v42 = vand.u32 31, %v5440_v6  ;;  %v2510_v6 = vld [vmem:[%s6869_s22 + $0x170] sm:$0xff] }
 0xcbf   :  { %v1391_v45 = vpop.xlane.xlu0 %1390 }
 0xcc0   :  { %v1393_v46 = vmul.f32 0.03125, %v1391_v45  ;;  %v5652_v45 = vand.u32 31, %v5474_v26  ;;  %v2477_v26 = vld [vmem:[%s6869_s22 + $0x68] sm:$0xff] }
 0xcc1   :  { %v1388_v47 = vpop.xlane.xlu1 %1387 }
 0xcc2   :  { %v1395_v48 = vsub.f32 %v1383_v39, %v1393_v46  ;;  %v1392_v49 = vmul.f32 0.03125, %v1388_v47  ;;  %v5555_v39 = vadd.s32 512, %v5137_v14  ;;  %v5663_v46 = vand.u32 31, %v5137_v14 }
 0xcc3   :  { %v5716_v47 = vand.u32 31, %v5540_v37 }
 0xcc4   :  { %v1394_v50 = vsub.f32 %v1382_v41, %v1392_v49  ;;  %v1397_v51 = vmul.f32 %v1395_v48, %v1395_v48  ;;  %v1679_v41 = vshra.s32 %v5540_v37, 5  ;;  %v1678_v43 = vshra.s32 %v5555_v39, 5  ;;  %v2498_v37 = vld [vmem:[%s6869_s22 + $0x110] sm:$0xff] }
 0xcc5   :  { %v5729_v49 = vand.u32 31, %v5555_v39  ;;  %v2489_v39 = vld [vmem:[%s6869_s22 + $0xc8] sm:$0xff] }
 0xcc6   :  { %v1401_v52 = vsel %vm281_vm5, %v1397_v51, 0.0  ;;  %v1396_v53 = vmul.f32 %v1394_v50, %v1394_v50  ;;  %v2478_v51 = vld [vmem:[%s6869_s22 + $0x70] sm:$0xff] }
 0xcc7   :  { %1402 = vadd.xlane.f32.xlu0 %v1401_v52  ;;  %v2595_v52 = vld [vmem:[%s6870_s23 + $0x18] sm:$0xff] }
 0xcc8   :  { %v1398_v57 = vsel %vm281_vm5, %v1396_v53, 0.0  ;;  %v2594_v53 = vld [vmem:[%s6870_s23 + $0x10] sm:$0xff] }
 0xcc9   :  { %1399 = vadd.xlane.f32.xlu1 %v1398_v57  ;;  %v2593_v57 = vld [vmem:[%s6870_s23 + $0x8] sm:$0xff] }
 0xcdd   :  { %1516 = vperm.xlu0 %4906, %v1513_v63   ;;  %v2526_v63 = vld [vmem:[%s6869_s22 + $0x1f0] sm:$0xff] }
 0xd50   :  { %v1403_v12 = vpop.xlane.xlu0 %1402 }
 0xd51   :  { %v1405_v13 = vmul.f32 0.03125, %v1403_v12  ;;  %v2508_v12 = vld [vmem:[%s6869_s22 + $0x160] sm:$0xff] }
 0xd52   :  { %v1400_v15 = vpop.xlane.xlu1 %1399 }
 0xd53   :  { %v1407_v16 = vadd.f32 1e-05, %v1405_v13  ;;  %v1404_v17 = vmul.f32 0.03125, %v1400_v15  ;;  %v2523_v13 = vld [vmem:[%s6869_s22 + $0x1d8] sm:$0xff] }
 0xd54   :  { %v2507_v15 = vld [vmem:[%s6869_s22 + $0x158] sm:$0xff] }
 0xd55   :  { %4934 = vrsqrt.f32 %v1407_v16  ;;  %v1406_v60 = vadd.f32 1e-05, %v1404_v17  ;;  %v2522_v16 = vld [vmem:[%s6869_s22 + $0x1d0] sm:$0xff] }
 0xd56   :  { %v2506_v17 = vld [vmem:[%s6869_s22 + $0x150] sm:$0xff] }
 0xd57   :  { %4936 = vrsqrt.f32 %v1406_v60  ;;  %v2521_v60 = vld [vmem:[%s6869_s22 + $0x1c8] sm:$0xff] }
 0xd58   :  { %v1517_v19 = vpop.permute.xlu0 %1516 }
 0xd59   :  { %vm1518_vm2 = vcmp.eq.s32.totalorder %v1514_v62, %v1517_v19  ;;  %v2505_v62 = vld [vmem:[%s6869_s22 + $0x148] sm:$0xff]  ;;  %v2504_v19 = vld [vmem:[%s6869_s22 + $0x140] sm:$0xff] }
 0xd5a   :  { %vm1519_vm3 = vmand %vm1428_vm11, %vm1518_vm2  ;;  %vm1697_vm11 = vcmp.eq.s32.totalorder %v5449_v10, %v5247_v3  ;;  %v2509_v10 = vld [vmem:[%s6869_s22 + $0x168] sm:$0xff] }
 0xd5b   :  { %v3948_v31 = vsel %vm1519_vm3, 1.0, %v4941_v5  ;;  %4046 = vmatprep.subr.msk.mxu0 %vm1697_vm11, %v4949_v27  ;;  %vm6893_vm11 = vcmp.eq.s32.totalorder %v5532_v34, %v5446_v9 }
 0xd5c   :  { %4047 = vmatpush1.msk.msra.mxu0 %vm1696_vm12, %v4949_v27 }
 0xd5d   :  { %4048 = vmatprep.subr.msk.mxu0 %vm1689_vm14, %v4949_v27  ;;  %vm6883_vm14 = vcmp.eq.s32.totalorder %v5532_v34, %v5247_v3 }
 0xd5e   :  { %4049 = vmatpush1.msk.msra.mxu0 %vm1688_vm1, %v4949_v27 }
 0xd62   :  { %v4935_v18 = vpop.eup %4934 }
 0xd63   :  { %v1411_v21 = vmul.f32 %v4935_v18, %v1395_v48  ;;  %v2479_v48 = vld [vmem:[%s6869_s22 + $0x78] sm:$0xff]  ;;  %v2520_v18 = vld [vmem:[%s6869_s22 + $0x1c0] sm:$0xff] }
 0xd64   :  { %v4937_v22 = vpop.eup %4936 }
 0xd65   :  { %v1419_v24 = vmul.f32 %v3939_v20, %v1411_v21  ;;  %v1410_v25 = vmul.f32 %v4937_v22, %v1394_v50  ;;  %v2494_v50 = vld [vmem:[%s6869_s22 + $0xf0] sm:$0xff]  ;;  %v2503_v21 = vld [vmem:[%s6869_s22 + $0x138] sm:$0xff] }
 0xd66   :  { %v2518_v22 = vld [vmem:[%s6869_s22 + $0x1b0] sm:$0xff] }
 0xd67   :  { %v1427_v28 = vadd.f32 %v3940_v23, %v1419_v24  ;;  %v1418_v2 = vmul.f32 %v3939_v20, %v1410_v25  ;;  %v2519_v20 = vld [vmem:[%s6869_s22 + $0x1b8] sm:$0xff]  ;;  %v2493_v24 = vld [vmem:[%s6869_s22 + $0xe8] sm:$0xff] }
 0xd68   :  { %v2517_v25 = vld [vmem:[%s6869_s22 + $0x1a8] sm:$0xff] }
 0xd69   :  { %4837 = vmatpush3.msra.mxu1 %v1427_v28  ;;  %v1426_v4 = vadd.f32 %v3940_v23, %v1418_v2  ;;  %v2502_v23 = vld [vmem:[%s6869_s22 + $0x130] sm:$0xff]  ;;  %v2501_v28 = vld [vmem:[%s6869_s22 + $0x128] sm:$0xff]  ;;  %v2492_v2 = vld [vmem:[%s6869_s22 + $0xe0] sm:$0xff] }
 0xd6a   :  { %4838 = vmatprep.subr.mxu1 %v4941_v5 }
 0xd6b   :  { %4839 = vmatpush3.msra.mxu1 %v1426_v4  ;;  %v2516_v4 = vld [vmem:[%s6869_s22 + $0x1a0] sm:$0xff] }
 0xd6c   :  { %4841 = vmatmul.mubr.msk.f32.vlgmr.msra.gmra.mxu1 %vm640_vm6, %v3948_v31  ;;  %4843 = vmatprep.subr.mxu1 %v4941_v5 }
 0xd6d   :  { %4844 = vmatpush3.msra.mxu1 %v5218_v55  ;;  %4847 = vmatprep.mubr.msk.f32.mxu1 %vm4942_vm0, %v4941_v5 }
 0xd6e   :  { %4845 = vmatprep.subr.mxu1 %v4941_v5 }
 0xd6f   :  { %4846 = vmatpush3.msra.mxu1 %v5216_v54  ;;  %v1667_v54 = vadd.s32 384, %v5137_v14  ;;  %v2495_v14 = vld [vmem:[%s6869_s22 + $0xf8] sm:$0xff] }
 0xd70   :  { %4848 = vmatmul.mubr.msk.f32.vlgmr.msra.gmra.mxu1 %vm640_vm6, %v3948_v31  ;;  %4015 = vmatprep.subr.msk.mxu1 %vm1707_vm4, %v4949_v27  ;;  %vm1690_vm6 = vcmp.eq.s32.totalorder %v1674_v30, %v5247_v3  ;;  %vm1708_vm4 = vcmp.eq.s32.totalorder %v1676_v33, %v5437_v0  ;;  %v2500_v30 = vld [vmem:[%s6869_s22 + $0x120] sm:$0xff]  ;;  %v2491_v31 = vld [vmem:[%s6869_s22 + $0xd8] sm:$0xff] }
 0xd71   :  { %4016 = vmatpush1.msk.msra.mxu1 %vm1706_vm7, %v4949_v27  ;;  %1949 = vmatprep.mubr.f32.mxu1 %v4941_v5  ;;  %v1677_v55 = vshra.s32 %v1667_v54, 5  ;;  %v5514_v7 = vand.u32 31, %v1667_v54  ;;  %vm6895_vm7 = vcmp.eq.s32.totalorder %v5532_v34, %v5437_v0  ;;  %v2515_v54 = vld [vmem:[%s6869_s22 + $0x198] sm:$0xff] }
 0xd72   :  { %4017 = vmatprep.subr.msk.mxu1 %vm1699_vm8, %v4949_v27 }
 0xd73   :  { %4018 = vmatpush1.msk.msra.mxu1 %vm1698_vm9, %v4949_v27  ;;  %vm1709_vm2 = vcmp.eq.s32.totalorder %v1677_v55, %v5437_v0  ;;  %vm6896_vm3 = vcmp.eq.s32.totalorder %v5514_v7, %v5437_v0  ;;  %vm1701_vm8 = vcmp.eq.s32.totalorder %v1677_v55, %v5446_v9  ;;  %vm6894_vm9 = vcmp.eq.s32.totalorder %v5514_v7, %v5446_v9 }
 0xd74   :  { %4019 = vmatprep.subr.msk.mxu1 %vm1691_vm10, %v4949_v27  ;;  %4060 = vmatprep.subr.msk.mxu0 %vm6896_vm3, %v4949_v27  ;;  %vm1700_vm10 = vcmp.eq.s32.totalorder %v1676_v33, %v5446_v9  ;;  %vm6892_vm12 = vcmp.eq.s32.totalorder %v5514_v7, %v5247_v3  ;;  %vm6882_vm1 = vcmp.eq.s32.totalorder %v5514_v7, %v5244_v1 }
 0xd75   :  { %4020 = vmatpush1.msk.msra.mxu1 %vm1690_vm6, %v4949_v27  ;;  %vm1693_vm6 = vcmp.eq.s32.totalorder %v1677_v55, %v5247_v3  ;;  %vm1798_vm3 = vcmp.eq.s32.totalorder %v5729_v49, %v5247_v3 }
 0xd76   :  { %4021 = vmatprep.subr.msk.mxu1 %vm1683_vm13, %v4949_v27  ;;  %vm1692_vm13 = vcmp.eq.s32.totalorder %v1676_v33, %v5247_v3 }
 0xd77   :  { %4022 = vmatpush1.msk.msra.mxu1 %vm1682_vm15, %v4949_v27  ;;  %vm1685_vm15 = vcmp.eq.s32.totalorder %v1677_v55, %v5244_v1  ;;  %v2475_v55 = vld [vmem:[%s6869_s22 + $0x58] sm:$0xff] }
 0xd78   :  { %4024 = vmatprep.subr.msk.mxu1 %vm1709_vm2, %v4949_v27  ;;  %vm1684_vm2 = vcmp.eq.s32.totalorder %v1676_v33, %v5244_v1  ;;  %v2490_v33 = vld [vmem:[%s6869_s22 + $0xd0] sm:$0xff] }
 0xe2c   :  { %v5534_v35 = vpop.f32.mrf.mxu1 }
 0xe2e   :  { %v4842_v36 = vpop.f32.mrf.mxu1 }
 0xe2f   :  { %v2474_v36 = vld [vmem:[%s6869_s22 + $0x50] sm:$0xff] }
 0xe30   :  { %v5542_v38 = vpop.f32.mrf.mxu1 }
 0xe31   :  { %4023 = vmatmul.mubr.msk.f32.vlgmr.msra.gmra.mxu1 %vm281_vm5, %v5542_v38  ;;  %4050 = vmatmul.mubr.msk.f32.vlgmr.msra.gmra.mxu0 %vm281_vm5, %v5542_v38 }
 0xe32   :  { %4025 = vmatpush1.msk.msra.mxu1 %vm1708_vm4, %v4949_v27  ;;  %4061 = vmatpush1.msk.msra.mxu0 %vm6895_vm7, %v4949_v27  ;;  %v4849_v40 = vpop.f32.mrf.mxu1  ;;  %vm6881_vm4 = vcmp.eq.s32.totalorder %v5532_v34, %v5244_v1  ;;  %vm1799_vm7 = vcmp.eq.s32.totalorder %v5716_v47, %v5247_v3 }
 0xe33   :  { %4026 = vmatprep.subr.msk.mxu1 %vm1701_vm8, %v4949_v27  ;;  %4062 = vmatprep.subr.msk.mxu0 %vm6894_vm9, %v4949_v27  ;;  %vm1711_vm8 = vcmp.eq.s32.totalorder %v1679_v41, %v5437_v0  ;;  %vm1806_vm9 = vcmp.eq.s32.totalorder %v5729_v49, %v5446_v9  ;;  %v2513_v40 = vld [vmem:[%s6869_s22 + $0x188] sm:$0xff] }
 0xe34   :  { %4027 = vmatpush1.msk.msra.mxu1 %vm1700_vm10, %v4949_v27  ;;  %4063 = vmatpush1.msk.msra.mxu0 %vm6893_vm11, %v4949_v27  ;;  %vm6884_vm10 = vcmp.eq.s32.totalorder %v5583_v42, %v5437_v0  ;;  %vm1807_vm11 = vcmp.eq.s32.totalorder %v5716_v47, %v5446_v9 }
 0xe35   :  { %4028 = vmatprep.subr.msk.mxu1 %vm1693_vm6, %v4949_v27  ;;  %4064 = vmatprep.subr.msk.mxu0 %vm6892_vm12, %v4949_v27  ;;  %vm1710_vm6 = vcmp.eq.s32.totalorder %v1678_v43, %v5437_v0  ;;  %vm6897_vm12 = vcmp.eq.s32.totalorder %v5729_v49, %v5437_v0 }
 0xe36   :  { %4029 = vmatpush1.msk.msra.mxu1 %vm1692_vm13, %v4949_v27  ;;  %4065 = vmatpush1.msk.msra.mxu0 %vm6883_vm14, %v4949_v27  ;;  %vm6891_vm13 = vcmp.eq.s32.totalorder %v5593_v44, %v5437_v0  ;;  %vm6890_vm14 = vcmp.eq.s32.totalorder %v5583_v42, %v5247_v3 }
 0xe37   :  { %4030 = vmatprep.subr.msk.mxu1 %vm1685_vm15, %v4949_v27  ;;  %4066 = vmatprep.subr.msk.mxu0 %vm6882_vm1, %v4949_v27  ;;  %vm1703_vm15 = vcmp.eq.s32.totalorder %v1679_v41, %v5446_v9  ;;  %vm6886_vm1 = vcmp.eq.s32.totalorder %v5593_v44, %v5446_v9 }
 0xe38   :  { %4031 = vmatpush1.msk.msra.mxu1 %vm1684_vm2, %v4949_v27  ;;  %2020 = vmatprep.mubr.f32.mxu1 %v4941_v5  ;;  %vm6885_vm2 = vcmp.eq.s32.totalorder %v5583_v42, %v5446_v9 }
 0xe39   :  { %4067 = vmatpush1.msk.msra.mxu0 %vm6881_vm4, %v4949_v27  ;;  %2307 = vmatprep.mubr.f32.mxu0 %v4941_v5  ;;  %vm1702_vm4 = vcmp.eq.s32.totalorder %v1678_v43, %v5446_v9 }
 0xe3a   :  { %4032 = vmatmul.mubr.msk.f32.vlgmr.msra.gmra.mxu1 %vm281_vm5, %v5542_v38  ;;  %4033 = vmatprep.subr.msk.mxu1 %vm1711_vm8, %v4949_v27  ;;  %vm1695_vm8 = vcmp.eq.s32.totalorder %v1679_v41, %v5247_v3 }
 0xe3b   :  { %4068 = vmatmul.mubr.msk.f32.vlgmr.msra.gmra.mxu0 %vm281_vm5, %v5534_v35  ;;  %4078 = vmatprep.subr.msk.mxu0 %vm6884_vm10, %v4949_v27  ;;  %vm1694_vm10 = vcmp.eq.s32.totalorder %v1678_v43, %v5247_v3 }
 0xe3c   :  { %4034 = vmatpush1.msk.msra.mxu1 %vm1710_vm6, %v4949_v27  ;;  %4079 = vmatpush1.msk.msra.mxu0 %vm6891_vm13, %v4949_v27  ;;  %vm6889_vm6 = vcmp.eq.s32.totalorder %v5593_v44, %v5247_v3  ;;  %vm6898_vm13 = vcmp.eq.s32.totalorder %v5716_v47, %v5437_v0 }
 0xe3d   :  { %4035 = vmatprep.subr.msk.mxu1 %vm1703_vm15, %v4949_v27  ;;  %4080 = vmatprep.subr.msk.mxu0 %vm6885_vm2, %v4949_v27  ;;  %vm1687_vm15 = vcmp.eq.s32.totalorder %v1679_v41, %v5244_v1  ;;  %vm6888_vm2 = vcmp.eq.s32.totalorder %v5583_v42, %v5244_v1  ;;  %v2473_v41 = vld [vmem:[%s6869_s22 + $0x48] sm:$0xff] }
 0xe3e   :  { %4036 = vmatpush1.msk.msra.mxu1 %vm1702_vm4, %v4949_v27  ;;  %4081 = vmatpush1.msk.msra.mxu0 %vm6886_vm1, %v4949_v27  ;;  %vm1686_vm4 = vcmp.eq.s32.totalorder %v1678_v43, %v5244_v1  ;;  %vm6887_vm1 = vcmp.eq.s32.totalorder %v5593_v44, %v5244_v1  ;;  %v2497_v43 = vld [vmem:[%s6869_s22 + $0x108] sm:$0xff] }
 0xe3f   :  { %4037 = vmatprep.subr.msk.mxu1 %vm1695_vm8, %v4949_v27  ;;  %4082 = vmatprep.subr.msk.mxu0 %vm6890_vm14, %v4949_v27  ;;  %vm1811_vm8 = vcmp.eq.s32.totalorder %v5652_v45, %v5437_v0  ;;  %vm1786_vm14 = vcmp.eq.s32.totalorder %v5663_v46, %v5244_v1 }
 0xe40   :  { %4038 = vmatpush1.msk.msra.mxu1 %vm1694_vm10, %v4949_v27  ;;  %4083 = vmatpush1.msk.msra.mxu0 %vm6889_vm6, %v4949_v27  ;;  %vm1810_vm10 = vcmp.eq.s32.totalorder %v5663_v46, %v5437_v0  ;;  %vm1787_vm6 = vcmp.eq.s32.totalorder %v5652_v45, %v5244_v1 }
 0xe41   :  { %4039 = vmatprep.subr.msk.mxu1 %vm1687_vm15, %v4949_v27  ;;  %4084 = vmatprep.subr.msk.mxu0 %vm6888_vm2, %v4949_v27  ;;  %vm1803_vm15 = vcmp.eq.s32.totalorder %v5652_v45, %v5446_v9  ;;  %vm1794_vm2 = vcmp.eq.s32.totalorder %v5663_v46, %v5247_v3 }
 0xe42   :  { %4040 = vmatpush1.msk.msra.mxu1 %vm1686_vm4, %v4949_v27  ;;  %2091 = vmatprep.mubr.f32.mxu1 %v4941_v5  ;;  %vm1802_vm4 = vcmp.eq.s32.totalorder %v5663_v46, %v5446_v9  ;;  %v2544_v46 = vld [vmem:[%s6869_s22 + $0x280] sm:$0xff] }
 0xe43   :  { %4085 = vmatpush1.msk.msra.mxu0 %vm6887_vm1, %v4949_v27  ;;  %2449 = vmatprep.mubr.f32.mxu0 %v4941_v5  ;;  %vm1795_vm1 = vcmp.eq.s32.totalorder %v5652_v45, %v5247_v3  ;;  %v2529_v45 = vld [vmem:[%s6869_s22 + $0x208] sm:$0xff] }
 0xe44   :  { %4041 = vmatmul.mubr.msk.f32.vlgmr.msra.gmra.mxu1 %vm281_vm5, %v5542_v38  ;;  %4051 = vmatprep.subr.msk.mxu1 %vm1811_vm8, %v4949_v27 }
 0xe45   :  { %4086 = vmatmul.mubr.msk.f32.vlgmr.msra.gmra.mxu0 %vm281_vm5, %v5534_v35  ;;  %4052 = vmatpush1.msk.msra.mxu1 %vm1810_vm10, %v4949_v27 }
 0xe46   :  { %4053 = vmatprep.subr.msk.mxu1 %vm1803_vm15, %v4949_v27  ;;  %2236 = vmatprep.mubr.f32.mxu1 %v4941_v5 }
 0xe47   :  { %4054 = vmatpush1.msk.msra.mxu1 %vm1802_vm4, %v4949_v27  ;;  %4367 = vmatprep.subr.mxu0 %v2495_v14  ;;  %v2488_v14 = vld [vmem:[%s6869_s22 + $0xc0] sm:$0xff] }
 0xe48   :  { %4055 = vmatprep.subr.msk.mxu1 %vm1795_vm1, %v4949_v27  ;;  %4368 = vmatpush3.msra.mxu0 %v2479_v48  ;;  %v2512_v48 = vld [vmem:[%s6869_s22 + $0x180] sm:$0xff] }
 0xe49   :  { %4056 = vmatpush1.msk.msra.mxu1 %vm1794_vm2, %v4949_v27  ;;  %4369 = vmatprep.subr.mxu0 %v2494_v50  ;;  %v2472_v50 = vld [vmem:[%s6869_s22 + $0x40] sm:$0xff] }
 0xe4a   :  { %4057 = vmatprep.subr.msk.mxu1 %vm1787_vm6, %v4949_v27  ;;  %4370 = vmatpush3.msra.mxu0 %v2478_v51  ;;  %v2496_v51 = vld [vmem:[%s6869_s22 + $0x100] sm:$0xff] }
 0xe4b   :  { %4058 = vmatpush1.msk.msra.mxu1 %vm1786_vm14, %v4949_v27  ;;  %4371 = vmatprep.subr.mxu0 %v2493_v24 }
 0xe4c   :  { %4059 = vmatmul.mubr.msk.f32.vlgmr.msra.gmra.mxu1 %vm281_vm5, %v5534_v35  ;;  %4069 = vmatprep.subr.msk.mxu1 %vm6898_vm13, %v4949_v27  ;;  %vm1790_vm13 = vcmp.eq.s32.totalorder %v5729_v49, %v5244_v1 }
 0xe4d   :  { %4070 = vmatpush1.msk.msra.mxu1 %vm6897_vm12, %v4949_v27  ;;  %2378 = vmatprep.mubr.f32.mxu1 %v4941_v5  ;;  %vm1791_vm12 = vcmp.eq.s32.totalorder %v5716_v47, %v5244_v1 }
 0xe4e   :  { %4071 = vmatprep.subr.msk.mxu1 %vm1807_vm11, %v4949_v27  ;;  %4372 = vmatpush3.msra.mxu0 %v2477_v26 }
 0xe4f   :  { %4072 = vmatpush1.msk.msra.mxu1 %vm1806_vm9, %v4949_v27  ;;  %4373 = vmatprep.subr.mxu0 %v2492_v2  ;;  %v2575_v2 = vld [vmem:[%s6869_s22 + $0x378] sm:$0xff] }
 0xe50   :  { %4073 = vmatprep.subr.msk.mxu1 %vm1799_vm7, %v4949_v27  ;;  %4374 = vmatpush3.msra.mxu0 %v2476_v29  ;;  %v2574_v29 = vld [vmem:[%s6869_s22 + $0x370] sm:$0xff] }
 0xe51   :  { %4074 = vmatpush1.msk.msra.mxu1 %vm1798_vm3, %v4949_v27  ;;  %4375 = vmatprep.subr.mxu0 %v2491_v31  ;;  %v2573_v31 = vld [vmem:[%s6869_s22 + $0x368] sm:$0xff] }
 0xe52   :  { %4075 = vmatprep.subr.msk.mxu1 %vm1791_vm12, %v4949_v27  ;;  %4376 = vmatpush3.msra.mxu0 %v2475_v55 }
 0xe53   :  { %4076 = vmatpush1.msk.msra.mxu1 %vm1790_vm13, %v4949_v27  ;;  %4377 = vmatprep.subr.mxu0 %v2490_v33 }
 0xe54   :  { %4077 = vmatmul.mubr.msk.f32.vlgmr.msra.gmra.mxu1 %vm281_vm5, %v5534_v35  ;;  %4850 = vmatprep.subr.mxu1 %v4941_v5 }
 0xe55   :  { %4851 = vmatpush3.msra.mxu1 %v2595_v52  ;;  %4858 = vmatprep.mubr.msk.f32.mxu1 %vm4942_vm0, %v4941_v5  ;;  %v2487_v52 = vld [vmem:[%s6869_s22 + $0xb8] sm:$0xff] }
 0xe56   :  { %4852 = vmatprep.subr.mxu1 %v4941_v5  ;;  %4378 = vmatpush3.msra.mxu0 %v2474_v36 }
 0xe57   :  { %4853 = vmatpush3.msra.mxu1 %v2594_v53  ;;  %4379 = vmatprep.subr.mxu0 %v2489_v39  ;;  %v2591_v53 = vld [vmem:[%s6869_s22 + $0x3f8] sm:$0xff] }
 0xe58   :  { %4854 = vmatprep.subr.mxu1 %v4941_v5  ;;  %4380 = vmatpush3.msra.mxu0 %v2473_v41  ;;  %v2570_v41 = vld [vmem:[%s6869_s22 + $0x350] sm:$0xff] }
 0xe59   :  { %4855 = vmatpush3.msra.mxu1 %v2593_v57  ;;  %4381 = vmatprep.subr.mxu0 %v2488_v14  ;;  %v2471_v57 = vld [vmem:[%s6869_s22 + $0x38] sm:$0xff]  ;;  %v2585_v14 = vld [vmem:[%s6869_s22 + $0x3c8] sm:$0xff] }
 0xe5a   :  { %4856 = vmatprep.subr.mxu1 %v4941_v5  ;;  %4382 = vmatpush3.msra.mxu0 %v2472_v50 }
 0xe5b   :  { %4857 = vmatpush3.msra.mxu1 %v2592_v58  ;;  %4383 = vmatprep.subr.mxu0 %v2487_v52  ;;  %v2486_v58 = vld [vmem:[%s6869_s22 + $0xb0] sm:$0xff]  ;;  %v2568_v52 = vld [vmem:[%s6869_s22 + $0x340] sm:$0xff] }
 0xe5c   :  { %4859 = vmatmul.mubr.msk.f32.vlgmr.msra.gmra.mxu1 %vm281_vm5, %v5534_v35  ;;  %4402 = vmatprep.subr.mxu1 %v2527_v59  ;;  %v2514_v35 = vld [vmem:[%s6869_s22 + $0x190] sm:$0xff] }
 0xe5d   :  { %4403 = vmatpush3.msra.mxu1 %v2511_v61  ;;  %4384 = vmatpush3.msra.mxu0 %v2471_v57  ;;  %v2470_v59 = vld [vmem:[%s6869_s22 + $0x30] sm:$0xff]  ;;  %v2485_v61 = vld [vmem:[%s6869_s22 + $0xa8] sm:$0xff]  ;;  %v2583_v57 = vld [vmem:[%s6869_s22 + $0x3b8] sm:$0xff] }
 0xe5e   :  { %4404 = vmatprep.subr.mxu1 %v2526_v63  ;;  %4385 = vmatprep.subr.mxu0 %v2486_v58  ;;  %v2469_v63 = vld [vmem:[%s6869_s22 + $0x28] sm:$0xff] }
 0xe5f   :  { %4405 = vmatpush3.msra.mxu1 %v2510_v6  ;;  %4386 = vmatpush3.msra.mxu0 %v2470_v59  ;;  %v2484_v6 = vld [vmem:[%s6869_s22 + $0xa0] sm:$0xff]  ;;  %v2567_v59 = vld [vmem:[%s6869_s22 + $0x338] sm:$0xff] }
 0xe60   :  { %4406 = vmatprep.subr.mxu1 %v2525_v8  ;;  %4387 = vmatprep.subr.mxu0 %v2485_v61  ;;  %v2468_v8 = vld [vmem:[%s6869_s22 + $0x20] sm:$0xff] }
 0xe61   :  { %4407 = vmatpush3.msra.mxu1 %v2509_v10  ;;  %4388 = vmatpush3.msra.mxu0 %v2469_v63  ;;  %v2483_v10 = vld [vmem:[%s6869_s22 + $0x98] sm:$0xff] }
 0xe62   :  { %4408 = vmatprep.subr.mxu1 %v2524_v11  ;;  %4389 = vmatprep.subr.mxu0 %v2484_v6  ;;  %v2467_v11 = vld [vmem:[%s6869_s22 + $0x18] sm:$0xff]  ;;  %v2582_v6 = vld [vmem:[%s6869_s22 + $0x3b0] sm:$0xff] }
 0xe63   :  { %4409 = vmatpush3.msra.mxu1 %v2508_v12  ;;  %4390 = vmatpush3.msra.mxu0 %v2468_v8  ;;  %v2482_v12 = vld [vmem:[%s6869_s22 + $0x90] sm:$0xff]  ;;  %v2543_v63 = vld [vmem:[%s6869_s22 + $0x278] sm:$0xff] }
 0xe64   :  { %4410 = vmatprep.subr.mxu1 %v2523_v13  ;;  %4391 = vmatprep.subr.mxu0 %v2483_v10  ;;  %v2466_v13 = vld [vmem:[%s6869_s22 + $0x10] sm:$0xff] }
 0xe65   :  { %4411 = vmatpush3.msra.mxu1 %v2507_v15  ;;  %4392 = vmatpush3.msra.mxu0 %v2467_v11  ;;  %v2481_v15 = vld [vmem:[%s6869_s22 + $0x88] sm:$0xff]  ;;  %v2558_v8 = vld [vmem:[%s6869_s22 + $0x2f0] sm:$0xff] }
 0xe66   :  { %4412 = vmatprep.subr.mxu1 %v2522_v16  ;;  %4393 = vmatprep.subr.mxu0 %v2482_v12  ;;  %v2465_v16 = vld [vmem:[%s6869_s22 + $0x8] sm:$0xff]  ;;  %v2566_v10 = vld [vmem:[%s6869_s22 + $0x330] sm:$0xff] }
 0xe67   :  { %4413 = vmatpush3.msra.mxu1 %v2506_v17  ;;  %4394 = vmatpush3.msra.mxu0 %v2466_v13  ;;  %v2480_v17 = vld [vmem:[%s6869_s22 + $0x80] sm:$0xff]  ;;  %v2542_v11 = vld [vmem:[%s6869_s22 + $0x270] sm:$0xff]  ;;  %v2581_v12 = vld [vmem:[%s6869_s22 + $0x3a8] sm:$0xff] }
 0xe68   :  { %4414 = vmatprep.subr.mxu1 %v2521_v60  ;;  %4395 = vmatprep.subr.mxu0 %v2481_v15  ;;  %v2464_v60 = vld [vmem:[%s6869_s22] sm:$0xff]  ;;  %v2557_v13 = vld [vmem:[%s6869_s22 + $0x2e8] sm:$0xff] }
 0xe69   :  { %4415 = vmatpush3.msra.mxu1 %v2505_v62  ;;  %4396 = vmatpush3.msra.mxu0 %v2465_v16  ;;  %v2559_v62 = vld [vmem:[%s6869_s22 + $0x2f8] sm:$0xff]  ;;  %v2565_v15 = vld [vmem:[%s6869_s22 + $0x328] sm:$0xff] }
 0xe6a   :  { %4416 = vmatprep.subr.mxu1 %v2520_v18  ;;  %4397 = vmatprep.subr.mxu0 %v2480_v17  ;;  %v2541_v17 = vld [vmem:[%s6869_s22 + $0x268] sm:$0xff] }
 0xe6b   :  { %4417 = vmatpush3.msra.mxu1 %v2504_v19  ;;  %4398 = vmatpush3.msra.mxu0 %v2464_v60  ;;  %v2580_v60 = vld [vmem:[%s6869_s22 + $0x3a0] sm:$0xff] }
 0xe6c   :  { %4418 = vmatprep.subr.mxu1 %v2519_v20  ;;  %4437 = vmatprep.subr.mxu0 %v2559_v62  ;;  %v2556_v62 = vld [vmem:[%s6869_s22 + $0x2e0] sm:$0xff] }
 0xe6d   :  { %4419 = vmatpush3.msra.mxu1 %v2503_v21 }
 0xe6e   :  { %4420 = vmatprep.subr.mxu1 %v2518_v22 }
 0xe6f   :  { %4421 = vmatpush3.msra.mxu1 %v2502_v23 }
 0xe70   :  { %4422 = vmatprep.subr.mxu1 %v2517_v25 }
 0xe71   :  { %4423 = vmatpush3.msra.mxu1 %v2501_v28 }
 0xe72   :  { %4424 = vmatprep.subr.mxu1 %v2516_v4  ;;  %v2590_v4 = vld [vmem:[%s6869_s22 + $0x3f0] sm:$0xff] }
 0xe73   :  { %4425 = vmatpush3.msra.mxu1 %v2500_v30  ;;  %v2589_v30 = vld [vmem:[%s6869_s22 + $0x3e8] sm:$0xff] }
 0xe74   :  { %4426 = vmatprep.subr.mxu1 %v2515_v54  ;;  %v2588_v54 = vld [vmem:[%s6869_s22 + $0x3e0] sm:$0xff] }
 0xe75   :  { %4427 = vmatpush3.msra.mxu1 %v2499_v32  ;;  %v2572_v32 = vld [vmem:[%s6869_s22 + $0x360] sm:$0xff] }
 0xe76   :  { %4428 = vmatprep.subr.mxu1 %v2514_v35  ;;  %v2587_v35 = vld [vmem:[%s6869_s22 + $0x3d8] sm:$0xff] }
 0xe77   :  { %4429 = vmatpush3.msra.mxu1 %v2498_v37  ;;  %v2571_v37 = vld [vmem:[%s6869_s22 + $0x358] sm:$0xff] }
 0xe78   :  { %4430 = vmatprep.subr.mxu1 %v2513_v40  ;;  %v2586_v40 = vld [vmem:[%s6869_s22 + $0x3d0] sm:$0xff] }
 0xe79   :  { %4431 = vmatpush3.msra.mxu1 %v2497_v43 }
 0xe7a   :  { %4432 = vmatprep.subr.mxu1 %v2512_v48  ;;  %v2569_v48 = vld [vmem:[%s6869_s22 + $0x348] sm:$0xff] }
 0xe7b   :  { %4433 = vmatpush3.msra.mxu1 %v2496_v51  ;;  %v2584_v51 = vld [vmem:[%s6869_s22 + $0x3c0] sm:$0xff] }
 0xe7c   :  { %4472 = vmatprep.subr.mxu1 %v2591_v53 }
 0xef1   :  { %v6020_v18 = vpop.f32.mrf.mxu1  ;;  %v6022_v19 = vpop.f32.mrf.mxu0 }
 0xef3   :  { %v6024_v20 = vpop.f32.mrf.mxu1  ;;  %v6026_v21 = vpop.f32.mrf.mxu0 }
 0xefa   :  { %v6028_v22 = vpop.f32.mrf.mxu1 }
 0xefb   :  { %v2309_v23 = vpop.f32.mrf.mxu0 }
 0xefc   :  { %v6030_v24 = vpop.f32.mrf.mxu1  ;;  %v2458_v28 = vmul.f32 %v2309_v23, %v6028_v22  ;;  %v2564_v23 = vld [vmem:[%s6869_s22 + $0x320] sm:$0xff] }
 0xefd   :  { %v2311_v25 = vpop.f32.mrf.mxu0 }
 0xefe   :  { %v2459_v26 = vmul.f32 %v2311_v25, %v6030_v24 }
 0xf00   :  { %2800 = vmatprep.mubr.f32.mxu1 %v2459_v26  ;;  %v2540_v26 = vld [vmem:[%s6869_s22 + $0x260] sm:$0xff] }
 0xf01   :  { %2801 = vmatmul.mubr.f32.vlgmr.msra.gmra.mxu1 %v2458_v28 }
 0xf02   :  { %4473 = vmatpush3.msra.mxu1 %v2575_v2  ;;  %v2555_v2 = vld [vmem:[%s6869_s22 + $0x2d8] sm:$0xff] }
 0xf03   :  { %4474 = vmatprep.subr.mxu1 %v2590_v4  ;;  %v2579_v4 = vld [vmem:[%s6869_s22 + $0x398] sm:$0xff] }
 0xf04   :  { %4475 = vmatpush3.msra.mxu1 %v2574_v29  ;;  %v6057_v33 = vpop.f32.mrf.mxu1  ;;  %v2539_v29 = vld [vmem:[%s6869_s22 + $0x258] sm:$0xff] }
 0xf05   :  { %v6052_v55 = vpop.f32.mrf.mxu0  ;;  %4476 = vmatprep.subr.mxu1 %v2589_v30  ;;  %v2563_v30 = vld [vmem:[%s6869_s22 + $0x318] sm:$0xff] }
 0xf06   :  { %4477 = vmatpush3.msra.mxu1 %v2573_v31  ;;  %v6072_v43 = vpop.f32.mrf.mxu1  ;;  %v2554_v31 = vld [vmem:[%s6869_s22 + $0x2d0] sm:$0xff] }
 0xf07   :  { %v2453_v36 = vpop.f32.mrf.mxu0  ;;  %4478 = vmatprep.subr.mxu1 %v2588_v54  ;;  %v2578_v54 = vld [vmem:[%s6869_s22 + $0x390] sm:$0xff] }
 0xf08   :  { %v2463_v39 = vmul.f32 %v2453_v36, %v6026_v21  ;;  %4479 = vmatpush3.msra.mxu1 %v2572_v32  ;;  %v2538_v32 = vld [vmem:[%s6869_s22 + $0x250] sm:$0xff]  ;;  %v2553_v36 = vld [vmem:[%s6869_s22 + $0x2c8] sm:$0xff] }
 0xf09   :  { %4480 = vmatprep.subr.mxu1 %v2587_v35  ;;  %v2562_v35 = vld [vmem:[%s6869_s22 + $0x310] sm:$0xff] }
 0xf0a   :  { %2940 = vmatprep.mubr.f32.mxu1 %v2463_v39  ;;  %4481 = vmatpush3.msra.mxu1 %v2571_v37  ;;  %v2577_v37 = vld [vmem:[%s6869_s22 + $0x388] sm:$0xff] }
 0xf0b   :  { %4482 = vmatprep.subr.mxu1 %v2586_v40  ;;  %v2537_v40 = vld [vmem:[%s6869_s22 + $0x248] sm:$0xff] }
 0xf0c   :  { %v2238_v50 = vpop.f32.mrf.mxu1  ;;  %4483 = vmatpush3.msra.mxu1 %v2570_v41  ;;  %v2561_v41 = vld [vmem:[%s6869_s22 + $0x308] sm:$0xff] }
 0xf0d   :  { %4484 = vmatprep.subr.mxu1 %v2585_v14  ;;  %v2456_v61 = vmul.f32 %v2238_v50, %v6020_v18  ;;  %v2552_v14 = vld [vmem:[%s6869_s22 + $0x2c0] sm:$0xff] }
 0xf0e   :  { %v2240_v53 = vpop.f32.mrf.mxu1  ;;  %4485 = vmatpush3.msra.mxu1 %v2569_v48  ;;  %v2576_v48 = vld [vmem:[%s6869_s22 + $0x380] sm:$0xff] }
 0xf0f   :  { %v2457_v58 = vmul.f32 %v2240_v53, %v6024_v20  ;;  %4486 = vmatprep.subr.mxu1 %v2584_v51  ;;  %v2536_v51 = vld [vmem:[%s6869_s22 + $0x240] sm:$0xff]  ;;  %v2551_v53 = vld [vmem:[%s6869_s22 + $0x2b8] sm:$0xff] }
 0xf10   :  { %4487 = vmatpush3.msra.mxu1 %v2568_v52  ;;  %v2560_v52 = vld [vmem:[%s6869_s22 + $0x300] sm:$0xff] }
 0xf11   :  { %2730 = vmatprep.mubr.f32.mxu0 %v2457_v58  ;;  %4488 = vmatprep.subr.mxu1 %v2583_v57  ;;  %v2462_v57 = vmul.f32 %v6052_v55, %v6022_v19  ;;  %v2535_v58 = vld [vmem:[%s6869_s22 + $0x238] sm:$0xff]  ;;  %v2549_v55 = vld [vmem:[%s6869_s22 + $0x2a8] sm:$0xff] }
 0xf12   :  { %2731 = vmatmul.mubr.f32.vlgmr.msra.gmra.mxu0 %v2456_v61  ;;  %4489 = vmatpush3.msra.mxu1 %v2567_v59  ;;  %v2550_v59 = vld [vmem:[%s6869_s22 + $0x2b0] sm:$0xff] }
 0xf13   :  { %4438 = vmatpush3.msra.mxu0 %v2543_v63  ;;  %4490 = vmatprep.subr.mxu1 %v2582_v6  ;;  %v2534_v61 = vld [vmem:[%s6869_s22 + $0x230] sm:$0xff]  ;;  %v2533_v63 = vld [vmem:[%s6869_s22 + $0x228] sm:$0xff]  ;;  %v2548_v6 = vld [vmem:[%s6869_s22 + $0x2a0] sm:$0xff] }
 0xf14   :  { %4439 = vmatprep.subr.mxu0 %v2558_v8  ;;  %v6118_v16 = vpop.f32.mrf.mxu1  ;;  %4491 = vmatpush3.msra.mxu1 %v2566_v10  ;;  %v2532_v8 = vld [vmem:[%s6869_s22 + $0x220] sm:$0xff]  ;;  %v2547_v10 = vld [vmem:[%s6869_s22 + $0x298] sm:$0xff] }
 0xf15   :  { %4440 = vmatpush3.msra.mxu0 %v2542_v11  ;;  %4492 = vmatprep.subr.mxu1 %v2581_v12  ;;  %v2531_v11 = vld [vmem:[%s6869_s22 + $0x218] sm:$0xff]  ;;  %v2546_v12 = vld [vmem:[%s6869_s22 + $0x290] sm:$0xff] }
 0xf16   :  { %4441 = vmatprep.subr.mxu0 %v2557_v13  ;;  %v2382_v25 = vpop.f32.mrf.mxu1  ;;  %4493 = vmatpush3.msra.mxu1 %v2565_v15  ;;  %v2530_v13 = vld [vmem:[%s6869_s22 + $0x210] sm:$0xff]  ;;  %v2545_v15 = vld [vmem:[%s6869_s22 + $0x288] sm:$0xff] }
 0xf17   :  { %v2461_v28 = vmul.f32 %v2382_v25, %v6072_v43  ;;  %4442 = vmatpush3.msra.mxu0 %v2541_v17  ;;  %4494 = vmatprep.subr.mxu1 %v2580_v60  ;;  %v2528_v17 = vld [vmem:[%s6869_s22 + $0x200] sm:$0xff]  ;;  %v2460_v60 = vmul.f32 %v6118_v16, %v6057_v33  ;;  %v2947_v16 = vld [vmem:[%s6871_s24 + $0x8] sm:$0xff] }
 0xf18   :  { %4443 = vmatprep.subr.mxu0 %v2556_v62  ;;  %4495 = vmatpush3.msra.mxu1 %v2564_v23  ;;  %v2949_v62 = vld [vmem:[%s6871_s24 + $0x18] sm:$0xff]  ;;  %v2948_v23 = vld [vmem:[%s6871_s24 + $0x10] sm:$0xff]  ;;  %v2946_v25 = vld [vmem:[%s6871_s24] sm:$0xff] }
 0xf19   :  { %4444 = vmatpush3.msra.mxu0 %v2540_v26  ;;  %2870 = vmatprep.mubr.f32.mxu0 %v2461_v28 }
 0xf1a   :  { %4445 = vmatprep.subr.mxu0 %v2555_v2  ;;  %4496 = vmatprep.subr.mxu1 %v2579_v4 }
 0xf1b   :  { %4446 = vmatpush3.msra.mxu0 %v2539_v29  ;;  %4497 = vmatpush3.msra.mxu1 %v2563_v30 }
 0xf1c   :  { %4447 = vmatprep.subr.mxu0 %v2554_v31  ;;  %4498 = vmatprep.subr.mxu1 %v2578_v54  ;;  %v6166_v39 = vpop.f32.mrf.mxu1 }
 0xf1d   :  { %4448 = vmatpush3.msra.mxu0 %v2538_v32  ;;  %4499 = vmatpush3.msra.mxu1 %v2562_v35 }
 0xf1e   :  { %4449 = vmatprep.subr.mxu0 %v2553_v36  ;;  %4500 = vmatprep.subr.mxu1 %v2577_v37  ;;  %v4860_v50 = vpop.f32.mrf.mxu1 }
 0xf1f   :  { %4450 = vmatpush3.msra.mxu0 %v2537_v40  ;;  %4501 = vmatpush3.msra.mxu1 %v2561_v41  ;;  %v4088_v40 = vld [vmem:[%s6872_s25] ss:$0 sm:$0xff] }
 0xf20   :  { %4451 = vmatprep.subr.mxu0 %v2552_v14  ;;  %4502 = vmatprep.subr.mxu1 %v2576_v48 }
 0xf21   :  { %4452 = vmatpush3.msra.mxu0 %v2536_v51  ;;  %4503 = vmatpush3.msra.mxu1 %v2560_v52 }
 0xf22   :  { %4453 = vmatprep.subr.mxu0 %v2551_v53  ;;  %2941 = vmatmul.mubr.f32.vlgmr.msra.gmra.mxu1 %v2462_v57  ;;  %v4254_v53 = vld [vmem:[%s6870_s23 + $0x20] sm:$0xff] }
 0xf23   :  { %4454 = vmatpush3.msra.mxu0 %v2535_v58  ;;  %4090 = vmatprep.subr.msk.mxu1 %vm1811_vm8, %v4949_v27  ;;  %vm6929_vm8 = vcmp.eq.s32.totalorder %v5532_v34, %v5446_v9  ;;  %v4154_v57 = vld [vmem:[%s6869_s22 + $0x4e0] sm:$0xff]  ;;  %v4189_v58 = vld [vmem:[%s6869_s22 + $0x5f8] sm:$0xff] }
 0xf24   :  { %4455 = vmatprep.subr.mxu0 %v2550_v59  ;;  %4091 = vmatpush1.msk.msra.mxu1 %vm1810_vm10, %v4949_v27  ;;  %vm6930_vm10 = vcmp.eq.s32.totalorder %v5514_v7, %v5247_v3  ;;  %v4173_v59 = vld [vmem:[%s6869_s22 + $0x578] sm:$0xff] }
 0xf25   :  { %4456 = vmatpush3.msra.mxu0 %v2534_v61  ;;  %4092 = vmatprep.subr.msk.mxu1 %vm1803_vm15, %v4949_v27  ;;  %vm6931_vm15 = vcmp.eq.s32.totalorder %v5532_v34, %v5247_v3  ;;  %v4138_v61 = vld [vmem:[%s6869_s22 + $0x460] sm:$0xff] }
 0xf26   :  { %4457 = vmatprep.subr.mxu0 %v2549_v55  ;;  %4093 = vmatpush1.msk.msra.mxu1 %vm1802_vm4, %v4949_v27  ;;  %vm6932_vm4 = vcmp.eq.s32.totalorder %v5514_v7, %v5244_v1  ;;  %v4188_v55 = vld [vmem:[%s6869_s22 + $0x5f0] sm:$0xff] }
 0xf27   :  { %4458 = vmatpush3.msra.mxu0 %v2533_v63  ;;  %4094 = vmatprep.subr.msk.mxu1 %vm1795_vm1, %v4949_v27  ;;  %vm6925_vm1 = vcmp.eq.s32.totalorder %v5716_v47, %v5437_v0  ;;  %v4155_v47 = vld [vmem:[%s6869_s22 + $0x4e8] sm:$0xff]  ;;  %v4153_v63 = vld [vmem:[%s6869_s22 + $0x4d8] sm:$0xff] }
 0xf28   :  { %4459 = vmatprep.subr.mxu0 %v2548_v6  ;;  %4095 = vmatpush1.msk.msra.mxu1 %vm1794_vm2, %v4949_v27  ;;  %vm6927_vm2 = vcmp.eq.s32.totalorder %v5532_v34, %v5437_v0  ;;  %v4172_v6 = vld [vmem:[%s6869_s22 + $0x570] sm:$0xff] }
 0xf29   :  { %4460 = vmatpush3.msra.mxu0 %v2532_v8  ;;  %4096 = vmatprep.subr.msk.mxu1 %vm1787_vm6, %v4949_v27  ;;  %vm6928_vm6 = vcmp.eq.s32.totalorder %v5514_v7, %v5446_v9  ;;  %v4137_v8 = vld [vmem:[%s6869_s22 + $0x458] sm:$0xff] }
 0xf2a   :  { %4461 = vmatprep.subr.mxu0 %v2547_v10  ;;  %4097 = vmatpush1.msk.msra.mxu1 %vm1786_vm14, %v4949_v27  ;;  %vm6926_vm14 = vcmp.eq.s32.totalorder %v5514_v7, %v5437_v0  ;;  %v4187_v10 = vld [vmem:[%s6869_s22 + $0x5e8] sm:$0xff] }
 0xf2b   :  { %4462 = vmatpush3.msra.mxu0 %v2531_v11  ;;  %3096 = vmatprep.mubr.f32.mxu1 %v4941_v5  ;;  %v4152_v11 = vld [vmem:[%s6869_s22 + $0x4d0] sm:$0xff] }
 0xf2c   :  { %4463 = vmatprep.subr.mxu0 %v2546_v12  ;;  %4108 = vmatprep.subr.msk.mxu1 %vm6925_vm1, %v4949_v27  ;;  %vm6933_vm1 = vcmp.eq.s32.totalorder %v5532_v34, %v5244_v1  ;;  %v4171_v12 = vld [vmem:[%s6869_s22 + $0x568] sm:$0xff] }
 0xf2d   :  { %4464 = vmatpush3.msra.mxu0 %v2530_v13  ;;  %v4136_v13 = vld [vmem:[%s6869_s22 + $0x450] sm:$0xff] }
 0xf2e   :  { %4465 = vmatprep.subr.mxu0 %v2545_v15  ;;  %v4186_v15 = vld [vmem:[%s6869_s22 + $0x5e0] sm:$0xff] }
 0xf2f   :  { %4466 = vmatpush3.msra.mxu0 %v2529_v45  ;;  %v4151_v45 = vld [vmem:[%s6869_s22 + $0x4c8] sm:$0xff] }
 0xf30   :  { %4467 = vmatprep.subr.mxu0 %v2544_v46  ;;  %v4170_v46 = vld [vmem:[%s6869_s22 + $0x560] sm:$0xff] }
 0xf31   :  { %4468 = vmatpush3.msra.mxu0 %v2528_v17  ;;  %v4135_v17 = vld [vmem:[%s6869_s22 + $0x448] sm:$0xff] }
 0xf32   :  { %2871 = vmatmul.mubr.f32.vlgmr.msra.gmra.mxu0 %v2460_v60  ;;  %4861 = vmatprep.subr.mxu0 %v4941_v5  ;;  %v4185_v60 = vld [vmem:[%s6869_s22 + $0x5d8] sm:$0xff] }
 0xf33   :  { %4862 = vmatpush3.msra.mxu0 %v2949_v62  ;;  %4869 = vmatprep.mubr.msk.f32.mxu0 %vm4942_vm0, %v4941_v5  ;;  %v4150_v62 = vld [vmem:[%s6869_s22 + $0x4c0] sm:$0xff] }
 0xf34   :  { %4863 = vmatprep.subr.mxu0 %v4941_v5 }
 0xf35   :  { %4864 = vmatpush3.msra.mxu0 %v2948_v23  ;;  %v4169_v23 = vld [vmem:[%s6869_s22 + $0x558] sm:$0xff] }
 0xf36   :  { %4865 = vmatprep.subr.mxu0 %v4941_v5 }
 0xf37   :  { %4866 = vmatpush3.msra.mxu0 %v2947_v16  ;;  %v4134_v16 = vld [vmem:[%s6869_s22 + $0x440] sm:$0xff] }
 0xf38   :  { %4867 = vmatprep.subr.mxu0 %v4941_v5 }
 0xf39   :  { %4868 = vmatpush3.msra.mxu0 %v2946_v25  ;;  %v4184_v25 = vld [vmem:[%s6869_s22 + $0x5d0] sm:$0xff] }
 0xf3a   :  { %4870 = vmatmul.mubr.msk.f32.vlgmr.msra.gmra.mxu0 %vm281_vm5, %v5542_v38  ;;  %4099 = vmatprep.subr.msk.mxu0 %vm6926_vm14, %v4949_v27  ;;  %vm6934_vm14 = vcmp.eq.s32.totalorder %v5583_v42, %v5437_v0 }
 0xf3b   :  { %4100 = vmatpush1.msk.msra.mxu0 %vm6927_vm2, %v4949_v27  ;;  %3167 = vmatprep.mubr.f32.mxu0 %v4941_v5  ;;  %vm6935_vm2 = vcmp.eq.s32.totalorder %v5729_v49, %v5437_v0  ;;  %v4139_v49 = vld [vmem:[%s6869_s22 + $0x468] sm:$0xff] }
 0xf3c   :  { %4101 = vmatprep.subr.msk.mxu0 %vm6928_vm6, %v4949_v27  ;;  %vm6936_vm6 = vcmp.eq.s32.totalorder %v5593_v44, %v5437_v0  ;;  %v4157_v0 = vld [vmem:[%s6869_s22 + $0x4f8] sm:$0xff] }
 0xf3d   :  { %4102 = vmatpush1.msk.msra.mxu0 %vm6929_vm8, %v4949_v27  ;;  %vm6937_vm8 = vcmp.eq.s32.totalorder %v5583_v42, %v5446_v9 }
 0xf3e   :  { %4103 = vmatprep.subr.msk.mxu0 %vm6930_vm10, %v4949_v27  ;;  %vm6938_vm10 = vcmp.eq.s32.totalorder %v5593_v44, %v5446_v9  ;;  %v4141_v9 = vld [vmem:[%s6869_s22 + $0x478] sm:$0xff] }
 0xf3f   :  { %4104 = vmatpush1.msk.msra.mxu0 %vm6931_vm15, %v4949_v27 }
 0xf40   :  { %4105 = vmatprep.subr.msk.mxu0 %vm6932_vm4, %v4949_v27 }
 0xf41   :  { %4106 = vmatpush1.msk.msra.mxu0 %vm6933_vm1, %v4949_v27 }
 0xf42   :  { %4117 = vmatprep.subr.msk.mxu0 %vm6934_vm14, %v4949_v27 }
 0xfc1   :  { %v4434_v2 = vpop.f32.mrf.mxu1 }
 0xfc3   :  { %v4435_v29 = vpop.f32.mrf.mxu1 }
 0xfc4   :  { %v4436_v54 = vadd.f32 %v4435_v29, %v4434_v2  ;;  %v4133_v2 = vld [vmem:[%s6869_s22 + $0x438] sm:$0xff]  ;;  %v4148_v29 = vld [vmem:[%s6869_s22 + $0x4b0] sm:$0xff] }
 0xfd2   :  { %v4399_v26 = vpop.f32.mrf.mxu0 }
 0xfd4   :  { %v4400_v28 = vpop.f32.mrf.mxu0 }
 0xfd5   :  { %v4401_v4 = vadd.f32 %v4400_v28, %v4399_v26  ;;  %v4149_v26 = vld [vmem:[%s6869_s22 + $0x4b8] sm:$0xff]  ;;  %v4168_v28 = vld [vmem:[%s6869_s22 + $0x550] sm:$0xff] }
 0xfd7   :  { %v2733_v30 = vadd.f32 %v4401_v4, %v6166_v39  ;;  %v4183_v4 = vld [vmem:[%s6869_s22 + $0x5c8] sm:$0xff] }
 0xfd9   :  { %v2803_v35 = vadd.f32 %v4436_v54, %v2733_v30  ;;  %v4167_v30 = vld [vmem:[%s6869_s22 + $0x548] sm:$0xff] }
 0xfda   :  { %v4147_v54 = vld [vmem:[%s6869_s22 + $0x4a8] sm:$0xff] }
 0xfe2   :  { %v4504_v31 = vpop.f32.mrf.mxu1 }
 0xfe4   :  { %v4505_v34 = vpop.f32.mrf.mxu1 }
 0xfe5   :  { %v4506_v41 = vadd.f32 %v4505_v34, %v4504_v31  ;;  %v4132_v31 = vld [vmem:[%s6869_s22 + $0x430] sm:$0xff]  ;;  %v4146_v34 = vld [vmem:[%s6869_s22 + $0x4a0] sm:$0xff] }
 0xff2   :  { %v4469_v7 = vpop.f32.mrf.mxu0 }
 0xff4   :  { %v4470_v32 = vpop.f32.mrf.mxu0 }
 0xff5   :  { %v4471_v36 = vadd.f32 %v4470_v32, %v4469_v7  ;;  %v4182_v7 = vld [vmem:[%s6869_s22 + $0x5c0] sm:$0xff] }
 0xff6   :  { %v4166_v32 = vld [vmem:[%s6869_s22 + $0x540] sm:$0xff] }
 0xff7   :  { %v2873_v37 = vadd.f32 %v4471_v36, %v2803_v35  ;;  %v4131_v35 = vld [vmem:[%s6869_s22 + $0x428] sm:$0xff]  ;;  %v4181_v36 = vld [vmem:[%s6869_s22 + $0x5b8] sm:$0xff] }
 0xff9   :  { %v2943_v48 = vadd.f32 %v4506_v41, %v2873_v37  ;;  %v4165_v37 = vld [vmem:[%s6869_s22 + $0x538] sm:$0xff]  ;;  %v4180_v41 = vld [vmem:[%s6869_s22 + $0x5b0] sm:$0xff] }
 0xffa   :  { %v3023_v14 = vpop.f32.mrf.mxu0 }
 0xffb   :  { %v3024_v50 = vadd.f32 %v4088_v40, %v3023_v14  ;;  %v4130_v40 = vld [vmem:[%s6869_s22 + $0x420] sm:$0xff]  ;;  %v4145_v14 = vld [vmem:[%s6869_s22 + $0x498] sm:$0xff] }
 0xffc   :  { %v4871_v51 = vpop.f32.mrf.mxu0 }
 0xffd   :  { %v3027_v52 = vadd.f32 %v3024_v50, %v2943_v48  ;;  %v4164_v48 = vld [vmem:[%s6869_s22 + $0x530] sm:$0xff]  ;;  %v4129_v50 = vld [vmem:[%s6869_s22 + $0x418] sm:$0xff]  ;;  %v4179_v51 = vld [vmem:[%s6869_s22 + $0x5a8] sm:$0xff] }
 0xfff   :  { %4938 = vtanh.f32 %v3027_v52  ;;  %v4144_v52 = vld [vmem:[%s6869_s22 + $0x490] sm:$0xff] }
0x100c   :  { %v4939_v39 = vpop.eup %4938 }
0x100d   :  { %4098 = vmatmul.mubr.msk.f32.vlgmr.msra.gmra.mxu1 %vm281_vm5, %v4939_v39  ;;  %4107 = vmatmul.mubr.msk.f32.vlgmr.msra.gmra.mxu0 %vm281_vm5, %v4939_v39 }
0x100e   :  { %4109 = vmatpush1.msk.msra.mxu1 %vm6935_vm2, %v4949_v27  ;;  %4118 = vmatpush1.msk.msra.mxu0 %vm6936_vm6, %v4949_v27 }
0x100f   :  { %4110 = vmatprep.subr.msk.mxu1 %vm1807_vm11, %v4949_v27  ;;  %4119 = vmatprep.subr.msk.mxu0 %vm6937_vm8, %v4949_v27  ;;  %vm6939_vm11 = vcmp.eq.s32.totalorder %v5583_v42, %v5247_v3 }
0x1010   :  { %4111 = vmatpush1.msk.msra.mxu1 %vm1806_vm9, %v4949_v27  ;;  %4120 = vmatpush1.msk.msra.mxu0 %vm6938_vm10, %v4949_v27  ;;  %vm6940_vm9 = vcmp.eq.s32.totalorder %v5593_v44, %v5247_v3  ;;  %v4257_v3 = vld [vmem:[%s6870_s23 + $0x38] sm:$0xff] }
0x1011   :  { %4112 = vmatprep.subr.msk.mxu1 %vm1799_vm7, %v4949_v27  ;;  %4121 = vmatprep.subr.msk.mxu0 %vm6939_vm11, %v4949_v27  ;;  %vm6941_vm7 = vcmp.eq.s32.totalorder %v5583_v42, %v5244_v1  ;;  %v4140_v42 = vld [vmem:[%s6869_s22 + $0x470] sm:$0xff] }
0x1012   :  { %4113 = vmatpush1.msk.msra.mxu1 %vm1798_vm3, %v4949_v27  ;;  %4122 = vmatpush1.msk.msra.mxu0 %vm6940_vm9, %v4949_v27  ;;  %vm6942_vm3 = vcmp.eq.s32.totalorder %v5593_v44, %v5244_v1  ;;  %v4256_v1 = vld [vmem:[%s6870_s23 + $0x30] sm:$0xff]  ;;  %v4255_v44 = vld [vmem:[%s6870_s23 + $0x28] sm:$0xff] }
0x1013   :  { %4114 = vmatprep.subr.msk.mxu1 %vm1791_vm12, %v4949_v27  ;;  %4123 = vmatprep.subr.msk.mxu0 %vm6941_vm7, %v4949_v27 }
0x1014   :  { %4115 = vmatpush1.msk.msra.mxu1 %vm1790_vm13, %v4949_v27  ;;  %3238 = vmatprep.mubr.f32.mxu1 %v4941_v5 }
0x1015   :  { %4124 = vmatpush1.msk.msra.mxu0 %vm6942_vm3, %v4949_v27  ;;  %3309 = vmatprep.mubr.f32.mxu0 %v4941_v5  ;;  %v4156_v27 = vld [vmem:[%s6869_s22 + $0x4f0] sm:$0xff] }
0x1016   :  { %4116 = vmatmul.mubr.msk.f32.vlgmr.msra.gmra.mxu1 %vm281_vm5, %v4939_v39  ;;  %4125 = vmatmul.mubr.msk.f32.vlgmr.msra.gmra.mxu0 %vm281_vm5, %v4939_v39 }
0x1017   :  { %4872 = vmatprep.subr.mxu1 %v4941_v5  ;;  %4880 = vmatprep.mubr.msk.f32.mxu1 %vm4942_vm0, %v4941_v5 }
0x1018   :  { %4873 = vmatpush3.msra.mxu1 %v4257_v3  ;;  %4517 = vmatprep.subr.mxu0 %v4157_v0  ;;  %v4178_v3 = vld [vmem:[%s6869_s22 + $0x5a0] sm:$0xff] }
0x1019   :  { %4874 = vmatprep.subr.mxu1 %v4941_v5  ;;  %4518 = vmatpush3.msra.mxu0 %v4141_v9  ;;  %v4162_v0 = vld [vmem:[%s6869_s22 + $0x520] sm:$0xff]  ;;  %v4177_v9 = vld [vmem:[%s6869_s22 + $0x598] sm:$0xff] }
0x101a   :  { %4875 = vmatpush3.msra.mxu1 %v4256_v1  ;;  %4519 = vmatprep.subr.mxu0 %v4156_v27  ;;  %v4161_v1 = vld [vmem:[%s6869_s22 + $0x518] sm:$0xff]  ;;  %v4176_v27 = vld [vmem:[%s6869_s22 + $0x590] sm:$0xff] }
0x101b   :  { %4876 = vmatprep.subr.mxu1 %v4941_v5  ;;  %4520 = vmatpush3.msra.mxu0 %v4140_v42  ;;  %v4128_v42 = vld [vmem:[%s6869_s22 + $0x410] sm:$0xff] }
0x101c   :  { %4877 = vmatpush3.msra.mxu1 %v4255_v44  ;;  %4521 = vmatprep.subr.mxu0 %v4155_v47  ;;  %v4160_v44 = vld [vmem:[%s6869_s22 + $0x510] sm:$0xff]  ;;  %v4143_v47 = vld [vmem:[%s6869_s22 + $0x488] sm:$0xff] }
0x101d   :  { %4878 = vmatprep.subr.mxu1 %v4941_v5  ;;  %4522 = vmatpush3.msra.mxu0 %v4139_v49  ;;  %v4175_v49 = vld [vmem:[%s6869_s22 + $0x588] sm:$0xff] }
0x101e   :  { %4879 = vmatpush3.msra.mxu1 %v4254_v53  ;;  %4523 = vmatprep.subr.mxu0 %v4154_v57  ;;  %v4127_v53 = vld [vmem:[%s6869_s22 + $0x408] sm:$0xff] }
0x101f   :  { %4881 = vmatmul.mubr.msk.f32.vlgmr.msra.gmra.mxu1 %vm281_vm5, %v4939_v39  ;;  %4552 = vmatprep.subr.mxu1 %v4189_v58  ;;  %v4163_v39 = vld [vmem:[%s6869_s22 + $0x528] sm:$0xff]  ;;  %v4142_v58 = vld [vmem:[%s6869_s22 + $0x480] sm:$0xff] }
0x1020   :  { %4553 = vmatpush3.msra.mxu1 %v4173_v59  ;;  %4524 = vmatpush3.msra.mxu0 %v4138_v61  ;;  %v4159_v57 = vld [vmem:[%s6869_s22 + $0x508] sm:$0xff]  ;;  %v4174_v59 = vld [vmem:[%s6869_s22 + $0x580] sm:$0xff] }
0x1021   :  { %4554 = vmatprep.subr.mxu1 %v4188_v55  ;;  %4525 = vmatprep.subr.mxu0 %v4153_v63  ;;  %v4126_v61 = vld [vmem:[%s6869_s22 + $0x400] sm:$0xff]  ;;  %v4221_v63 = vld [vmem:[%s6869_s22 + $0x6f8] sm:$0xff] }
0x1022   :  { %4555 = vmatpush3.msra.mxu1 %v4172_v6  ;;  %4526 = vmatpush3.msra.mxu0 %v4137_v8  ;;  %v4158_v55 = vld [vmem:[%s6869_s22 + $0x500] sm:$0xff]  ;;  %v4253_v6 = vld [vmem:[%s6869_s22 + $0x7f8] sm:$0xff] }
0x1023   :  { %4556 = vmatprep.subr.mxu1 %v4187_v10  ;;  %4527 = vmatprep.subr.mxu0 %v4152_v11 }
0x1024   :  { %4557 = vmatpush3.msra.mxu1 %v4171_v12  ;;  %4528 = vmatpush3.msra.mxu0 %v4136_v13 }
0x1025   :  { %4558 = vmatprep.subr.mxu1 %v4186_v15  ;;  %4529 = vmatprep.subr.mxu0 %v4151_v45 }
0x1026   :  { %4559 = vmatpush3.msra.mxu1 %v4170_v46  ;;  %4530 = vmatpush3.msra.mxu0 %v4135_v17  ;;  %v4205_v17 = vld [vmem:[%s6869_s22 + $0x678] sm:$0xff] }
0x1027   :  { %4560 = vmatprep.subr.mxu1 %v4185_v60  ;;  %4531 = vmatprep.subr.mxu0 %v4150_v62  ;;  %v4237_v60 = vld [vmem:[%s6869_s22 + $0x778] sm:$0xff]  ;;  %v4219_v62 = vld [vmem:[%s6869_s22 + $0x6e8] sm:$0xff] }
0x1028   :  { %4561 = vmatpush3.msra.mxu1 %v4169_v23  ;;  %4532 = vmatpush3.msra.mxu0 %v4134_v16  ;;  %v4251_v23 = vld [vmem:[%s6869_s22 + $0x7e8] sm:$0xff] }
0x1029   :  { %4562 = vmatprep.subr.mxu1 %v4184_v25  ;;  %4533 = vmatprep.subr.mxu0 %v4149_v26  ;;  %v4203_v16 = vld [vmem:[%s6869_s22 + $0x668] sm:$0xff] }
0x102a   :  { %4563 = vmatpush3.msra.mxu1 %v4168_v28  ;;  %4534 = vmatpush3.msra.mxu0 %v4133_v2  ;;  %v4235_v25 = vld [vmem:[%s6869_s22 + $0x768] sm:$0xff]  ;;  %v4218_v2 = vld [vmem:[%s6869_s22 + $0x6e0] sm:$0xff] }
0x102b   :  { %4564 = vmatprep.subr.mxu1 %v4183_v4  ;;  %4535 = vmatprep.subr.mxu0 %v4148_v29  ;;  %v4250_v4 = vld [vmem:[%s6869_s22 + $0x7e0] sm:$0xff] }
0x102c   :  { %4565 = vmatpush3.msra.mxu1 %v4167_v30  ;;  %4536 = vmatpush3.msra.mxu0 %v4132_v31  ;;  %v4202_v29 = vld [vmem:[%s6869_s22 + $0x660] sm:$0xff] }
0x102d   :  { %4566 = vmatprep.subr.mxu1 %v4182_v7  ;;  %4537 = vmatprep.subr.mxu0 %v4147_v54  ;;  %v4234_v30 = vld [vmem:[%s6869_s22 + $0x760] sm:$0xff] }
0x102e   :  { %4567 = vmatpush3.msra.mxu1 %v4166_v32  ;;  %4538 = vmatpush3.msra.mxu0 %v4131_v35  ;;  %v4217_v35 = vld [vmem:[%s6869_s22 + $0x6d8] sm:$0xff] }
0x102f   :  { %4568 = vmatprep.subr.mxu1 %v4181_v36  ;;  %4539 = vmatprep.subr.mxu0 %v4146_v34  ;;  %v4249_v36 = vld [vmem:[%s6869_s22 + $0x7d8] sm:$0xff] }
0x1030   :  { %4569 = vmatpush3.msra.mxu1 %v4165_v37  ;;  %4540 = vmatpush3.msra.mxu0 %v4130_v40  ;;  %v4201_v34 = vld [vmem:[%s6869_s22 + $0x658] sm:$0xff]  ;;  %v4248_v37 = vld [vmem:[%s6869_s22 + $0x7d0] sm:$0xff] }
0x1031   :  { %4570 = vmatprep.subr.mxu1 %v4180_v41  ;;  %4541 = vmatprep.subr.mxu0 %v4145_v14  ;;  %v4200_v40 = vld [vmem:[%s6869_s22 + $0x650] sm:$0xff]  ;;  %v4215_v14 = vld [vmem:[%s6869_s22 + $0x6c8] sm:$0xff] }
0x1032   :  { %4571 = vmatpush3.msra.mxu1 %v4164_v48  ;;  %4542 = vmatpush3.msra.mxu0 %v4129_v50  ;;  %v4232_v41 = vld [vmem:[%s6869_s22 + $0x750] sm:$0xff]  ;;  %v4247_v48 = vld [vmem:[%s6869_s22 + $0x7c8] sm:$0xff] }
0x1033   :  { %4572 = vmatprep.subr.mxu1 %v4179_v51  ;;  %4543 = vmatprep.subr.mxu0 %v4144_v52  ;;  %v4199_v50 = vld [vmem:[%s6869_s22 + $0x648] sm:$0xff] }
0x1034   :  { %4573 = vmatpush3.msra.mxu1 %v4163_v39  ;;  %4544 = vmatpush3.msra.mxu0 %v4128_v42  ;;  %v4231_v51 = vld [vmem:[%s6869_s22 + $0x748] sm:$0xff]  ;;  %v4214_v39 = vld [vmem:[%s6869_s22 + $0x6c0] sm:$0xff]  ;;  %v4245_v42 = vld [vmem:[%s6869_s22 + $0x7b8] sm:$0xff] }
0x1035   :  { %4574 = vmatprep.subr.mxu1 %v4178_v3  ;;  %4545 = vmatprep.subr.mxu0 %v4143_v47  ;;  %v4246_v3 = vld [vmem:[%s6869_s22 + $0x7c0] sm:$0xff]  ;;  %v4229_v47 = vld [vmem:[%s6869_s22 + $0x738] sm:$0xff] }
0x1036   :  { %4575 = vmatpush3.msra.mxu1 %v4162_v0  ;;  %4546 = vmatpush3.msra.mxu0 %v4127_v53  ;;  %v4198_v0 = vld [vmem:[%s6869_s22 + $0x640] sm:$0xff]  ;;  %v4244_v53 = vld [vmem:[%s6869_s22 + $0x7b0] sm:$0xff] }
0x1037   :  { %4576 = vmatprep.subr.mxu1 %v4177_v9  ;;  %4547 = vmatprep.subr.mxu0 %v4142_v58  ;;  %v4230_v9 = vld [vmem:[%s6869_s22 + $0x740] sm:$0xff]  ;;  %v4228_v58 = vld [vmem:[%s6869_s22 + $0x730] sm:$0xff] }
0x1038   :  { %4577 = vmatpush3.msra.mxu1 %v4161_v1  ;;  %4548 = vmatpush3.msra.mxu0 %v4126_v61  ;;  %v4243_v61 = vld [vmem:[%s6869_s22 + $0x7a8] sm:$0xff] }
0x1039   :  { %4578 = vmatprep.subr.mxu1 %v4176_v27  ;;  %4587 = vmatprep.subr.mxu0 %v4221_v63  ;;  %v4213_v27 = vld [vmem:[%s6869_s22 + $0x6b8] sm:$0xff]  ;;  %v4227_v63 = vld [vmem:[%s6869_s22 + $0x728] sm:$0xff] }
0x103a   :  { %4579 = vmatpush3.msra.mxu1 %v4160_v44  ;;  %v4197_v44 = vld [vmem:[%s6869_s22 + $0x638] sm:$0xff] }
0x103b   :  { %4580 = vmatprep.subr.mxu1 %v4175_v49  ;;  %v4212_v49 = vld [vmem:[%s6869_s22 + $0x6b0] sm:$0xff] }
0x103c   :  { %4581 = vmatpush3.msra.mxu1 %v4159_v57  ;;  %v4196_v57 = vld [vmem:[%s6869_s22 + $0x630] sm:$0xff] }
0x103d   :  { %4582 = vmatprep.subr.mxu1 %v4174_v59  ;;  %v4211_v59 = vld [vmem:[%s6869_s22 + $0x6a8] sm:$0xff] }
0x103e   :  { %4583 = vmatpush3.msra.mxu1 %v4158_v55  ;;  %v4195_v55 = vld [vmem:[%s6869_s22 + $0x628] sm:$0xff] }
0x103f   :  { %4622 = vmatprep.subr.mxu1 %v4253_v6  ;;  %v4210_v6 = vld [vmem:[%s6869_s22 + $0x6a0] sm:$0xff] }
0x10cd   :  { %v3098_v8 = vpop.f32.mrf.mxu1  ;;  %v3169_v10 = vpop.f32.mrf.mxu0 }
0x10ce   :  { %v3316_v45 = vmul.f32 %v3098_v8, %v6020_v18  ;;  %v3318_v46 = vmul.f32 %v3169_v10, %v6028_v22  ;;  %v4252_v18 = vld [vmem:[%s6869_s22 + $0x7f0] sm:$0xff]  ;;  %v4242_v8 = vld [vmem:[%s6869_s22 + $0x7a0] sm:$0xff] }
0x10cf   :  { %v3100_v11 = vpop.f32.mrf.mxu1  ;;  %v3171_v12 = vpop.f32.mrf.mxu0  ;;  %v4204_v22 = vld [vmem:[%s6869_s22 + $0x670] sm:$0xff]  ;;  %v4194_v10 = vld [vmem:[%s6869_s22 + $0x620] sm:$0xff] }
0x10d0   :  { %v3317_v13 = vmul.f32 %v3100_v11, %v6024_v20  ;;  %v3319_v15 = vmul.f32 %v3171_v12, %v6030_v24  ;;  %v4220_v20 = vld [vmem:[%s6869_s22 + $0x6f0] sm:$0xff]  ;;  %v4226_v11 = vld [vmem:[%s6869_s22 + $0x720] sm:$0xff]  ;;  %v4209_v12 = vld [vmem:[%s6869_s22 + $0x698] sm:$0xff] }
0x10d1   :  { %v4236_v24 = vld [vmem:[%s6869_s22 + $0x770] sm:$0xff] }
0x10d2   :  { %3592 = vmatprep.mubr.f32.mxu0 %v3317_v13  ;;  %3662 = vmatprep.mubr.f32.mxu1 %v3319_v15  ;;  %v4241_v13 = vld [vmem:[%s6869_s22 + $0x798] sm:$0xff] }
0x10d3   :  { %3593 = vmatmul.mubr.f32.vlgmr.msra.gmra.mxu0 %v3316_v45  ;;  %3663 = vmatmul.mubr.f32.vlgmr.msra.gmra.mxu1 %v3318_v46  ;;  %v4193_v15 = vld [vmem:[%s6869_s22 + $0x618] sm:$0xff]  ;;  %v4208_v46 = vld [vmem:[%s6869_s22 + $0x690] sm:$0xff] }
0x10d4   :  { %4588 = vmatpush3.msra.mxu0 %v4205_v17  ;;  %4623 = vmatpush3.msra.mxu1 %v4237_v60  ;;  %v4225_v45 = vld [vmem:[%s6869_s22 + $0x718] sm:$0xff]  ;;  %v4240_v17 = vld [vmem:[%s6869_s22 + $0x790] sm:$0xff] }
0x10d5   :  { %4589 = vmatprep.subr.mxu0 %v4220_v20  ;;  %4624 = vmatprep.subr.mxu1 %v4252_v18  ;;  %v4192_v60 = vld [vmem:[%s6869_s22 + $0x610] sm:$0xff]  ;;  %v4207_v18 = vld [vmem:[%s6869_s22 + $0x688] sm:$0xff] }
0x10d6   :  { %v6649_v26 = vpop.f32.mrf.mxu1  ;;  %v6651_v28 = vpop.f32.mrf.mxu0  ;;  %4590 = vmatpush3.msra.mxu0 %v4204_v22  ;;  %4625 = vmatpush3.msra.mxu1 %v4236_v24  ;;  %v4224_v20 = vld [vmem:[%s6869_s22 + $0x710] sm:$0xff]  ;;  %v4239_v22 = vld [vmem:[%s6869_s22 + $0x788] sm:$0xff] }
0x10d7   :  { %4591 = vmatprep.subr.mxu0 %v4219_v62  ;;  %4626 = vmatprep.subr.mxu1 %v4251_v23  ;;  %v4191_v24 = vld [vmem:[%s6869_s22 + $0x608] sm:$0xff]  ;;  %v4206_v23 = vld [vmem:[%s6869_s22 + $0x680] sm:$0xff] }
0x10d8   :  { %v3242_v31 = vpop.f32.mrf.mxu1  ;;  %v3313_v7 = vpop.f32.mrf.mxu0  ;;  %4592 = vmatpush3.msra.mxu0 %v4203_v16  ;;  %4627 = vmatpush3.msra.mxu1 %v4235_v25  ;;  %v4223_v62 = vld [vmem:[%s6869_s22 + $0x708] sm:$0xff]  ;;  %v4238_v16 = vld [vmem:[%s6869_s22 + $0x780] sm:$0xff] }
0x10d9   :  { %v3321_v54 = vmul.f32 %v3242_v31, %v6072_v43  ;;  %v3323_v32 = vmul.f32 %v3313_v7, %v6026_v21  ;;  %4593 = vmatprep.subr.mxu0 %v4218_v2  ;;  %4628 = vmatprep.subr.mxu1 %v4250_v4  ;;  %v4233_v21 = vld [vmem:[%s6869_s22 + $0x758] sm:$0xff]  ;;  %v4216_v43 = vld [vmem:[%s6869_s22 + $0x6d0] sm:$0xff]  ;;  %v4190_v25 = vld [vmem:[%s6869_s22 + $0x600] sm:$0xff]  ;;  %v3320_v4 = vmul.f32 %v6649_v26, %v6057_v33 }
0x10da   :  { %4594 = vmatpush3.msra.mxu0 %v4202_v29  ;;  %4629 = vmatpush3.msra.mxu1 %v4234_v30  ;;  %v4222_v2 = vld [vmem:[%s6869_s22 + $0x700] sm:$0xff]  ;;  %v3322_v29 = vmul.f32 %v6651_v28, %v6022_v19  ;;  %v4262_v30 = vld [vmem:[%s6871_s24 + $0x38] sm:$0xff]  ;;  %v4261_v31 = vld [vmem:[%s6871_s24 + $0x30] sm:$0xff] }
0x10db   :  { %3732 = vmatprep.mubr.f32.mxu0 %v3321_v54  ;;  %3802 = vmatprep.mubr.f32.mxu1 %v3323_v32  ;;  %v4260_v19 = vld [vmem:[%s6871_s24 + $0x28] sm:$0xff]  ;;  %v4259_v33 = vld [vmem:[%s6871_s24 + $0x20] sm:$0xff] }
0x10dc   :  { %4595 = vmatprep.subr.mxu0 %v4217_v35  ;;  %4630 = vmatprep.subr.mxu1 %v4249_v36 }
0x10dd   :  { %4596 = vmatpush3.msra.mxu0 %v4201_v34  ;;  %4631 = vmatpush3.msra.mxu1 %v4233_v21 }
0x10de   :  { %4597 = vmatprep.subr.mxu0 %v4216_v43  ;;  %4632 = vmatprep.subr.mxu1 %v4248_v37 }
0x10df   :  { %v6703_v52 = vpop.f32.mrf.mxu1  ;;  %4598 = vmatpush3.msra.mxu0 %v4200_v40  ;;  %4633 = vmatpush3.msra.mxu1 %v4232_v41 }
0x10e0   :  { %4599 = vmatprep.subr.mxu0 %v4215_v14  ;;  %4634 = vmatprep.subr.mxu1 %v4247_v48  ;;  %v3910_v48 = vld [vmem:[%s6873_s9] ss:$0 sm:$0xff] }
0x10e1   :  { %v4882_v1 = vpop.f32.mrf.mxu1  ;;  %4600 = vmatpush3.msra.mxu0 %v4199_v50  ;;  %4635 = vmatpush3.msra.mxu1 %v4231_v51 }
0x10e2   :  { %4601 = vmatprep.subr.mxu0 %v4214_v39  ;;  %4636 = vmatprep.subr.mxu1 %v4246_v3  ;;  %v437_v3 = vadd.f32 %v3910_v48, %v5224_v56 }
0x10e3   :  { %4602 = vmatpush3.msra.mxu0 %v4198_v0  ;;  %4637 = vmatpush3.msra.mxu1 %v4230_v9 }
0x10e4   :  { %4603 = vmatprep.subr.mxu0 %v4213_v27  ;;  %4638 = vmatprep.subr.mxu1 %v4245_v42 }
0x10e5   :  { %4604 = vmatpush3.msra.mxu0 %v4197_v44  ;;  %4639 = vmatpush3.msra.mxu1 %v4229_v47 }
0x10e6   :  { %4605 = vmatprep.subr.mxu0 %v4212_v49  ;;  %4640 = vmatprep.subr.mxu1 %v4244_v53 }
0x10e7   :  { %4606 = vmatpush3.msra.mxu0 %v4196_v57  ;;  %4641 = vmatpush3.msra.mxu1 %v4228_v58 }
0x10e8   :  { %4607 = vmatprep.subr.mxu0 %v4211_v59  ;;  %4642 = vmatprep.subr.mxu1 %v4243_v61 }
0x10e9   :  { %4608 = vmatpush3.msra.mxu0 %v4195_v55  ;;  %4643 = vmatpush3.msra.mxu1 %v4227_v63 }
0x10ea   :  { %4609 = vmatprep.subr.mxu0 %v4210_v6  ;;  %4644 = vmatprep.subr.mxu1 %v4242_v8 }
0x10eb   :  { %4610 = vmatpush3.msra.mxu0 %v4194_v10  ;;  %4645 = vmatpush3.msra.mxu1 %v4226_v11 }
0x10ec   :  { %4611 = vmatprep.subr.mxu0 %v4209_v12  ;;  %4646 = vmatprep.subr.mxu1 %v4241_v13 }
0x10ed   :  { %4612 = vmatpush3.msra.mxu0 %v4193_v15  ;;  %4647 = vmatpush3.msra.mxu1 %v4225_v45 }
0x10ee   :  { %4613 = vmatprep.subr.mxu0 %v4208_v46  ;;  %4648 = vmatprep.subr.mxu1 %v4240_v17 }
0x10ef   :  { %4614 = vmatpush3.msra.mxu0 %v4192_v60  ;;  %4649 = vmatpush3.msra.mxu1 %v4224_v20 }
0x10f0   :  { %4615 = vmatprep.subr.mxu0 %v4207_v18  ;;  %4650 = vmatprep.subr.mxu1 %v4239_v22 }
0x10f1   :  { %4616 = vmatpush3.msra.mxu0 %v4191_v24  ;;  %4651 = vmatpush3.msra.mxu1 %v4223_v62 }
0x10f2   :  { %4617 = vmatprep.subr.mxu0 %v4206_v23  ;;  %4652 = vmatprep.subr.mxu1 %v4238_v16 }
0x10f3   :  { %4618 = vmatpush3.msra.mxu0 %v4190_v25  ;;  %4653 = vmatpush3.msra.mxu1 %v4222_v2 }
0x10f4   :  { %3733 = vmatmul.mubr.f32.vlgmr.msra.gmra.mxu0 %v3320_v4  ;;  %3803 = vmatmul.mubr.f32.vlgmr.msra.gmra.mxu1 %v3322_v29 }
0x10f5   :  { %4883 = vmatprep.subr.mxu0 %v4941_v5  ;;  %4891 = vmatprep.mubr.msk.f32.mxu0 %vm4942_vm0, %v4941_v5  ;;  %vm3893_vm0 = vcmask 254976  }
0x10f6   :  { %4884 = vmatpush3.msra.mxu0 %v4262_v30 }
0x10f7   :  { %4885 = vmatprep.subr.mxu0 %v4941_v5 }
0x10f8   :  { %4886 = vmatpush3.msra.mxu0 %v4261_v31 }
0x10f9   :  { %4887 = vmatprep.subr.mxu0 %v4941_v5 }
0x10fa   :  { %4888 = vmatpush3.msra.mxu0 %v4260_v19 }
0x10fb   :  { %4889 = vmatprep.subr.mxu0 %v4941_v5  ;;  %v4264_v5 = vld [vmem:[%s6872_s25 + $0x1] ss:$0 sm:$0xff] }
0x10fc   :  { %4890 = vmatpush3.msra.mxu0 %v4259_v33 }
0x10fd   :  { %4892 = vmatmul.mubr.msk.f32.vlgmr.msra.gmra.mxu0 %vm281_vm5, %v5542_v38 }
0x1193   :  { %v4549_v26 = vpop.f32.mrf.mxu0  ;;  %v4584_v7 = vpop.f32.mrf.mxu1 }
0x1195   :  { %v4550_v28 = vpop.f32.mrf.mxu0  ;;  %v4585_v32 = vpop.f32.mrf.mxu1 }
0x1196   :  { %v4551_v54 = vadd.f32 %v4550_v28, %v4549_v26  ;;  %v4586_v21 = vadd.f32 %v4585_v32, %v4584_v7 }
0x1198   :  { %v3595_v35 = vadd.f32 %v4551_v54, %v6703_v52 }
0x119a   :  { %v3665_v40 = vadd.f32 %v4586_v21, %v3595_v35 }
0x11b4   :  { %v4619_v36 = vpop.f32.mrf.mxu0  ;;  %v4654_v34 = vpop.f32.mrf.mxu1 }
0x11b6   :  { %v4620_v43 = vpop.f32.mrf.mxu0  ;;  %v4655_v41 = vpop.f32.mrf.mxu1 }
0x11b7   :  { %v4621_v37 = vadd.f32 %v4620_v43, %v4619_v36  ;;  %v4656_v38 = vadd.f32 %v4655_v41, %v4654_v34 }
0x11b9   :  { %v3735_v14 = vadd.f32 %v4621_v37, %v3665_v40 }
0x11bb   :  { %v3805_v51 = vadd.f32 %v4656_v38, %v3735_v14 }
0x11bd   :  { %v3887_v50 = vpop.f32.mrf.mxu0 }
0x11be   :  { %v3888_v52 = vadd.f32 %v4264_v5, %v3887_v50 }
0x11bf   :  { %v4893_v39 = vpop.f32.mrf.mxu0 }
0x11c0   :  { %v3891_v0 = vadd.f32 %v3888_v52, %v3805_v51 }
0x11c2   :  { %v3892_v9 = vmul.f32 %v3891_v0, %v437_v3 }
0x11c4   :  { %v3894_v1 = vsel %vm3893_vm0, %v3892_v9, 0.0 }
0x11c5   :  { %3895 = vadd.xlane.f32.xlu1 %v3894_v1 }
0x124e   :  { %v3896_v27 = vpop.xlane.xlu1 %3895 }
0x124f   :  { %3897 = vst [vmem:[%s6874_s26] sm:$0x3] %v3896_v27 }

</bundles_post_ra>
